<compile_context>
chip_gen: v5e
topology: v5e:2x2
jax: 0.10.0
libtpu: 0.0.40
codegen_flags: <defaults>
</compile_context>

<pallas_src>
import functools
import math

import jax
import jax.numpy as jnp
from jax.experimental import pallas as pl
from jax.experimental.pallas import tpu as pltpu

EPS = 1e-5  # PyTorch nn.LayerNorm default eps


def _ln(x, g, b):
    # PyTorch LayerNorm: biased variance over last dim, computed in f32.
    mu = jnp.mean(x, axis=-1, keepdims=True)
    var = jnp.mean((x - mu) ** 2, axis=-1, keepdims=True)
    return (x - mu) * jax.lax.rsqrt(var + EPS) * g + b


# ----------------------------------------------------------------------------
# Fused ViT kernel: one grid step == one transformer layer.
# ----------------------------------------------------------------------------
def _vit_fused_kernel(
    # layer-constant inputs
    xp_ref, peg1_ref, peb1_ref, pew_ref, pebw_ref, peg2_ref, peb2_ref,
    cls_ref, pos_ref,
    # per-layer stacked inputs (leading depth axis, index_map -> layer id)
    ag_ref, ab_ref, wqkv_ref, wo_ref, bo_ref,
    fg_ref, fb_ref, w1_ref, b1_ref, w2_ref, b2_ref,
    # head inputs
    hg_ref, hb_ref, hw_ref, hbias_ref,
    # outputs
    preds_ref, attn_ref,
    # scratch: residual stream resident in VMEM across all layers
    x_vmem,
):
    lyr = pl.program_id(0)
    B, P, PD = xp_ref.shape
    _, N, D = pos_ref.shape
    _, heads, dh, _ = wo_ref.shape
    inner = heads * dh
    pad_n = attn_ref.shape[-1]          # key axis padded to a 128 multiple
    bf16, f32 = jnp.bfloat16, jnp.float32

    # ---- stage 0: patch embed (LN -> Linear -> LN) + CLS + pos-emb (first step) ----
    @pl.when(lyr == 0)
    def _init():
        pos = pos_ref[0]            # (N, D)
        cls_tok = cls_ref[0]        # (1, D)
        for b in range(B):          # static unroll, B small
            xpn = _ln(xp_ref[b], peg1_ref[0], peb1_ref[0])               # (P, PD) f32
            yb = jnp.dot(xpn.astype(bf16), pew_ref[...],
                         preferred_element_type=f32) + pebw_ref[0]
            yb = _ln(yb, peg2_ref[0], peb2_ref[0])                       # (P, D) f32
            tok = jnp.concatenate([cls_tok + pos[0:1, :], yb + pos[1:, :]], axis=0)
            x_vmem[b * N:(b + 1) * N, :] = tok      # one coalesced (N, D) store

    # ---- one transformer layer per grid step ----
    x = x_vmem[...]                                 # (B*N, D) f32 residual stream

    # Attention: pre-LN, fused QKV projection over the whole stream (2-D lhs, no
    # per-head broadcast), then per-batch / per-head 2-D matmuls with in-place
    # residual accumulation.  q columns were pre-scaled by dh**-0.5 in the wrapper.
    xn = _ln(x, ag_ref[0, 0], ab_ref[0, 0]).astype(bf16)
    qkv = jnp.dot(xn, wqkv_ref[0], preferred_element_type=f32).astype(bf16)   # (B*N, 3*inner)

    if pad_n > N:   # trace-time: build key padding helpers once per layer step
        zpad = jnp.zeros((pad_n - N, 3 * inner), bf16)
        kmask = jax.lax.broadcasted_iota(jnp.int32, (N, pad_n), 1) < N

    for b in range(B):                               # static unroll; fori_loop if B grows
        r0 = b * N
        qkv_b = qkv[r0:r0 + N, :]                    # (N, 3*inner) bf16
        # zero-pad keys/values along rows -> lane-dense (N, pad_n) attention maps
        kv_src = jnp.concatenate([qkv_b, zpad], axis=0) if pad_n > N else qkv_b
        acc = x[r0:r0 + N, :] + bo_ref[0, 0]         # residual + out-proj bias, f32
        for h in range(heads):
            q = qkv_b[:, h * dh:(h + 1) * dh]                               # (N, dh)
            kp = kv_src[:, inner + h * dh: inner + (h + 1) * dh]            # (pad_n, dh)
            vp = kv_src[:, 2 * inner + h * dh: 2 * inner + (h + 1) * dh]    # (pad_n, dh)
            dots = jnp.einsum('nc,mc->nm', q, kp,
                              preferred_element_type=f32)                   # (N, pad_n)
            if pad_n > N:
                dots = jnp.where(kmask, dots, -1e30)                        # mask padding
            dots = dots - jnp.max(dots, axis=-1, keepdims=True)
            e = jnp.exp(dots)                                               # f32 softmax
            a = e / jnp.sum(e, axis=-1, keepdims=True)                      # exact norm
            # full-lane (pad_n is a 128 multiple) bf16 store of the recorded map
            attn_ref[0, b * heads + h] = a.astype(attn_ref.dtype)
            o = jnp.dot(a.astype(bf16), vp, preferred_element_type=f32)     # (N, dh)
            acc = acc + jnp.dot(o.astype(bf16), wo_ref[0, h],
                                preferred_element_type=f32)                 # (N, D)
        x_vmem[r0:r0 + N, :] = acc                   # in-place per-batch residual update

    # Feed-forward: pre-LN -> Linear -> exact GELU -> Linear -> residual
    x2 = x_vmem[...]
    xn2 = _ln(x2, fg_ref[0, 0], fb_ref[0, 0]).astype(bf16)
    h1 = jnp.dot(xn2, w1_ref[0], preferred_element_type=f32) + b1_ref[0, 0]
    # exact GELU (matches nn.GELU()); jax.nn.gelu(approximate=True) would use EUP tanh.
    h1 = 0.5 * h1 * (1.0 + jax.lax.erf(h1 * (1.0 / math.sqrt(2.0))))
    h2 = jnp.dot(h1.astype(bf16), w2_ref[0], preferred_element_type=f32) + b2_ref[0, 0]
    x_new = x2 + h2
    x_vmem[...] = x_new

    # ---- final LN + CLS pooling + classification head (last step only) ----
    @pl.when(lyr == pl.num_programs(0) - 1)
    def _head():
        # Gather only the CLS rows (B rows); concat of single-row slices is cheap here.
        cls_rows = jnp.concatenate([x_new[b * N:b * N + 1, :] for b in range(B)], axis=0)
        cn = _ln(cls_rows, hg_ref[0], hb_ref[0])
        preds_ref[...] = jnp.dot(cn.astype(bf16), hw_ref[...],
                                 preferred_element_type=f32) + hbias_ref[0]


# ----------------------------------------------------------------------------
# Wrapper: patchify glue, weight re-layout (depth-stack, scale fold, bf16) and
# the single pallas_call.
# ----------------------------------------------------------------------------
def basic_vit_forward(img, params, *, patch_size, heads, dim_head):
    B, C, H, W = img.shape
    p = patch_size
    hp, wp = H // p, W // p
    # einops 'b c (h p1) (w p2) -> b (h w) (p1 p2 c)'
    xp = img.reshape(B, C, hp, p, wp, p)
    xp = jnp.transpose(xp, (0, 2, 4, 3, 5, 1))
    xp = xp.reshape(B, hp * wp, p * p * C)                  # (B, P, PD)

    layers = params["layers"]
    depth = len(layers)
    D = params["pe_w"].shape[1]
    P = hp * wp
    N = P + 1
    PD = p * p * C
    inner = heads * dim_head
    mlp = layers[0]["ff_w1"].shape[1]
    NC = params["head_w"].shape[1]
    bf16 = jnp.bfloat16
    pad_n = ((N + 127) // 128) * 128                        # lane-dense attn key axis

    # wrapper-side weight re-layout (one-time, outside the kernel)
    scale = dim_head ** -0.5
    ag = jnp.stack([ly["attn_g"] for ly in layers])                      # (depth, 1, D)
    ab = jnp.stack([ly["attn_b"] for ly in layers])
    # fused QKV slab, with the softmax scale folded into the q columns
    wqkv = jnp.stack([ly["w_qkv"].at[:, :inner].multiply(scale)
                      for ly in layers]).astype(bf16)                    # (depth, D, 3*inner)
    wo = jnp.stack([ly["w_out"].reshape(heads, dim_head, D)
                    for ly in layers]).astype(bf16)                      # (depth, h, dh, D)
    bo = jnp.stack([ly["b_out"] for ly in layers])
    fg = jnp.stack([ly["ff_g"] for ly in layers])
    fb = jnp.stack([ly["ff_b"] for ly in layers])
    w1 = jnp.stack([ly["ff_w1"] for ly in layers]).astype(bf16)          # (depth, D, mlp)
    b1 = jnp.stack([ly["ff_b1"] for ly in layers])                       # (depth, 1, mlp)
    w2 = jnp.stack([ly["ff_w2"] for ly in layers]).astype(bf16)          # (depth, mlp, D)
    b2 = jnp.stack([ly["ff_b2"] for ly in layers])

    pe_w = params["pe_w"].astype(bf16)
    head_w = params["head_w"].astype(bf16)
    pos = params["pos_embedding"][:, :N]

    # BlockSpec helpers
    def const_vec(n):   return pl.BlockSpec((1, n), lambda l: (0, 0))
    def const_mat(r, c): return pl.BlockSpec((r, c), lambda l: (0, 0))
    def layer_vec(n):   return pl.BlockSpec((1, 1, n), lambda l: (l, 0, 0))
    def layer_mat(r, c): return pl.BlockSpec((1, r, c), lambda l: (l, 0, 0))

    in_specs = [
        pl.BlockSpec((B, P, PD), lambda l: (0, 0, 0)),       # patches (loaded once)
        const_vec(PD), const_vec(PD),                        # pe_g1, pe_b1
        const_mat(PD, D), const_vec(D), const_vec(D), const_vec(D),  # pe_w, pe_bw, pe_g2, pe_b2
        pl.BlockSpec((1, 1, D), lambda l: (0, 0, 0)),        # cls token
        pl.BlockSpec((1, N, D), lambda l: (0, 0, 0)),        # pos embedding
        layer_vec(D), layer_vec(D),                          # attn LN g, b
        layer_mat(D, 3 * inner),                             # fused qkv weight
        pl.BlockSpec((1, heads, dim_head, D), lambda l: (l, 0, 0, 0)),   # wo
        layer_vec(D),                                        # b_out
        layer_vec(D), layer_vec(D),                          # ff LN g, b
        layer_mat(D, mlp), layer_vec(mlp),                   # w1, b1
        layer_mat(mlp, D), layer_vec(D),                     # w2, b2
        const_vec(D), const_vec(D),                          # final LN g, b
        const_mat(D, NC), const_vec(NC),                     # head w, b
    ]
    out_specs = (
        # preds: constant block index across the 'arbitrary' depth axis -> resident
        # accumulator, written only under pl.when(lyr == last), written back once.
        pl.BlockSpec((B, NC), lambda l: (0, 0)),
        # attention maps: per-layer block, bf16, key axis padded to a 128 multiple.
        pl.BlockSpec((1, B * heads, N, pad_n), lambda l: (l, 0, 0, 0)),
    )
    out_shape = (
        jax.ShapeDtypeStruct((B, NC), jnp.float32),
        jax.ShapeDtypeStruct((depth, B * heads, N, pad_n), jnp.bfloat16),
    )

    # explicit VMEM limit sized from the resident set (constants + double-buffered
    # per-layer blocks + output blocks + residual scratch), with 2x headroom.
    def _nbytes(a):
        return int(a.size) * a.dtype.itemsize
    const_inputs = [xp, params["pe_g1"], params["pe_b1"], pe_w, params["pe_bw"],
                    params["pe_g2"], params["pe_b2"], params["cls_token"], pos,
                    params["final_g"], params["final_b"], head_w, params["head_b"]]
    layer_inputs = [ag, ab, wqkv, wo, bo, fg, fb, w1, b1, w2, b2]
    out_block_bytes = B * NC * 4 + B * heads * N * pad_n * 2
    vmem_est = (2 * sum(_nbytes(a) for a in const_inputs)
                + 2 * sum(_nbytes(a) // depth for a in layer_inputs)
                + 2 * out_block_bytes
                + B * N * D * 4)
    vmem_limit = int(min(max(2 * vmem_est, 8 * 2 ** 20), 64 * 2 ** 20))

    preds, attn_raw = pl.pallas_call(
        _vit_fused_kernel,
        out_shape=out_shape,
        grid=(depth,),
        in_specs=in_specs,
        out_specs=out_specs,
        scratch_shapes=[pltpu.VMEM((B * N, D), jnp.float32)],
        compiler_params=pltpu.CompilerParams(
            dimension_semantics=("arbitrary",),
            vmem_limit_bytes=vmem_limit,
        ),
    )(
        xp, params["pe_g1"], params["pe_b1"], pe_w, params["pe_bw"],
        params["pe_g2"], params["pe_b2"], params["cls_token"], pos,
        ag, ab, wqkv, wo, bo, fg, fb, w1, b1, w2, b2,
        params["final_g"], params["final_b"], head_w, params["head_b"],
    )

    # (depth, B*heads, N, pad_n) bf16 -> (B, depth, heads, N, N) f32  (Recorder layout)
    attns = attn_raw[..., :N].astype(jnp.float32)
    attns = jnp.transpose(attns.reshape(depth, B, heads, N, N), (1, 0, 2, 3, 4))
    return preds, attns


# ----------------------------------------------------------------------------
# Deterministic parameter init (synthetic; shapes follow the module's __init__)
# ----------------------------------------------------------------------------
def init_params(key, *, patch_dim, dim, depth, heads, dim_head, mlp_dim,
                num_patches, num_classes):
    inner = heads * dim_head
    keys = jax.random.split(key, 6 + depth)
    norm = lambda k, shp, s=0.02: (s * jax.random.normal(k, shp)).astype(jnp.float32)
    ones = lambda n: jnp.ones((1, n), jnp.float32)
    zeros = lambda n: jnp.zeros((1, n), jnp.float32)

    params = {
        "pe_g1": ones(patch_dim), "pe_b1": zeros(patch_dim),
        "pe_w": norm(keys[0], (patch_dim, dim)), "pe_bw": zeros(dim),
        "pe_g2": ones(dim), "pe_b2": zeros(dim),
        "pos_embedding": norm(keys[1], (1, num_patches + 1, dim), 1.0),
        "cls_token": norm(keys[2], (1, 1, dim), 1.0),
        "final_g": ones(dim), "final_b": zeros(dim),
        "head_w": norm(keys[3], (dim, num_classes)), "head_b": zeros(num_classes),
        "layers": [],
    }
    for d in range(depth):
        lk = jax.random.split(keys[6 + d], 4)
        params["layers"].append({
            "attn_g": ones(dim), "attn_b": zeros(dim),
            "w_qkv": norm(lk[0], (dim, 3 * inner)),     # to_qkv has no bias
            "w_out": norm(lk[1], (inner, dim)), "b_out": zeros(dim),
            "ff_g": ones(dim), "ff_b": zeros(dim),
            "ff_w1": norm(lk[2], (dim, mlp_dim)), "ff_b1": zeros(mlp_dim),
            "ff_w2": norm(lk[3], (mlp_dim, dim)), "ff_b2": zeros(dim),
        })
    return params


if __name__ == "__main__":
    # Small shapes consistent with the module (scaled-down ViT hyperparams).
    B, C, IMG, P = 2, 1, 16, 8          # channels=1 as in BasicViT default
    DIM, DEPTH, HEADS, DIM_HEAD, MLP_DIM, NUM_CLASSES = 32, 2, 4, 8, 16, 10
    NUM_PATCHES = (IMG // P) * (IMG // P)
    PATCH_DIM = C * P * P

    key = jax.random.PRNGKey(0)
    k_img, k_par = jax.random.split(key)
    img = jax.random.normal(k_img, (B, C, IMG, IMG), dtype=jnp.float32)  # NCHW input

    params = init_params(k_par, patch_dim=PATCH_DIM, dim=DIM, depth=DEPTH,
                         heads=HEADS, dim_head=DIM_HEAD, mlp_dim=MLP_DIM,
                         num_patches=NUM_PATCHES, num_classes=NUM_CLASSES)

    fwd = jax.jit(functools.partial(basic_vit_forward, patch_size=P,
                                    heads=HEADS, dim_head=DIM_HEAD))
    preds, attns = fwd(img, params)
    jax.block_until_ready((preds, attns))
    assert preds.shape == (B, NUM_CLASSES)
    assert attns.shape == (B, DEPTH, HEADS, NUM_PATCHES + 1, NUM_PATCHES + 1)
    print("KERNEL_OK")
</pallas_src>

<mosaic_0001>
module attributes {stable_mosaic.version = 11 : i64} {
  func.func @_vit_fused_kernel(%arg0: i32, %arg1: memref<2x4x64xf32, #tpu.memory_space<vmem>>, %arg2: memref<1x64xf32, #tpu.memory_space<vmem>>, %arg3: memref<1x64xf32, #tpu.memory_space<vmem>>, %arg4: memref<64x32xbf16, #tpu.memory_space<vmem>>, %arg5: memref<1x32xf32, #tpu.memory_space<vmem>>, %arg6: memref<1x32xf32, #tpu.memory_space<vmem>>, %arg7: memref<1x32xf32, #tpu.memory_space<vmem>>, %arg8: memref<1x1x32xf32, #tpu.memory_space<vmem>>, %arg9: memref<1x5x32xf32, #tpu.memory_space<vmem>>, %arg10: memref<1x1x32xf32, #tpu.memory_space<vmem>>, %arg11: memref<1x1x32xf32, #tpu.memory_space<vmem>>, %arg12: memref<1x32x96xbf16, #tpu.memory_space<vmem>>, %arg13: memref<1x4x8x32xbf16, #tpu.memory_space<vmem>>, %arg14: memref<1x1x32xf32, #tpu.memory_space<vmem>>, %arg15: memref<1x1x32xf32, #tpu.memory_space<vmem>>, %arg16: memref<1x1x32xf32, #tpu.memory_space<vmem>>, %arg17: memref<1x32x16xbf16, #tpu.memory_space<vmem>>, %arg18: memref<1x1x16xf32, #tpu.memory_space<vmem>>, %arg19: memref<1x16x32xbf16, #tpu.memory_space<vmem>>, %arg20: memref<1x1x32xf32, #tpu.memory_space<vmem>>, %arg21: memref<1x32xf32, #tpu.memory_space<vmem>>, %arg22: memref<1x32xf32, #tpu.memory_space<vmem>>, %arg23: memref<32x10xbf16, #tpu.memory_space<vmem>>, %arg24: memref<1x10xf32, #tpu.memory_space<vmem>>, %arg25: memref<2x10xf32, #tpu.memory_space<vmem>>, %arg26: memref<1x8x5x128xbf16, #tpu.memory_space<vmem>>, %arg27: memref<10x32xf32, #tpu.memory_space<vmem>>) attributes {dimension_semantics = [#tpu.dimension_semantics<arbitrary>], iteration_bounds = array<i64: 2>, scalar_prefetch = 0 : i64, scratch_operands = 1 : i64, tpu.core_type = #tpu.core_type<tc>, window_params = [{pipeline_mode = #tpu.pipeline_mode<synchronous>, transform_indices = @transform_0, window_bounds = array<i64: 2, 4, 64>}, {pipeline_mode = #tpu.pipeline_mode<synchronous>, transform_indices = @transform_1, window_bounds = array<i64: 1, 64>}, {pipeline_mode = #tpu.pipeline_mode<synchronous>, transform_indices = @transform_2, window_bounds = array<i64: 1, 64>}, {pipeline_mode = #tpu.pipeline_mode<synchronous>, transform_indices = @transform_3, window_bounds = array<i64: 64, 32>}, {pipeline_mode = #tpu.pipeline_mode<synchronous>, transform_indices = @transform_4, window_bounds = array<i64: 1, 32>}, {pipeline_mode = #tpu.pipeline_mode<synchronous>, transform_indices = @transform_5, window_bounds = array<i64: 1, 32>}, {pipeline_mode = #tpu.pipeline_mode<synchronous>, transform_indices = @transform_6, window_bounds = array<i64: 1, 32>}, {pipeline_mode = #tpu.pipeline_mode<synchronous>, transform_indices = @transform_7, window_bounds = array<i64: 1, 1, 32>}, {pipeline_mode = #tpu.pipeline_mode<synchronous>, transform_indices = @transform_8, window_bounds = array<i64: 1, 5, 32>}, {transform_indices = @transform_9, window_bounds = array<i64: 1, 1, 32>}, {transform_indices = @transform_10, window_bounds = array<i64: 1, 1, 32>}, {transform_indices = @transform_11, window_bounds = array<i64: 1, 32, 96>}, {transform_indices = @transform_12, window_bounds = array<i64: 1, 4, 8, 32>}, {transform_indices = @transform_13, window_bounds = array<i64: 1, 1, 32>}, {transform_indices = @transform_14, window_bounds = array<i64: 1, 1, 32>}, {transform_indices = @transform_15, window_bounds = array<i64: 1, 1, 32>}, {transform_indices = @transform_16, window_bounds = array<i64: 1, 32, 16>}, {transform_indices = @transform_17, window_bounds = array<i64: 1, 1, 16>}, {transform_indices = @transform_18, window_bounds = array<i64: 1, 16, 32>}, {transform_indices = @transform_19, window_bounds = array<i64: 1, 1, 32>}, {pipeline_mode = #tpu.pipeline_mode<synchronous>, transform_indices = @transform_20, window_bounds = array<i64: 1, 32>}, {pipeline_mode = #tpu.pipeline_mode<synchronous>, transform_indices = @transform_21, window_bounds = array<i64: 1, 32>}, {pipeline_mode = #tpu.pipeline_mode<synchronous>, transform_indices = @transform_22, window_bounds = array<i64: 32, 10>}, {pipeline_mode = #tpu.pipeline_mode<synchronous>, transform_indices = @transform_23, window_bounds = array<i64: 1, 10>}, {pipeline_mode = #tpu.pipeline_mode<synchronous>, transform_indices = @transform_24, window_bounds = array<i64: 2, 10>}, {transform_indices = @transform_25, window_bounds = array<i64: 1, 8, 5, 128>}]} {
    %c0_i32 = arith.constant 0 : i32
    %0 = arith.cmpi eq, %arg0, %c0_i32 : i32
    %1 = arith.extui %0 : i1 to i32
    %c0_i32_0 = arith.constant 0 : i32
    %2 = arith.cmpi ne, %1, %c0_i32_0 : i32
    scf.if %2 {
      %c0_165 = arith.constant 0 : index
      %c0_166 = arith.constant 0 : index
      %c0_167 = arith.constant 0 : index
      %327 = vector.load %arg9[%c0_165, %c0_166, %c0_167] : memref<1x5x32xf32, #tpu.memory_space<vmem>>, vector<1x5x32xf32>
      %328 = vector.shape_cast %327 : vector<1x5x32xf32> to vector<5x32xf32>
      %c0_168 = arith.constant 0 : index
      %c0_169 = arith.constant 0 : index
      %c0_170 = arith.constant 0 : index
      %329 = vector.load %arg8[%c0_168, %c0_169, %c0_170] : memref<1x1x32xf32, #tpu.memory_space<vmem>>, vector<1x1x32xf32>
      %330 = vector.shape_cast %329 : vector<1x1x32xf32> to vector<1x32xf32>
      %c0_171 = arith.constant 0 : index
      %c0_172 = arith.constant 0 : index
      %c0_173 = arith.constant 0 : index
      %331 = vector.load %arg1[%c0_171, %c0_172, %c0_173] : memref<2x4x64xf32, #tpu.memory_space<vmem>>, vector<1x4x64xf32>
      %332 = vector.shape_cast %331 : vector<1x4x64xf32> to vector<4x64xf32>
      %c0_174 = arith.constant 0 : index
      %c0_175 = arith.constant 0 : index
      %333 = vector.load %arg2[%c0_174, %c0_175] : memref<1x64xf32, #tpu.memory_space<vmem>>, vector<1x64xf32>
      %334 = vector.shape_cast %333 : vector<1x64xf32> to vector<64xf32>
      %c0_176 = arith.constant 0 : index
      %c0_177 = arith.constant 0 : index
      %335 = vector.load %arg3[%c0_176, %c0_177] : memref<1x64xf32, #tpu.memory_space<vmem>>, vector<1x64xf32>
      %336 = vector.shape_cast %335 : vector<1x64xf32> to vector<64xf32>
      %cst_178 = arith.constant dense<0.000000e+00> : vector<4xf32>
      %337 = vector.multi_reduction <add>, %332, %cst_178 [1] : vector<4x64xf32> to vector<4xf32>
      %338 = vector.shape_cast %337 : vector<4xf32> to vector<4x1xf32>
      %cst_179 = arith.constant 6.400000e+01 : f32
      %339 = vector.broadcast %cst_179 : f32 to vector<4x1xf32>
      %340 = arith.divf %338, %339 : vector<4x1xf32>
      %341 = vector.broadcast %340 : vector<4x1xf32> to vector<4x64xf32>
      %342 = arith.subf %332, %341 : vector<4x64xf32>
      %343 = arith.mulf %342, %342 : vector<4x64xf32>
      %cst_180 = arith.constant dense<0.000000e+00> : vector<4xf32>
      %344 = vector.multi_reduction <add>, %343, %cst_180 [1] : vector<4x64xf32> to vector<4xf32>
      %345 = vector.shape_cast %344 : vector<4xf32> to vector<4x1xf32>
      %cst_181 = arith.constant 6.400000e+01 : f32
      %346 = vector.broadcast %cst_181 : f32 to vector<4x1xf32>
      %347 = arith.divf %345, %346 : vector<4x1xf32>
      %348 = vector.broadcast %340 : vector<4x1xf32> to vector<4x64xf32>
      %349 = arith.subf %332, %348 : vector<4x64xf32>
      %cst_182 = arith.constant 9.99999974E-6 : f32
      %350 = vector.broadcast %cst_182 : f32 to vector<4x1xf32>
      %351 = arith.addf %347, %350 : vector<4x1xf32>
      %352 = math.rsqrt %351 : vector<4x1xf32>
      %353 = vector.broadcast %352 : vector<4x1xf32> to vector<4x64xf32>
      %354 = arith.mulf %349, %353 : vector<4x64xf32>
      %355 = vector.shape_cast %334 : vector<64xf32> to vector<1x64xf32>
      %356 = vector.broadcast %355 : vector<1x64xf32> to vector<4x64xf32>
      %357 = arith.mulf %354, %356 : vector<4x64xf32>
      %358 = vector.shape_cast %336 : vector<64xf32> to vector<1x64xf32>
      %359 = vector.broadcast %358 : vector<1x64xf32> to vector<4x64xf32>
      %360 = arith.addf %357, %359 : vector<4x64xf32>
      %361 = arith.truncf %360 : vector<4x64xf32> to vector<4x64xbf16>
      %c0_183 = arith.constant 0 : index
      %c0_184 = arith.constant 0 : index
      %362 = vector.load %arg4[%c0_183, %c0_184] : memref<64x32xbf16, #tpu.memory_space<vmem>>, vector<64x32xbf16>
      %cst_185 = arith.constant dense<0.000000e+00> : vector<4x32xf32>
      %363 = tpu.matmul %361, %362, %cst_185 {dimension_numbers = #tpu.dot_dimension_numbers<[1], [0], [0], [1], [0, 0, 1, 1], [], []>} : vector<4x64xbf16>, vector<64x32xbf16>, vector<4x32xf32> -> vector<4x32xf32>
      %c0_186 = arith.constant 0 : index
      %c0_187 = arith.constant 0 : index
      %364 = vector.load %arg5[%c0_186, %c0_187] : memref<1x32xf32, #tpu.memory_space<vmem>>, vector<1x32xf32>
      %365 = vector.shape_cast %364 : vector<1x32xf32> to vector<32xf32>
      %366 = vector.shape_cast %365 : vector<32xf32> to vector<1x32xf32>
      %367 = vector.broadcast %366 : vector<1x32xf32> to vector<4x32xf32>
      %368 = arith.addf %363, %367 : vector<4x32xf32>
      %c0_188 = arith.constant 0 : index
      %c0_189 = arith.constant 0 : index
      %369 = vector.load %arg6[%c0_188, %c0_189] : memref<1x32xf32, #tpu.memory_space<vmem>>, vector<1x32xf32>
      %370 = vector.shape_cast %369 : vector<1x32xf32> to vector<32xf32>
      %c0_190 = arith.constant 0 : index
      %c0_191 = arith.constant 0 : index
      %371 = vector.load %arg7[%c0_190, %c0_191] : memref<1x32xf32, #tpu.memory_space<vmem>>, vector<1x32xf32>
      %372 = vector.shape_cast %371 : vector<1x32xf32> to vector<32xf32>
      %cst_192 = arith.constant dense<0.000000e+00> : vector<4xf32>
      %373 = vector.multi_reduction <add>, %368, %cst_192 [1] : vector<4x32xf32> to vector<4xf32>
      %374 = vector.shape_cast %373 : vector<4xf32> to vector<4x1xf32>
      %cst_193 = arith.constant 3.200000e+01 : f32
      %375 = vector.broadcast %cst_193 : f32 to vector<4x1xf32>
      %376 = arith.divf %374, %375 : vector<4x1xf32>
      %377 = vector.broadcast %376 : vector<4x1xf32> to vector<4x32xf32>
      %378 = arith.subf %368, %377 : vector<4x32xf32>
      %379 = arith.mulf %378, %378 : vector<4x32xf32>
      %cst_194 = arith.constant dense<0.000000e+00> : vector<4xf32>
      %380 = vector.multi_reduction <add>, %379, %cst_194 [1] : vector<4x32xf32> to vector<4xf32>
      %381 = vector.shape_cast %380 : vector<4xf32> to vector<4x1xf32>
      %cst_195 = arith.constant 3.200000e+01 : f32
      %382 = vector.broadcast %cst_195 : f32 to vector<4x1xf32>
      %383 = arith.divf %381, %382 : vector<4x1xf32>
      %384 = vector.broadcast %376 : vector<4x1xf32> to vector<4x32xf32>
      %385 = arith.subf %368, %384 : vector<4x32xf32>
      %cst_196 = arith.constant 9.99999974E-6 : f32
      %386 = vector.broadcast %cst_196 : f32 to vector<4x1xf32>
      %387 = arith.addf %383, %386 : vector<4x1xf32>
      %388 = math.rsqrt %387 : vector<4x1xf32>
      %389 = vector.broadcast %388 : vector<4x1xf32> to vector<4x32xf32>
      %390 = arith.mulf %385, %389 : vector<4x32xf32>
      %391 = vector.shape_cast %370 : vector<32xf32> to vector<1x32xf32>
      %392 = vector.broadcast %391 : vector<1x32xf32> to vector<4x32xf32>
      %393 = arith.mulf %390, %392 : vector<4x32xf32>
      %394 = vector.shape_cast %372 : vector<32xf32> to vector<1x32xf32>
      %395 = vector.broadcast %394 : vector<1x32xf32> to vector<4x32xf32>
      %396 = arith.addf %393, %395 : vector<4x32xf32>
      %397 = vector.extract_strided_slice %328 {offsets = [0, 0], sizes = [1, 32], strides = [1, 1]} : vector<5x32xf32> to vector<1x32xf32>
      %398 = arith.addf %330, %397 : vector<1x32xf32>
      %399 = vector.extract_strided_slice %328 {offsets = [1, 0], sizes = [4, 32], strides = [1, 1]} : vector<5x32xf32> to vector<4x32xf32>
      %400 = arith.addf %396, %399 : vector<4x32xf32>
      %401 = tpu.concatenate %398, %400 in 0 : vector<1x32xf32>, vector<4x32xf32> -> vector<5x32xf32>
      %c0_197 = arith.constant 0 : index
      %c0_198 = arith.constant 0 : index
      %402 = vector.load %arg27[%c0_197, %c0_198] : memref<10x32xf32, #tpu.memory_space<vmem>>, vector<5x32xf32>
      tpu.vector_store %arg27[%c0_197, %c0_198], %401 {strides = array<i32>} : memref<10x32xf32, #tpu.memory_space<vmem>>, vector<5x32xf32>,
      %c1_199 = arith.constant 1 : index
      %c0_200 = arith.constant 0 : index
      %c0_201 = arith.constant 0 : index
      %403 = vector.load %arg1[%c1_199, %c0_200, %c0_201] : memref<2x4x64xf32, #tpu.memory_space<vmem>>, vector<1x4x64xf32>
      %404 = vector.shape_cast %403 : vector<1x4x64xf32> to vector<4x64xf32>
      %c0_202 = arith.constant 0 : index
      %c0_203 = arith.constant 0 : index
      %405 = vector.load %arg2[%c0_202, %c0_203] : memref<1x64xf32, #tpu.memory_space<vmem>>, vector<1x64xf32>
      %406 = vector.shape_cast %405 : vector<1x64xf32> to vector<64xf32>
      %c0_204 = arith.constant 0 : index
      %c0_205 = arith.constant 0 : index
      %407 = vector.load %arg3[%c0_204, %c0_205] : memref<1x64xf32, #tpu.memory_space<vmem>>, vector<1x64xf32>
      %408 = vector.shape_cast %407 : vector<1x64xf32> to vector<64xf32>
      %cst_206 = arith.constant dense<0.000000e+00> : vector<4xf32>
      %409 = vector.multi_reduction <add>, %404, %cst_206 [1] : vector<4x64xf32> to vector<4xf32>
      %410 = vector.shape_cast %409 : vector<4xf32> to vector<4x1xf32>
      %cst_207 = arith.constant 6.400000e+01 : f32
      %411 = vector.broadcast %cst_207 : f32 to vector<4x1xf32>
      %412 = arith.divf %410, %411 : vector<4x1xf32>
      %413 = vector.broadcast %412 : vector<4x1xf32> to vector<4x64xf32>
      %414 = arith.subf %404, %413 : vector<4x64xf32>
      %415 = arith.mulf %414, %414 : vector<4x64xf32>
      %cst_208 = arith.constant dense<0.000000e+00> : vector<4xf32>
      %416 = vector.multi_reduction <add>, %415, %cst_208 [1] : vector<4x64xf32> to vector<4xf32>
      %417 = vector.shape_cast %416 : vector<4xf32> to vector<4x1xf32>
      %cst_209 = arith.constant 6.400000e+01 : f32
      %418 = vector.broadcast %cst_209 : f32 to vector<4x1xf32>
      %419 = arith.divf %417, %418 : vector<4x1xf32>
      %420 = vector.broadcast %412 : vector<4x1xf32> to vector<4x64xf32>
      %421 = arith.subf %404, %420 : vector<4x64xf32>
      %cst_210 = arith.constant 9.99999974E-6 : f32
      %422 = vector.broadcast %cst_210 : f32 to vector<4x1xf32>
      %423 = arith.addf %419, %422 : vector<4x1xf32>
      %424 = math.rsqrt %423 : vector<4x1xf32>
      %425 = vector.broadcast %424 : vector<4x1xf32> to vector<4x64xf32>
      %426 = arith.mulf %421, %425 : vector<4x64xf32>
      %427 = vector.shape_cast %406 : vector<64xf32> to vector<1x64xf32>
      %428 = vector.broadcast %427 : vector<1x64xf32> to vector<4x64xf32>
      %429 = arith.mulf %426, %428 : vector<4x64xf32>
      %430 = vector.shape_cast %408 : vector<64xf32> to vector<1x64xf32>
      %431 = vector.broadcast %430 : vector<1x64xf32> to vector<4x64xf32>
      %432 = arith.addf %429, %431 : vector<4x64xf32>
      %433 = arith.truncf %432 : vector<4x64xf32> to vector<4x64xbf16>
      %c0_211 = arith.constant 0 : index
      %c0_212 = arith.constant 0 : index
      %434 = vector.load %arg4[%c0_211, %c0_212] : memref<64x32xbf16, #tpu.memory_space<vmem>>, vector<64x32xbf16>
      %cst_213 = arith.constant dense<0.000000e+00> : vector<4x32xf32>
      %435 = tpu.matmul %433, %434, %cst_213 {dimension_numbers = #tpu.dot_dimension_numbers<[1], [0], [0], [1], [0, 0, 1, 1], [], []>} : vector<4x64xbf16>, vector<64x32xbf16>, vector<4x32xf32> -> vector<4x32xf32>
      %c0_214 = arith.constant 0 : index
      %c0_215 = arith.constant 0 : index
      %436 = vector.load %arg5[%c0_214, %c0_215] : memref<1x32xf32, #tpu.memory_space<vmem>>, vector<1x32xf32>
      %437 = vector.shape_cast %436 : vector<1x32xf32> to vector<32xf32>
      %438 = vector.shape_cast %437 : vector<32xf32> to vector<1x32xf32>
      %439 = vector.broadcast %438 : vector<1x32xf32> to vector<4x32xf32>
      %440 = arith.addf %435, %439 : vector<4x32xf32>
      %c0_216 = arith.constant 0 : index
      %c0_217 = arith.constant 0 : index
      %441 = vector.load %arg6[%c0_216, %c0_217] : memref<1x32xf32, #tpu.memory_space<vmem>>, vector<1x32xf32>
      %442 = vector.shape_cast %441 : vector<1x32xf32> to vector<32xf32>
      %c0_218 = arith.constant 0 : index
      %c0_219 = arith.constant 0 : index
      %443 = vector.load %arg7[%c0_218, %c0_219] : memref<1x32xf32, #tpu.memory_space<vmem>>, vector<1x32xf32>
      %444 = vector.shape_cast %443 : vector<1x32xf32> to vector<32xf32>
      %cst_220 = arith.constant dense<0.000000e+00> : vector<4xf32>
      %445 = vector.multi_reduction <add>, %440, %cst_220 [1] : vector<4x32xf32> to vector<4xf32>
      %446 = vector.shape_cast %445 : vector<4xf32> to vector<4x1xf32>
      %cst_221 = arith.constant 3.200000e+01 : f32
      %447 = vector.broadcast %cst_221 : f32 to vector<4x1xf32>
      %448 = arith.divf %446, %447 : vector<4x1xf32>
      %449 = vector.broadcast %448 : vector<4x1xf32> to vector<4x32xf32>
      %450 = arith.subf %440, %449 : vector<4x32xf32>
      %451 = arith.mulf %450, %450 : vector<4x32xf32>
      %cst_222 = arith.constant dense<0.000000e+00> : vector<4xf32>
      %452 = vector.multi_reduction <add>, %451, %cst_222 [1] : vector<4x32xf32> to vector<4xf32>
      %453 = vector.shape_cast %452 : vector<4xf32> to vector<4x1xf32>
      %cst_223 = arith.constant 3.200000e+01 : f32
      %454 = vector.broadcast %cst_223 : f32 to vector<4x1xf32>
      %455 = arith.divf %453, %454 : vector<4x1xf32>
      %456 = vector.broadcast %448 : vector<4x1xf32> to vector<4x32xf32>
      %457 = arith.subf %440, %456 : vector<4x32xf32>
      %cst_224 = arith.constant 9.99999974E-6 : f32
      %458 = vector.broadcast %cst_224 : f32 to vector<4x1xf32>
      %459 = arith.addf %455, %458 : vector<4x1xf32>
      %460 = math.rsqrt %459 : vector<4x1xf32>
      %461 = vector.broadcast %460 : vector<4x1xf32> to vector<4x32xf32>
      %462 = arith.mulf %457, %461 : vector<4x32xf32>
      %463 = vector.shape_cast %442 : vector<32xf32> to vector<1x32xf32>
      %464 = vector.broadcast %463 : vector<1x32xf32> to vector<4x32xf32>
      %465 = arith.mulf %462, %464 : vector<4x32xf32>
      %466 = vector.shape_cast %444 : vector<32xf32> to vector<1x32xf32>
      %467 = vector.broadcast %466 : vector<1x32xf32> to vector<4x32xf32>
      %468 = arith.addf %465, %467 : vector<4x32xf32>
      %469 = vector.extract_strided_slice %328 {offsets = [0, 0], sizes = [1, 32], strides = [1, 1]} : vector<5x32xf32> to vector<1x32xf32>
      %470 = arith.addf %330, %469 : vector<1x32xf32>
      %471 = vector.extract_strided_slice %328 {offsets = [1, 0], sizes = [4, 32], strides = [1, 1]} : vector<5x32xf32> to vector<4x32xf32>
      %472 = arith.addf %468, %471 : vector<4x32xf32>
      %473 = tpu.concatenate %470, %472 in 0 : vector<1x32xf32>, vector<4x32xf32> -> vector<5x32xf32>
      %c5_225 = arith.constant 5 : index
      %c0_226 = arith.constant 0 : index
      %474 = vector.load %arg27[%c5_225, %c0_226] : memref<10x32xf32, #tpu.memory_space<vmem>>, vector<5x32xf32>
      tpu.vector_store %arg27[%c5_225, %c0_226], %473 {strides = array<i32>} : memref<10x32xf32, #tpu.memory_space<vmem>>, vector<5x32xf32>,
    } else {
    }
    %c0 = arith.constant 0 : index
    %c0_1 = arith.constant 0 : index
    %3 = vector.load %arg27[%c0, %c0_1] : memref<10x32xf32, #tpu.memory_space<vmem>>, vector<10x32xf32>
    %c0_2 = arith.constant 0 : index
    %c0_3 = arith.constant 0 : index
    %c0_4 = arith.constant 0 : index
    %4 = vector.load %arg10[%c0_2, %c0_3, %c0_4] : memref<1x1x32xf32, #tpu.memory_space<vmem>>, vector<1x1x32xf32>
    %5 = vector.shape_cast %4 : vector<1x1x32xf32> to vector<32xf32>
    %c0_5 = arith.constant 0 : index
    %c0_6 = arith.constant 0 : index
    %c0_7 = arith.constant 0 : index
    %6 = vector.load %arg11[%c0_5, %c0_6, %c0_7] : memref<1x1x32xf32, #tpu.memory_space<vmem>>, vector<1x1x32xf32>
    %7 = vector.shape_cast %6 : vector<1x1x32xf32> to vector<32xf32>
    %cst = arith.constant dense<0.000000e+00> : vector<10xf32>
    %8 = vector.multi_reduction <add>, %3, %cst [1] : vector<10x32xf32> to vector<10xf32>
    %9 = vector.shape_cast %8 : vector<10xf32> to vector<10x1xf32>
    %cst_8 = arith.constant 3.200000e+01 : f32
    %10 = vector.broadcast %cst_8 : f32 to vector<10x1xf32>
    %11 = arith.divf %9, %10 : vector<10x1xf32>
    %12 = vector.broadcast %11 : vector<10x1xf32> to vector<10x32xf32>
    %13 = arith.subf %3, %12 : vector<10x32xf32>
    %14 = arith.mulf %13, %13 : vector<10x32xf32>
    %cst_9 = arith.constant dense<0.000000e+00> : vector<10xf32>
    %15 = vector.multi_reduction <add>, %14, %cst_9 [1] : vector<10x32xf32> to vector<10xf32>
    %16 = vector.shape_cast %15 : vector<10xf32> to vector<10x1xf32>
    %cst_10 = arith.constant 3.200000e+01 : f32
    %17 = vector.broadcast %cst_10 : f32 to vector<10x1xf32>
    %18 = arith.divf %16, %17 : vector<10x1xf32>
    %19 = vector.broadcast %11 : vector<10x1xf32> to vector<10x32xf32>
    %20 = arith.subf %3, %19 : vector<10x32xf32>
    %cst_11 = arith.constant 9.99999974E-6 : f32
    %21 = vector.broadcast %cst_11 : f32 to vector<10x1xf32>
    %22 = arith.addf %18, %21 : vector<10x1xf32>
    %23 = math.rsqrt %22 : vector<10x1xf32>
    %24 = vector.broadcast %23 : vector<10x1xf32> to vector<10x32xf32>
    %25 = arith.mulf %20, %24 : vector<10x32xf32>
    %26 = vector.shape_cast %5 : vector<32xf32> to vector<1x32xf32>
    %27 = vector.broadcast %26 : vector<1x32xf32> to vector<10x32xf32>
    %28 = arith.mulf %25, %27 : vector<10x32xf32>
    %29 = vector.shape_cast %7 : vector<32xf32> to vector<1x32xf32>
    %30 = vector.broadcast %29 : vector<1x32xf32> to vector<10x32xf32>
    %31 = arith.addf %28, %30 : vector<10x32xf32>
    %32 = arith.truncf %31 : vector<10x32xf32> to vector<10x32xbf16>
    %c0_12 = arith.constant 0 : index
    %c0_13 = arith.constant 0 : index
    %c0_14 = arith.constant 0 : index
    %33 = vector.load %arg12[%c0_12, %c0_13, %c0_14] : memref<1x32x96xbf16, #tpu.memory_space<vmem>>, vector<1x32x96xbf16>
    %34 = vector.shape_cast %33 : vector<1x32x96xbf16> to vector<32x96xbf16>
    %cst_15 = arith.constant dense<0.000000e+00> : vector<10x96xf32>
    %35 = tpu.matmul %32, %34, %cst_15 {dimension_numbers = #tpu.dot_dimension_numbers<[1], [0], [0], [1], [0, 0, 1, 1], [], []>} : vector<10x32xbf16>, vector<32x96xbf16>, vector<10x96xf32> -> vector<10x96xf32>
    %36 = arith.truncf %35 : vector<10x96xf32> to vector<10x96xbf16>
    %cst_16 = arith.constant 0.000000e+00 : bf16
    %37 = vector.broadcast %cst_16 : bf16 to vector<123x96xbf16>
    %38 = tpu.iota {dimensions = array<i32: 1>} : vector<5x128xi32>
    %c5_i32 = arith.constant 5 : i32
    %39 = vector.broadcast %c5_i32 : i32 to vector<5x128xi32>
    %40 = arith.cmpi slt, %38, %39 : vector<5x128xi32>
    %41 = vector.extract_strided_slice %36 {offsets = [0, 0], sizes = [5, 96], strides = [1, 1]} : vector<10x96xbf16> to vector<5x96xbf16>
    %42 = tpu.concatenate %41, %37 in 0 : vector<5x96xbf16>, vector<123x96xbf16> -> vector<128x96xbf16>
    %43 = vector.extract_strided_slice %3 {offsets = [0, 0], sizes = [5, 32], strides = [1, 1]} : vector<10x32xf32> to vector<5x32xf32>
    %c0_17 = arith.constant 0 : index
    %c0_18 = arith.constant 0 : index
    %c0_19 = arith.constant 0 : index
    %44 = vector.load %arg14[%c0_17, %c0_18, %c0_19] : memref<1x1x32xf32, #tpu.memory_space<vmem>>, vector<1x1x32xf32>
    %45 = vector.shape_cast %44 : vector<1x1x32xf32> to vector<32xf32>
    %46 = vector.shape_cast %45 : vector<32xf32> to vector<1x32xf32>
    %47 = vector.broadcast %46 : vector<1x32xf32> to vector<5x32xf32>
    %48 = arith.addf %43, %47 : vector<5x32xf32>
    %49 = vector.extract_strided_slice %41 {offsets = [0, 0], sizes = [5, 8], strides = [1, 1]} : vector<5x96xbf16> to vector<5x8xbf16>
    %50 = vector.extract_strided_slice %42 {offsets = [0, 32], sizes = [128, 8], strides = [1, 1]} : vector<128x96xbf16> to vector<128x8xbf16>
    %51 = vector.extract_strided_slice %42 {offsets = [0, 64], sizes = [128, 8], strides = [1, 1]} : vector<128x96xbf16> to vector<128x8xbf16>
    "tpu.trace_start"() <{level = 10 : i32, message = "nc,mc->nm"}> : () -> ()
    %cst_20 = arith.constant dense<0.000000e+00> : vector<5x128xf32>
    %52 = tpu.matmul %49, %50, %cst_20 {dimension_numbers = #tpu.dot_dimension_numbers<[1], [1], [0], [0], [0, 0, 1, 0], [], []>} : vector<5x8xbf16>, vector<128x8xbf16>, vector<5x128xf32> -> vector<5x128xf32>
    %cst_21 = arith.constant -1.000000e+30 : f32
    "tpu.trace_stop"() : () -> ()
    %53 = vector.broadcast %cst_21 : f32 to vector<5x128xf32>
    %54 = arith.select %40, %52, %53 : vector<5x128xi1>, vector<5x128xf32>
    %cst_22 = arith.constant dense<0xFF800000> : vector<5xf32>
    %55 = vector.multi_reduction <maximumf>, %54, %cst_22 [1] : vector<5x128xf32> to vector<5xf32>
    %56 = vector.shape_cast %55 : vector<5xf32> to vector<5x1xf32>
    %57 = vector.broadcast %56 : vector<5x1xf32> to vector<5x128xf32>
    %58 = arith.subf %54, %57 : vector<5x128xf32>
    %59 = math.exp %58 : vector<5x128xf32>
    %cst_23 = arith.constant dense<0.000000e+00> : vector<5xf32>
    %60 = vector.multi_reduction <add>, %59, %cst_23 [1] : vector<5x128xf32> to vector<5xf32>
    %61 = vector.shape_cast %60 : vector<5xf32> to vector<5x1xf32>
    %62 = vector.broadcast %61 : vector<5x1xf32> to vector<5x128xf32>
    %63 = arith.divf %59, %62 : vector<5x128xf32>
    %64 = arith.truncf %63 : vector<5x128xf32> to vector<5x128xbf16>
    %c0_24 = arith.constant 0 : index
    %c0_25 = arith.constant 0 : index
    %c0_26 = arith.constant 0 : index
    %c0_27 = arith.constant 0 : index
    %65 = vector.load %arg26[%c0_24, %c0_25, %c0_26, %c0_27] : memref<1x8x5x128xbf16, #tpu.memory_space<vmem>>, vector<1x1x5x128xbf16>
    %66 = vector.shape_cast %65 : vector<1x1x5x128xbf16> to vector<5x128xbf16>
    %67 = vector.shape_cast %64 : vector<5x128xbf16> to vector<1x1x5x128xbf16>
    tpu.vector_store %arg26[%c0_24, %c0_25, %c0_26, %c0_27], %67 {strides = array<i32>} : memref<1x8x5x128xbf16, #tpu.memory_space<vmem>>, vector<1x1x5x128xbf16>,
    %68 = arith.truncf %63 : vector<5x128xf32> to vector<5x128xbf16>
    %cst_28 = arith.constant dense<0.000000e+00> : vector<5x8xf32>
    %69 = tpu.matmul %68, %51, %cst_28 {dimension_numbers = #tpu.dot_dimension_numbers<[1], [0], [0], [1], [0, 0, 1, 1], [], []>} : vector<5x128xbf16>, vector<128x8xbf16>, vector<5x8xf32> -> vector<5x8xf32>
    %70 = arith.truncf %69 : vector<5x8xf32> to vector<5x8xbf16>
    %c0_29 = arith.constant 0 : index
    %c0_30 = arith.constant 0 : index
    %c0_31 = arith.constant 0 : index
    %c0_32 = arith.constant 0 : index
    %71 = vector.load %arg13[%c0_29, %c0_30, %c0_31, %c0_32] : memref<1x4x8x32xbf16, #tpu.memory_space<vmem>>, vector<1x1x8x32xbf16>
    %72 = vector.shape_cast %71 : vector<1x1x8x32xbf16> to vector<8x32xbf16>
    %cst_33 = arith.constant dense<0.000000e+00> : vector<5x32xf32>
    %73 = tpu.matmul %70, %72, %cst_33 {dimension_numbers = #tpu.dot_dimension_numbers<[1], [0], [0], [1], [0, 0, 1, 1], [], []>} : vector<5x8xbf16>, vector<8x32xbf16>, vector<5x32xf32> -> vector<5x32xf32>
    %74 = arith.addf %48, %73 : vector<5x32xf32>
    %75 = vector.extract_strided_slice %41 {offsets = [0, 8], sizes = [5, 8], strides = [1, 1]} : vector<5x96xbf16> to vector<5x8xbf16>
    %76 = vector.extract_strided_slice %42 {offsets = [0, 40], sizes = [128, 8], strides = [1, 1]} : vector<128x96xbf16> to vector<128x8xbf16>
    %77 = vector.extract_strided_slice %42 {offsets = [0, 72], sizes = [128, 8], strides = [1, 1]} : vector<128x96xbf16> to vector<128x8xbf16>
    "tpu.trace_start"() <{level = 10 : i32, message = "nc,mc->nm"}> : () -> ()
    %cst_34 = arith.constant dense<0.000000e+00> : vector<5x128xf32>
    %78 = tpu.matmul %75, %76, %cst_34 {dimension_numbers = #tpu.dot_dimension_numbers<[1], [1], [0], [0], [0, 0, 1, 0], [], []>} : vector<5x8xbf16>, vector<128x8xbf16>, vector<5x128xf32> -> vector<5x128xf32>
    %cst_35 = arith.constant -1.000000e+30 : f32
    "tpu.trace_stop"() : () -> ()
    %79 = vector.broadcast %cst_35 : f32 to vector<5x128xf32>
    %80 = arith.select %40, %78, %79 : vector<5x128xi1>, vector<5x128xf32>
    %cst_36 = arith.constant dense<0xFF800000> : vector<5xf32>
    %81 = vector.multi_reduction <maximumf>, %80, %cst_36 [1] : vector<5x128xf32> to vector<5xf32>
    %82 = vector.shape_cast %81 : vector<5xf32> to vector<5x1xf32>
    %83 = vector.broadcast %82 : vector<5x1xf32> to vector<5x128xf32>
    %84 = arith.subf %80, %83 : vector<5x128xf32>
    %85 = math.exp %84 : vector<5x128xf32>
    %cst_37 = arith.constant dense<0.000000e+00> : vector<5xf32>
    %86 = vector.multi_reduction <add>, %85, %cst_37 [1] : vector<5x128xf32> to vector<5xf32>
    %87 = vector.shape_cast %86 : vector<5xf32> to vector<5x1xf32>
    %88 = vector.broadcast %87 : vector<5x1xf32> to vector<5x128xf32>
    %89 = arith.divf %85, %88 : vector<5x128xf32>
    %90 = arith.truncf %89 : vector<5x128xf32> to vector<5x128xbf16>
    %c0_38 = arith.constant 0 : index
    %c1 = arith.constant 1 : index
    %c0_39 = arith.constant 0 : index
    %c0_40 = arith.constant 0 : index
    %91 = vector.load %arg26[%c0_38, %c1, %c0_39, %c0_40] : memref<1x8x5x128xbf16, #tpu.memory_space<vmem>>, vector<1x1x5x128xbf16>
    %92 = vector.shape_cast %91 : vector<1x1x5x128xbf16> to vector<5x128xbf16>
    %93 = vector.shape_cast %90 : vector<5x128xbf16> to vector<1x1x5x128xbf16>
    tpu.vector_store %arg26[%c0_38, %c1, %c0_39, %c0_40], %93 {strides = array<i32>} : memref<1x8x5x128xbf16, #tpu.memory_space<vmem>>, vector<1x1x5x128xbf16>,
    %94 = arith.truncf %89 : vector<5x128xf32> to vector<5x128xbf16>
    %cst_41 = arith.constant dense<0.000000e+00> : vector<5x8xf32>
    %95 = tpu.matmul %94, %77, %cst_41 {dimension_numbers = #tpu.dot_dimension_numbers<[1], [0], [0], [1], [0, 0, 1, 1], [], []>} : vector<5x128xbf16>, vector<128x8xbf16>, vector<5x8xf32> -> vector<5x8xf32>
    %96 = arith.truncf %95 : vector<5x8xf32> to vector<5x8xbf16>
    %c0_42 = arith.constant 0 : index
    %c1_43 = arith.constant 1 : index
    %c0_44 = arith.constant 0 : index
    %c0_45 = arith.constant 0 : index
    %97 = vector.load %arg13[%c0_42, %c1_43, %c0_44, %c0_45] : memref<1x4x8x32xbf16, #tpu.memory_space<vmem>>, vector<1x1x8x32xbf16>
    %98 = vector.shape_cast %97 : vector<1x1x8x32xbf16> to vector<8x32xbf16>
    %cst_46 = arith.constant dense<0.000000e+00> : vector<5x32xf32>
    %99 = tpu.matmul %96, %98, %cst_46 {dimension_numbers = #tpu.dot_dimension_numbers<[1], [0], [0], [1], [0, 0, 1, 1], [], []>} : vector<5x8xbf16>, vector<8x32xbf16>, vector<5x32xf32> -> vector<5x32xf32>
    %100 = arith.addf %74, %99 : vector<5x32xf32>
    %101 = vector.extract_strided_slice %41 {offsets = [0, 16], sizes = [5, 8], strides = [1, 1]} : vector<5x96xbf16> to vector<5x8xbf16>
    %102 = vector.extract_strided_slice %42 {offsets = [0, 48], sizes = [128, 8], strides = [1, 1]} : vector<128x96xbf16> to vector<128x8xbf16>
    %103 = vector.extract_strided_slice %42 {offsets = [0, 80], sizes = [128, 8], strides = [1, 1]} : vector<128x96xbf16> to vector<128x8xbf16>
    "tpu.trace_start"() <{level = 10 : i32, message = "nc,mc->nm"}> : () -> ()
    %cst_47 = arith.constant dense<0.000000e+00> : vector<5x128xf32>
    %104 = tpu.matmul %101, %102, %cst_47 {dimension_numbers = #tpu.dot_dimension_numbers<[1], [1], [0], [0], [0, 0, 1, 0], [], []>} : vector<5x8xbf16>, vector<128x8xbf16>, vector<5x128xf32> -> vector<5x128xf32>
    %cst_48 = arith.constant -1.000000e+30 : f32
    "tpu.trace_stop"() : () -> ()
    %105 = vector.broadcast %cst_48 : f32 to vector<5x128xf32>
    %106 = arith.select %40, %104, %105 : vector<5x128xi1>, vector<5x128xf32>
    %cst_49 = arith.constant dense<0xFF800000> : vector<5xf32>
    %107 = vector.multi_reduction <maximumf>, %106, %cst_49 [1] : vector<5x128xf32> to vector<5xf32>
    %108 = vector.shape_cast %107 : vector<5xf32> to vector<5x1xf32>
    %109 = vector.broadcast %108 : vector<5x1xf32> to vector<5x128xf32>
    %110 = arith.subf %106, %109 : vector<5x128xf32>
    %111 = math.exp %110 : vector<5x128xf32>
    %cst_50 = arith.constant dense<0.000000e+00> : vector<5xf32>
    %112 = vector.multi_reduction <add>, %111, %cst_50 [1] : vector<5x128xf32> to vector<5xf32>
    %113 = vector.shape_cast %112 : vector<5xf32> to vector<5x1xf32>
    %114 = vector.broadcast %113 : vector<5x1xf32> to vector<5x128xf32>
    %115 = arith.divf %111, %114 : vector<5x128xf32>
    %116 = arith.truncf %115 : vector<5x128xf32> to vector<5x128xbf16>
    %c0_51 = arith.constant 0 : index
    %c2 = arith.constant 2 : index
    %c0_52 = arith.constant 0 : index
    %c0_53 = arith.constant 0 : index
    %117 = vector.load %arg26[%c0_51, %c2, %c0_52, %c0_53] : memref<1x8x5x128xbf16, #tpu.memory_space<vmem>>, vector<1x1x5x128xbf16>
    %118 = vector.shape_cast %117 : vector<1x1x5x128xbf16> to vector<5x128xbf16>
    %119 = vector.shape_cast %116 : vector<5x128xbf16> to vector<1x1x5x128xbf16>
    tpu.vector_store %arg26[%c0_51, %c2, %c0_52, %c0_53], %119 {strides = array<i32>} : memref<1x8x5x128xbf16, #tpu.memory_space<vmem>>, vector<1x1x5x128xbf16>,
    %120 = arith.truncf %115 : vector<5x128xf32> to vector<5x128xbf16>
    %cst_54 = arith.constant dense<0.000000e+00> : vector<5x8xf32>
    %121 = tpu.matmul %120, %103, %cst_54 {dimension_numbers = #tpu.dot_dimension_numbers<[1], [0], [0], [1], [0, 0, 1, 1], [], []>} : vector<5x128xbf16>, vector<128x8xbf16>, vector<5x8xf32> -> vector<5x8xf32>
    %122 = arith.truncf %121 : vector<5x8xf32> to vector<5x8xbf16>
    %c0_55 = arith.constant 0 : index
    %c2_56 = arith.constant 2 : index
    %c0_57 = arith.constant 0 : index
    %c0_58 = arith.constant 0 : index
    %123 = vector.load %arg13[%c0_55, %c2_56, %c0_57, %c0_58] : memref<1x4x8x32xbf16, #tpu.memory_space<vmem>>, vector<1x1x8x32xbf16>
    %124 = vector.shape_cast %123 : vector<1x1x8x32xbf16> to vector<8x32xbf16>
    %cst_59 = arith.constant dense<0.000000e+00> : vector<5x32xf32>
    %125 = tpu.matmul %122, %124, %cst_59 {dimension_numbers = #tpu.dot_dimension_numbers<[1], [0], [0], [1], [0, 0, 1, 1], [], []>} : vector<5x8xbf16>, vector<8x32xbf16>, vector<5x32xf32> -> vector<5x32xf32>
    %126 = arith.addf %100, %125 : vector<5x32xf32>
    %127 = vector.extract_strided_slice %41 {offsets = [0, 24], sizes = [5, 8], strides = [1, 1]} : vector<5x96xbf16> to vector<5x8xbf16>
    %128 = vector.extract_strided_slice %42 {offsets = [0, 56], sizes = [128, 8], strides = [1, 1]} : vector<128x96xbf16> to vector<128x8xbf16>
    %129 = vector.extract_strided_slice %42 {offsets = [0, 88], sizes = [128, 8], strides = [1, 1]} : vector<128x96xbf16> to vector<128x8xbf16>
    "tpu.trace_start"() <{level = 10 : i32, message = "nc,mc->nm"}> : () -> ()
    %cst_60 = arith.constant dense<0.000000e+00> : vector<5x128xf32>
    %130 = tpu.matmul %127, %128, %cst_60 {dimension_numbers = #tpu.dot_dimension_numbers<[1], [1], [0], [0], [0, 0, 1, 0], [], []>} : vector<5x8xbf16>, vector<128x8xbf16>, vector<5x128xf32> -> vector<5x128xf32>
    %cst_61 = arith.constant -1.000000e+30 : f32
    "tpu.trace_stop"() : () -> ()
    %131 = vector.broadcast %cst_61 : f32 to vector<5x128xf32>
    %132 = arith.select %40, %130, %131 : vector<5x128xi1>, vector<5x128xf32>
    %cst_62 = arith.constant dense<0xFF800000> : vector<5xf32>
    %133 = vector.multi_reduction <maximumf>, %132, %cst_62 [1] : vector<5x128xf32> to vector<5xf32>
    %134 = vector.shape_cast %133 : vector<5xf32> to vector<5x1xf32>
    %135 = vector.broadcast %134 : vector<5x1xf32> to vector<5x128xf32>
    %136 = arith.subf %132, %135 : vector<5x128xf32>
    %137 = math.exp %136 : vector<5x128xf32>
    %cst_63 = arith.constant dense<0.000000e+00> : vector<5xf32>
    %138 = vector.multi_reduction <add>, %137, %cst_63 [1] : vector<5x128xf32> to vector<5xf32>
    %139 = vector.shape_cast %138 : vector<5xf32> to vector<5x1xf32>
    %140 = vector.broadcast %139 : vector<5x1xf32> to vector<5x128xf32>
    %141 = arith.divf %137, %140 : vector<5x128xf32>
    %142 = arith.truncf %141 : vector<5x128xf32> to vector<5x128xbf16>
    %c0_64 = arith.constant 0 : index
    %c3 = arith.constant 3 : index
    %c0_65 = arith.constant 0 : index
    %c0_66 = arith.constant 0 : index
    %143 = vector.load %arg26[%c0_64, %c3, %c0_65, %c0_66] : memref<1x8x5x128xbf16, #tpu.memory_space<vmem>>, vector<1x1x5x128xbf16>
    %144 = vector.shape_cast %143 : vector<1x1x5x128xbf16> to vector<5x128xbf16>
    %145 = vector.shape_cast %142 : vector<5x128xbf16> to vector<1x1x5x128xbf16>
    tpu.vector_store %arg26[%c0_64, %c3, %c0_65, %c0_66], %145 {strides = array<i32>} : memref<1x8x5x128xbf16, #tpu.memory_space<vmem>>, vector<1x1x5x128xbf16>,
    %146 = arith.truncf %141 : vector<5x128xf32> to vector<5x128xbf16>
    %cst_67 = arith.constant dense<0.000000e+00> : vector<5x8xf32>
    %147 = tpu.matmul %146, %129, %cst_67 {dimension_numbers = #tpu.dot_dimension_numbers<[1], [0], [0], [1], [0, 0, 1, 1], [], []>} : vector<5x128xbf16>, vector<128x8xbf16>, vector<5x8xf32> -> vector<5x8xf32>
    %148 = arith.truncf %147 : vector<5x8xf32> to vector<5x8xbf16>
    %c0_68 = arith.constant 0 : index
    %c3_69 = arith.constant 3 : index
    %c0_70 = arith.constant 0 : index
    %c0_71 = arith.constant 0 : index
    %149 = vector.load %arg13[%c0_68, %c3_69, %c0_70, %c0_71] : memref<1x4x8x32xbf16, #tpu.memory_space<vmem>>, vector<1x1x8x32xbf16>
    %150 = vector.shape_cast %149 : vector<1x1x8x32xbf16> to vector<8x32xbf16>
    %cst_72 = arith.constant dense<0.000000e+00> : vector<5x32xf32>
    %151 = tpu.matmul %148, %150, %cst_72 {dimension_numbers = #tpu.dot_dimension_numbers<[1], [0], [0], [1], [0, 0, 1, 1], [], []>} : vector<5x8xbf16>, vector<8x32xbf16>, vector<5x32xf32> -> vector<5x32xf32>
    %152 = arith.addf %126, %151 : vector<5x32xf32>
    %c0_73 = arith.constant 0 : index
    %c0_74 = arith.constant 0 : index
    %153 = vector.load %arg27[%c0_73, %c0_74] : memref<10x32xf32, #tpu.memory_space<vmem>>, vector<5x32xf32>
    tpu.vector_store %arg27[%c0_73, %c0_74], %152 {strides = array<i32>} : memref<10x32xf32, #tpu.memory_space<vmem>>, vector<5x32xf32>,
    %154 = vector.extract_strided_slice %36 {offsets = [5, 0], sizes = [5, 96], strides = [1, 1]} : vector<10x96xbf16> to vector<5x96xbf16>
    %155 = tpu.concatenate %154, %37 in 0 : vector<5x96xbf16>, vector<123x96xbf16> -> vector<128x96xbf16>
    %156 = vector.extract_strided_slice %3 {offsets = [5, 0], sizes = [5, 32], strides = [1, 1]} : vector<10x32xf32> to vector<5x32xf32>
    %c0_75 = arith.constant 0 : index
    %c0_76 = arith.constant 0 : index
    %c0_77 = arith.constant 0 : index
    %157 = vector.load %arg14[%c0_75, %c0_76, %c0_77] : memref<1x1x32xf32, #tpu.memory_space<vmem>>, vector<1x1x32xf32>
    %158 = vector.shape_cast %157 : vector<1x1x32xf32> to vector<32xf32>
    %159 = vector.shape_cast %158 : vector<32xf32> to vector<1x32xf32>
    %160 = vector.broadcast %159 : vector<1x32xf32> to vector<5x32xf32>
    %161 = arith.addf %156, %160 : vector<5x32xf32>
    %162 = vector.extract_strided_slice %154 {offsets = [0, 0], sizes = [5, 8], strides = [1, 1]} : vector<5x96xbf16> to vector<5x8xbf16>
    %163 = vector.extract_strided_slice %155 {offsets = [0, 32], sizes = [128, 8], strides = [1, 1]} : vector<128x96xbf16> to vector<128x8xbf16>
    %164 = vector.extract_strided_slice %155 {offsets = [0, 64], sizes = [128, 8], strides = [1, 1]} : vector<128x96xbf16> to vector<128x8xbf16>
    "tpu.trace_start"() <{level = 10 : i32, message = "nc,mc->nm"}> : () -> ()
    %cst_78 = arith.constant dense<0.000000e+00> : vector<5x128xf32>
    %165 = tpu.matmul %162, %163, %cst_78 {dimension_numbers = #tpu.dot_dimension_numbers<[1], [1], [0], [0], [0, 0, 1, 0], [], []>} : vector<5x8xbf16>, vector<128x8xbf16>, vector<5x128xf32> -> vector<5x128xf32>
    %cst_79 = arith.constant -1.000000e+30 : f32
    "tpu.trace_stop"() : () -> ()
    %166 = vector.broadcast %cst_79 : f32 to vector<5x128xf32>
    %167 = arith.select %40, %165, %166 : vector<5x128xi1>, vector<5x128xf32>
    %cst_80 = arith.constant dense<0xFF800000> : vector<5xf32>
    %168 = vector.multi_reduction <maximumf>, %167, %cst_80 [1] : vector<5x128xf32> to vector<5xf32>
    %169 = vector.shape_cast %168 : vector<5xf32> to vector<5x1xf32>
    %170 = vector.broadcast %169 : vector<5x1xf32> to vector<5x128xf32>
    %171 = arith.subf %167, %170 : vector<5x128xf32>
    %172 = math.exp %171 : vector<5x128xf32>
    %cst_81 = arith.constant dense<0.000000e+00> : vector<5xf32>
    %173 = vector.multi_reduction <add>, %172, %cst_81 [1] : vector<5x128xf32> to vector<5xf32>
    %174 = vector.shape_cast %173 : vector<5xf32> to vector<5x1xf32>
    %175 = vector.broadcast %174 : vector<5x1xf32> to vector<5x128xf32>
    %176 = arith.divf %172, %175 : vector<5x128xf32>
    %177 = arith.truncf %176 : vector<5x128xf32> to vector<5x128xbf16>
    %c0_82 = arith.constant 0 : index
    %c4 = arith.constant 4 : index
    %c0_83 = arith.constant 0 : index
    %c0_84 = arith.constant 0 : index
    %178 = vector.load %arg26[%c0_82, %c4, %c0_83, %c0_84] : memref<1x8x5x128xbf16, #tpu.memory_space<vmem>>, vector<1x1x5x128xbf16>
    %179 = vector.shape_cast %178 : vector<1x1x5x128xbf16> to vector<5x128xbf16>
    %180 = vector.shape_cast %177 : vector<5x128xbf16> to vector<1x1x5x128xbf16>
    tpu.vector_store %arg26[%c0_82, %c4, %c0_83, %c0_84], %180 {strides = array<i32>} : memref<1x8x5x128xbf16, #tpu.memory_space<vmem>>, vector<1x1x5x128xbf16>,
    %181 = arith.truncf %176 : vector<5x128xf32> to vector<5x128xbf16>
    %cst_85 = arith.constant dense<0.000000e+00> : vector<5x8xf32>
    %182 = tpu.matmul %181, %164, %cst_85 {dimension_numbers = #tpu.dot_dimension_numbers<[1], [0], [0], [1], [0, 0, 1, 1], [], []>} : vector<5x128xbf16>, vector<128x8xbf16>, vector<5x8xf32> -> vector<5x8xf32>
    %183 = arith.truncf %182 : vector<5x8xf32> to vector<5x8xbf16>
    %c0_86 = arith.constant 0 : index
    %c0_87 = arith.constant 0 : index
    %c0_88 = arith.constant 0 : index
    %c0_89 = arith.constant 0 : index
    %184 = vector.load %arg13[%c0_86, %c0_87, %c0_88, %c0_89] : memref<1x4x8x32xbf16, #tpu.memory_space<vmem>>, vector<1x1x8x32xbf16>
    %185 = vector.shape_cast %184 : vector<1x1x8x32xbf16> to vector<8x32xbf16>
    %cst_90 = arith.constant dense<0.000000e+00> : vector<5x32xf32>
    %186 = tpu.matmul %183, %185, %cst_90 {dimension_numbers = #tpu.dot_dimension_numbers<[1], [0], [0], [1], [0, 0, 1, 1], [], []>} : vector<5x8xbf16>, vector<8x32xbf16>, vector<5x32xf32> -> vector<5x32xf32>
    %187 = arith.addf %161, %186 : vector<5x32xf32>
    %188 = vector.extract_strided_slice %154 {offsets = [0, 8], sizes = [5, 8], strides = [1, 1]} : vector<5x96xbf16> to vector<5x8xbf16>
    %189 = vector.extract_strided_slice %155 {offsets = [0, 40], sizes = [128, 8], strides = [1, 1]} : vector<128x96xbf16> to vector<128x8xbf16>
    %190 = vector.extract_strided_slice %155 {offsets = [0, 72], sizes = [128, 8], strides = [1, 1]} : vector<128x96xbf16> to vector<128x8xbf16>
    "tpu.trace_start"() <{level = 10 : i32, message = "nc,mc->nm"}> : () -> ()
    %cst_91 = arith.constant dense<0.000000e+00> : vector<5x128xf32>
    %191 = tpu.matmul %188, %189, %cst_91 {dimension_numbers = #tpu.dot_dimension_numbers<[1], [1], [0], [0], [0, 0, 1, 0], [], []>} : vector<5x8xbf16>, vector<128x8xbf16>, vector<5x128xf32> -> vector<5x128xf32>
    %cst_92 = arith.constant -1.000000e+30 : f32
    "tpu.trace_stop"() : () -> ()
    %192 = vector.broadcast %cst_92 : f32 to vector<5x128xf32>
    %193 = arith.select %40, %191, %192 : vector<5x128xi1>, vector<5x128xf32>
    %cst_93 = arith.constant dense<0xFF800000> : vector<5xf32>
    %194 = vector.multi_reduction <maximumf>, %193, %cst_93 [1] : vector<5x128xf32> to vector<5xf32>
    %195 = vector.shape_cast %194 : vector<5xf32> to vector<5x1xf32>
    %196 = vector.broadcast %195 : vector<5x1xf32> to vector<5x128xf32>
    %197 = arith.subf %193, %196 : vector<5x128xf32>
    %198 = math.exp %197 : vector<5x128xf32>
    %cst_94 = arith.constant dense<0.000000e+00> : vector<5xf32>
    %199 = vector.multi_reduction <add>, %198, %cst_94 [1] : vector<5x128xf32> to vector<5xf32>
    %200 = vector.shape_cast %199 : vector<5xf32> to vector<5x1xf32>
    %201 = vector.broadcast %200 : vector<5x1xf32> to vector<5x128xf32>
    %202 = arith.divf %198, %201 : vector<5x128xf32>
    %203 = arith.truncf %202 : vector<5x128xf32> to vector<5x128xbf16>
    %c0_95 = arith.constant 0 : index
    %c5 = arith.constant 5 : index
    %c0_96 = arith.constant 0 : index
    %c0_97 = arith.constant 0 : index
    %204 = vector.load %arg26[%c0_95, %c5, %c0_96, %c0_97] : memref<1x8x5x128xbf16, #tpu.memory_space<vmem>>, vector<1x1x5x128xbf16>
    %205 = vector.shape_cast %204 : vector<1x1x5x128xbf16> to vector<5x128xbf16>
    %206 = vector.shape_cast %203 : vector<5x128xbf16> to vector<1x1x5x128xbf16>
    tpu.vector_store %arg26[%c0_95, %c5, %c0_96, %c0_97], %206 {strides = array<i32>} : memref<1x8x5x128xbf16, #tpu.memory_space<vmem>>, vector<1x1x5x128xbf16>,
    %207 = arith.truncf %202 : vector<5x128xf32> to vector<5x128xbf16>
    %cst_98 = arith.constant dense<0.000000e+00> : vector<5x8xf32>
    %208 = tpu.matmul %207, %190, %cst_98 {dimension_numbers = #tpu.dot_dimension_numbers<[1], [0], [0], [1], [0, 0, 1, 1], [], []>} : vector<5x128xbf16>, vector<128x8xbf16>, vector<5x8xf32> -> vector<5x8xf32>
    %209 = arith.truncf %208 : vector<5x8xf32> to vector<5x8xbf16>
    %c0_99 = arith.constant 0 : index
    %c1_100 = arith.constant 1 : index
    %c0_101 = arith.constant 0 : index
    %c0_102 = arith.constant 0 : index
    %210 = vector.load %arg13[%c0_99, %c1_100, %c0_101, %c0_102] : memref<1x4x8x32xbf16, #tpu.memory_space<vmem>>, vector<1x1x8x32xbf16>
    %211 = vector.shape_cast %210 : vector<1x1x8x32xbf16> to vector<8x32xbf16>
    %cst_103 = arith.constant dense<0.000000e+00> : vector<5x32xf32>
    %212 = tpu.matmul %209, %211, %cst_103 {dimension_numbers = #tpu.dot_dimension_numbers<[1], [0], [0], [1], [0, 0, 1, 1], [], []>} : vector<5x8xbf16>, vector<8x32xbf16>, vector<5x32xf32> -> vector<5x32xf32>
    %213 = arith.addf %187, %212 : vector<5x32xf32>
    %214 = vector.extract_strided_slice %154 {offsets = [0, 16], sizes = [5, 8], strides = [1, 1]} : vector<5x96xbf16> to vector<5x8xbf16>
    %215 = vector.extract_strided_slice %155 {offsets = [0, 48], sizes = [128, 8], strides = [1, 1]} : vector<128x96xbf16> to vector<128x8xbf16>
    %216 = vector.extract_strided_slice %155 {offsets = [0, 80], sizes = [128, 8], strides = [1, 1]} : vector<128x96xbf16> to vector<128x8xbf16>
    "tpu.trace_start"() <{level = 10 : i32, message = "nc,mc->nm"}> : () -> ()
    %cst_104 = arith.constant dense<0.000000e+00> : vector<5x128xf32>
    %217 = tpu.matmul %214, %215, %cst_104 {dimension_numbers = #tpu.dot_dimension_numbers<[1], [1], [0], [0], [0, 0, 1, 0], [], []>} : vector<5x8xbf16>, vector<128x8xbf16>, vector<5x128xf32> -> vector<5x128xf32>
    %cst_105 = arith.constant -1.000000e+30 : f32
    "tpu.trace_stop"() : () -> ()
    %218 = vector.broadcast %cst_105 : f32 to vector<5x128xf32>
    %219 = arith.select %40, %217, %218 : vector<5x128xi1>, vector<5x128xf32>
    %cst_106 = arith.constant dense<0xFF800000> : vector<5xf32>
    %220 = vector.multi_reduction <maximumf>, %219, %cst_106 [1] : vector<5x128xf32> to vector<5xf32>
    %221 = vector.shape_cast %220 : vector<5xf32> to vector<5x1xf32>
    %222 = vector.broadcast %221 : vector<5x1xf32> to vector<5x128xf32>
    %223 = arith.subf %219, %222 : vector<5x128xf32>
    %224 = math.exp %223 : vector<5x128xf32>
    %cst_107 = arith.constant dense<0.000000e+00> : vector<5xf32>
    %225 = vector.multi_reduction <add>, %224, %cst_107 [1] : vector<5x128xf32> to vector<5xf32>
    %226 = vector.shape_cast %225 : vector<5xf32> to vector<5x1xf32>
    %227 = vector.broadcast %226 : vector<5x1xf32> to vector<5x128xf32>
    %228 = arith.divf %224, %227 : vector<5x128xf32>
    %229 = arith.truncf %228 : vector<5x128xf32> to vector<5x128xbf16>
    %c0_108 = arith.constant 0 : index
    %c6 = arith.constant 6 : index
    %c0_109 = arith.constant 0 : index
    %c0_110 = arith.constant 0 : index
    %230 = vector.load %arg26[%c0_108, %c6, %c0_109, %c0_110] : memref<1x8x5x128xbf16, #tpu.memory_space<vmem>>, vector<1x1x5x128xbf16>
    %231 = vector.shape_cast %230 : vector<1x1x5x128xbf16> to vector<5x128xbf16>
    %232 = vector.shape_cast %229 : vector<5x128xbf16> to vector<1x1x5x128xbf16>
    tpu.vector_store %arg26[%c0_108, %c6, %c0_109, %c0_110], %232 {strides = array<i32>} : memref<1x8x5x128xbf16, #tpu.memory_space<vmem>>, vector<1x1x5x128xbf16>,
    %233 = arith.truncf %228 : vector<5x128xf32> to vector<5x128xbf16>
    %cst_111 = arith.constant dense<0.000000e+00> : vector<5x8xf32>
    %234 = tpu.matmul %233, %216, %cst_111 {dimension_numbers = #tpu.dot_dimension_numbers<[1], [0], [0], [1], [0, 0, 1, 1], [], []>} : vector<5x128xbf16>, vector<128x8xbf16>, vector<5x8xf32> -> vector<5x8xf32>
    %235 = arith.truncf %234 : vector<5x8xf32> to vector<5x8xbf16>
    %c0_112 = arith.constant 0 : index
    %c2_113 = arith.constant 2 : index
    %c0_114 = arith.constant 0 : index
    %c0_115 = arith.constant 0 : index
    %236 = vector.load %arg13[%c0_112, %c2_113, %c0_114, %c0_115] : memref<1x4x8x32xbf16, #tpu.memory_space<vmem>>, vector<1x1x8x32xbf16>
    %237 = vector.shape_cast %236 : vector<1x1x8x32xbf16> to vector<8x32xbf16>
    %cst_116 = arith.constant dense<0.000000e+00> : vector<5x32xf32>
    %238 = tpu.matmul %235, %237, %cst_116 {dimension_numbers = #tpu.dot_dimension_numbers<[1], [0], [0], [1], [0, 0, 1, 1], [], []>} : vector<5x8xbf16>, vector<8x32xbf16>, vector<5x32xf32> -> vector<5x32xf32>
    %239 = arith.addf %213, %238 : vector<5x32xf32>
    %240 = vector.extract_strided_slice %154 {offsets = [0, 24], sizes = [5, 8], strides = [1, 1]} : vector<5x96xbf16> to vector<5x8xbf16>
    %241 = vector.extract_strided_slice %155 {offsets = [0, 56], sizes = [128, 8], strides = [1, 1]} : vector<128x96xbf16> to vector<128x8xbf16>
    %242 = vector.extract_strided_slice %155 {offsets = [0, 88], sizes = [128, 8], strides = [1, 1]} : vector<128x96xbf16> to vector<128x8xbf16>
    "tpu.trace_start"() <{level = 10 : i32, message = "nc,mc->nm"}> : () -> ()
    %cst_117 = arith.constant dense<0.000000e+00> : vector<5x128xf32>
    %243 = tpu.matmul %240, %241, %cst_117 {dimension_numbers = #tpu.dot_dimension_numbers<[1], [1], [0], [0], [0, 0, 1, 0], [], []>} : vector<5x8xbf16>, vector<128x8xbf16>, vector<5x128xf32> -> vector<5x128xf32>
    %cst_118 = arith.constant -1.000000e+30 : f32
    "tpu.trace_stop"() : () -> ()
    %244 = vector.broadcast %cst_118 : f32 to vector<5x128xf32>
    %245 = arith.select %40, %243, %244 : vector<5x128xi1>, vector<5x128xf32>
    %cst_119 = arith.constant dense<0xFF800000> : vector<5xf32>
    %246 = vector.multi_reduction <maximumf>, %245, %cst_119 [1] : vector<5x128xf32> to vector<5xf32>
    %247 = vector.shape_cast %246 : vector<5xf32> to vector<5x1xf32>
    %248 = vector.broadcast %247 : vector<5x1xf32> to vector<5x128xf32>
    %249 = arith.subf %245, %248 : vector<5x128xf32>
    %250 = math.exp %249 : vector<5x128xf32>
    %cst_120 = arith.constant dense<0.000000e+00> : vector<5xf32>
    %251 = vector.multi_reduction <add>, %250, %cst_120 [1] : vector<5x128xf32> to vector<5xf32>
    %252 = vector.shape_cast %251 : vector<5xf32> to vector<5x1xf32>
    %253 = vector.broadcast %252 : vector<5x1xf32> to vector<5x128xf32>
    %254 = arith.divf %250, %253 : vector<5x128xf32>
    %255 = arith.truncf %254 : vector<5x128xf32> to vector<5x128xbf16>
    %c0_121 = arith.constant 0 : index
    %c7 = arith.constant 7 : index
    %c0_122 = arith.constant 0 : index
    %c0_123 = arith.constant 0 : index
    %256 = vector.load %arg26[%c0_121, %c7, %c0_122, %c0_123] : memref<1x8x5x128xbf16, #tpu.memory_space<vmem>>, vector<1x1x5x128xbf16>
    %257 = vector.shape_cast %256 : vector<1x1x5x128xbf16> to vector<5x128xbf16>
    %258 = vector.shape_cast %255 : vector<5x128xbf16> to vector<1x1x5x128xbf16>
    tpu.vector_store %arg26[%c0_121, %c7, %c0_122, %c0_123], %258 {strides = array<i32>} : memref<1x8x5x128xbf16, #tpu.memory_space<vmem>>, vector<1x1x5x128xbf16>,
    %259 = arith.truncf %254 : vector<5x128xf32> to vector<5x128xbf16>
    %cst_124 = arith.constant dense<0.000000e+00> : vector<5x8xf32>
    %260 = tpu.matmul %259, %242, %cst_124 {dimension_numbers = #tpu.dot_dimension_numbers<[1], [0], [0], [1], [0, 0, 1, 1], [], []>} : vector<5x128xbf16>, vector<128x8xbf16>, vector<5x8xf32> -> vector<5x8xf32>
    %261 = arith.truncf %260 : vector<5x8xf32> to vector<5x8xbf16>
    %c0_125 = arith.constant 0 : index
    %c3_126 = arith.constant 3 : index
    %c0_127 = arith.constant 0 : index
    %c0_128 = arith.constant 0 : index
    %262 = vector.load %arg13[%c0_125, %c3_126, %c0_127, %c0_128] : memref<1x4x8x32xbf16, #tpu.memory_space<vmem>>, vector<1x1x8x32xbf16>
    %263 = vector.shape_cast %262 : vector<1x1x8x32xbf16> to vector<8x32xbf16>
    %cst_129 = arith.constant dense<0.000000e+00> : vector<5x32xf32>
    %264 = tpu.matmul %261, %263, %cst_129 {dimension_numbers = #tpu.dot_dimension_numbers<[1], [0], [0], [1], [0, 0, 1, 1], [], []>} : vector<5x8xbf16>, vector<8x32xbf16>, vector<5x32xf32> -> vector<5x32xf32>
    %265 = arith.addf %239, %264 : vector<5x32xf32>
    %c5_130 = arith.constant 5 : index
    %c0_131 = arith.constant 0 : index
    %266 = vector.load %arg27[%c5_130, %c0_131] : memref<10x32xf32, #tpu.memory_space<vmem>>, vector<5x32xf32>
    tpu.vector_store %arg27[%c5_130, %c0_131], %265 {strides = array<i32>} : memref<10x32xf32, #tpu.memory_space<vmem>>, vector<5x32xf32>,
    %c0_132 = arith.constant 0 : index
    %c0_133 = arith.constant 0 : index
    %267 = vector.load %arg27[%c0_132, %c0_133] : memref<10x32xf32, #tpu.memory_space<vmem>>, vector<10x32xf32>
    %c0_134 = arith.constant 0 : index
    %c0_135 = arith.constant 0 : index
    %c0_136 = arith.constant 0 : index
    %268 = vector.load %arg15[%c0_134, %c0_135, %c0_136] : memref<1x1x32xf32, #tpu.memory_space<vmem>>, vector<1x1x32xf32>
    %269 = vector.shape_cast %268 : vector<1x1x32xf32> to vector<32xf32>
    %c0_137 = arith.constant 0 : index
    %c0_138 = arith.constant 0 : index
    %c0_139 = arith.constant 0 : index
    %270 = vector.load %arg16[%c0_137, %c0_138, %c0_139] : memref<1x1x32xf32, #tpu.memory_space<vmem>>, vector<1x1x32xf32>
    %271 = vector.shape_cast %270 : vector<1x1x32xf32> to vector<32xf32>
    %cst_140 = arith.constant dense<0.000000e+00> : vector<10xf32>
    %272 = vector.multi_reduction <add>, %267, %cst_140 [1] : vector<10x32xf32> to vector<10xf32>
    %273 = vector.shape_cast %272 : vector<10xf32> to vector<10x1xf32>
    %cst_141 = arith.constant 3.200000e+01 : f32
    %274 = vector.broadcast %cst_141 : f32 to vector<10x1xf32>
    %275 = arith.divf %273, %274 : vector<10x1xf32>
    %276 = vector.broadcast %275 : vector<10x1xf32> to vector<10x32xf32>
    %277 = arith.subf %267, %276 : vector<10x32xf32>
    %278 = arith.mulf %277, %277 : vector<10x32xf32>
    %cst_142 = arith.constant dense<0.000000e+00> : vector<10xf32>
    %279 = vector.multi_reduction <add>, %278, %cst_142 [1] : vector<10x32xf32> to vector<10xf32>
    %280 = vector.shape_cast %279 : vector<10xf32> to vector<10x1xf32>
    %cst_143 = arith.constant 3.200000e+01 : f32
    %281 = vector.broadcast %cst_143 : f32 to vector<10x1xf32>
    %282 = arith.divf %280, %281 : vector<10x1xf32>
    %283 = vector.broadcast %275 : vector<10x1xf32> to vector<10x32xf32>
    %284 = arith.subf %267, %283 : vector<10x32xf32>
    %cst_144 = arith.constant 9.99999974E-6 : f32
    %285 = vector.broadcast %cst_144 : f32 to vector<10x1xf32>
    %286 = arith.addf %282, %285 : vector<10x1xf32>
    %287 = math.rsqrt %286 : vector<10x1xf32>
    %288 = vector.broadcast %287 : vector<10x1xf32> to vector<10x32xf32>
    %289 = arith.mulf %284, %288 : vector<10x32xf32>
    %290 = vector.shape_cast %269 : vector<32xf32> to vector<1x32xf32>
    %291 = vector.broadcast %290 : vector<1x32xf32> to vector<10x32xf32>
    %292 = arith.mulf %289, %291 : vector<10x32xf32>
    %293 = vector.shape_cast %271 : vector<32xf32> to vector<1x32xf32>
    %294 = vector.broadcast %293 : vector<1x32xf32> to vector<10x32xf32>
    %295 = arith.addf %292, %294 : vector<10x32xf32>
    %296 = arith.truncf %295 : vector<10x32xf32> to vector<10x32xbf16>
    %c0_145 = arith.constant 0 : index
    %c0_146 = arith.constant 0 : index
    %c0_147 = arith.constant 0 : index
    %297 = vector.load %arg17[%c0_145, %c0_146, %c0_147] : memref<1x32x16xbf16, #tpu.memory_space<vmem>>, vector<1x32x16xbf16>
    %298 = vector.shape_cast %297 : vector<1x32x16xbf16> to vector<32x16xbf16>
    %cst_148 = arith.constant dense<0.000000e+00> : vector<10x16xf32>
    %299 = tpu.matmul %296, %298, %cst_148 {dimension_numbers = #tpu.dot_dimension_numbers<[1], [0], [0], [1], [0, 0, 1, 1], [], []>} : vector<10x32xbf16>, vector<32x16xbf16>, vector<10x16xf32> -> vector<10x16xf32>
    %c0_149 = arith.constant 0 : index
    %c0_150 = arith.constant 0 : index
    %c0_151 = arith.constant 0 : index
    %300 = vector.load %arg18[%c0_149, %c0_150, %c0_151] : memref<1x1x16xf32, #tpu.memory_space<vmem>>, vector<1x1x16xf32>
    %301 = vector.shape_cast %300 : vector<1x1x16xf32> to vector<16xf32>
    %302 = vector.shape_cast %301 : vector<16xf32> to vector<1x16xf32>
    %303 = vector.broadcast %302 : vector<1x16xf32> to vector<10x16xf32>
    %304 = arith.addf %299, %303 : vector<10x16xf32>
    %cst_152 = arith.constant 5.000000e-01 : f32
    %305 = vector.broadcast %cst_152 : f32 to vector<10x16xf32>
    %306 = arith.mulf %305, %304 : vector<10x16xf32>
    %cst_153 = arith.constant 0.707106769 : f32
    %307 = vector.broadcast %cst_153 : f32 to vector<10x16xf32>
    %308 = arith.mulf %304, %307 : vector<10x16xf32>
    %309 = math.erf %308 : vector<10x16xf32>
    %cst_154 = arith.constant 1.000000e+00 : f32
    %310 = vector.broadcast %cst_154 : f32 to vector<10x16xf32>
    %311 = arith.addf %310, %309 : vector<10x16xf32>
    %312 = arith.mulf %306, %311 : vector<10x16xf32>
    %313 = arith.truncf %312 : vector<10x16xf32> to vector<10x16xbf16>
    %c0_155 = arith.constant 0 : index
    %c0_156 = arith.constant 0 : index
    %c0_157 = arith.constant 0 : index
    %314 = vector.load %arg19[%c0_155, %c0_156, %c0_157] : memref<1x16x32xbf16, #tpu.memory_space<vmem>>, vector<1x16x32xbf16>
    %315 = vector.shape_cast %314 : vector<1x16x32xbf16> to vector<16x32xbf16>
    %cst_158 = arith.constant dense<0.000000e+00> : vector<10x32xf32>
    %316 = tpu.matmul %313, %315, %cst_158 {dimension_numbers = #tpu.dot_dimension_numbers<[1], [0], [0], [1], [0, 0, 1, 1], [], []>} : vector<10x16xbf16>, vector<16x32xbf16>, vector<10x32xf32> -> vector<10x32xf32>
    %c0_159 = arith.constant 0 : index
    %c0_160 = arith.constant 0 : index
    %c0_161 = arith.constant 0 : index
    %317 = vector.load %arg20[%c0_159, %c0_160, %c0_161] : memref<1x1x32xf32, #tpu.memory_space<vmem>>, vector<1x1x32xf32>
    %318 = vector.shape_cast %317 : vector<1x1x32xf32> to vector<32xf32>
    %319 = vector.shape_cast %318 : vector<32xf32> to vector<1x32xf32>
    %320 = vector.broadcast %319 : vector<1x32xf32> to vector<10x32xf32>
    %321 = arith.addf %316, %320 : vector<10x32xf32>
    %322 = arith.addf %267, %321 : vector<10x32xf32>
    %c0_162 = arith.constant 0 : index
    %c0_163 = arith.constant 0 : index
    %323 = vector.load %arg27[%c0_162, %c0_163] : memref<10x32xf32, #tpu.memory_space<vmem>>, vector<10x32xf32>
    tpu.vector_store %arg27[%c0_162, %c0_163], %322 {strides = array<i32>} : memref<10x32xf32, #tpu.memory_space<vmem>>, vector<10x32xf32>,
    %c1_i32 = arith.constant 1 : i32
    %324 = arith.cmpi eq, %arg0, %c1_i32 : i32
    %325 = arith.extui %324 : i1 to i32
    %c0_i32_164 = arith.constant 0 : i32
    %326 = arith.cmpi ne, %325, %c0_i32_164 : i32
    scf.if %326 {
      %327 = vector.extract_strided_slice %322 {offsets = [0, 0], sizes = [1, 32], strides = [1, 1]} : vector<10x32xf32> to vector<1x32xf32>
      %328 = vector.extract_strided_slice %322 {offsets = [5, 0], sizes = [1, 32], strides = [1, 1]} : vector<10x32xf32> to vector<1x32xf32>
      %329 = tpu.concatenate %327, %328 in 0 : vector<1x32xf32>, vector<1x32xf32> -> vector<2x32xf32>
      %c0_165 = arith.constant 0 : index
      %c0_166 = arith.constant 0 : index
      %330 = vector.load %arg21[%c0_165, %c0_166] : memref<1x32xf32, #tpu.memory_space<vmem>>, vector<1x32xf32>
      %331 = vector.shape_cast %330 : vector<1x32xf32> to vector<32xf32>
      %c0_167 = arith.constant 0 : index
      %c0_168 = arith.constant 0 : index
      %332 = vector.load %arg22[%c0_167, %c0_168] : memref<1x32xf32, #tpu.memory_space<vmem>>, vector<1x32xf32>
      %333 = vector.shape_cast %332 : vector<1x32xf32> to vector<32xf32>
      %cst_169 = arith.constant dense<0.000000e+00> : vector<2xf32>
      %334 = vector.multi_reduction <add>, %329, %cst_169 [1] : vector<2x32xf32> to vector<2xf32>
      %335 = vector.shape_cast %334 : vector<2xf32> to vector<2x1xf32>
      %cst_170 = arith.constant 3.200000e+01 : f32
      %336 = vector.broadcast %cst_170 : f32 to vector<2x1xf32>
      %337 = arith.divf %335, %336 : vector<2x1xf32>
      %338 = vector.broadcast %337 : vector<2x1xf32> to vector<2x32xf32>
      %339 = arith.subf %329, %338 : vector<2x32xf32>
      %340 = arith.mulf %339, %339 : vector<2x32xf32>
      %cst_171 = arith.constant dense<0.000000e+00> : vector<2xf32>
      %341 = vector.multi_reduction <add>, %340, %cst_171 [1] : vector<2x32xf32> to vector<2xf32>
      %342 = vector.shape_cast %341 : vector<2xf32> to vector<2x1xf32>
      %cst_172 = arith.constant 3.200000e+01 : f32
      %343 = vector.broadcast %cst_172 : f32 to vector<2x1xf32>
      %344 = arith.divf %342, %343 : vector<2x1xf32>
      %345 = vector.broadcast %337 : vector<2x1xf32> to vector<2x32xf32>
      %346 = arith.subf %329, %345 : vector<2x32xf32>
      %cst_173 = arith.constant 9.99999974E-6 : f32
      %347 = vector.broadcast %cst_173 : f32 to vector<2x1xf32>
      %348 = arith.addf %344, %347 : vector<2x1xf32>
      %349 = math.rsqrt %348 : vector<2x1xf32>
      %350 = vector.broadcast %349 : vector<2x1xf32> to vector<2x32xf32>
      %351 = arith.mulf %346, %350 : vector<2x32xf32>
      %352 = vector.shape_cast %331 : vector<32xf32> to vector<1x32xf32>
      %353 = vector.broadcast %352 : vector<1x32xf32> to vector<2x32xf32>
      %354 = arith.mulf %351, %353 : vector<2x32xf32>
      %355 = vector.shape_cast %333 : vector<32xf32> to vector<1x32xf32>
      %356 = vector.broadcast %355 : vector<1x32xf32> to vector<2x32xf32>
      %357 = arith.addf %354, %356 : vector<2x32xf32>
      %358 = arith.truncf %357 : vector<2x32xf32> to vector<2x32xbf16>
      %c0_174 = arith.constant 0 : index
      %c0_175 = arith.constant 0 : index
      %359 = vector.load %arg23[%c0_174, %c0_175] : memref<32x10xbf16, #tpu.memory_space<vmem>>, vector<32x10xbf16>
      %cst_176 = arith.constant dense<0.000000e+00> : vector<2x10xf32>
      %360 = tpu.matmul %358, %359, %cst_176 {dimension_numbers = #tpu.dot_dimension_numbers<[1], [0], [0], [1], [0, 0, 1, 1], [], []>} : vector<2x32xbf16>, vector<32x10xbf16>, vector<2x10xf32> -> vector<2x10xf32>
      %c0_177 = arith.constant 0 : index
      %c0_178 = arith.constant 0 : index
      %361 = vector.load %arg24[%c0_177, %c0_178] : memref<1x10xf32, #tpu.memory_space<vmem>>, vector<1x10xf32>
      %362 = vector.shape_cast %361 : vector<1x10xf32> to vector<10xf32>
      %363 = vector.shape_cast %362 : vector<10xf32> to vector<1x10xf32>
      %364 = vector.broadcast %363 : vector<1x10xf32> to vector<2x10xf32>
      %365 = arith.addf %360, %364 : vector<2x10xf32>
      %c0_179 = arith.constant 0 : index
      %c0_180 = arith.constant 0 : index
      %366 = vector.load %arg25[%c0_179, %c0_180] : memref<2x10xf32, #tpu.memory_space<vmem>>, vector<2x10xf32>
      tpu.vector_store %arg25[%c0_179, %c0_180], %365 {strides = array<i32>} : memref<2x10xf32, #tpu.memory_space<vmem>>, vector<2x10xf32>,
    } else {
    }
    return
  }
  func.func @transform_0(%arg0: i32) -> (i32, i32, i32) {
    %c0_i32 = arith.constant 0 : i32
    %c0_i32_0 = arith.constant 0 : i32
    %c0_i32_1 = arith.constant 0 : i32
    %c0_i32_2 = arith.constant 0 : i32
    return %c0_i32, %c0_i32_0, %c0_i32_1 : i32, i32, i32
  }
  func.func @transform_1(%arg0: i32) -> (i32, i32) {
    %c0_i32 = arith.constant 0 : i32
    %c0_i32_0 = arith.constant 0 : i32
    %c0_i32_1 = arith.constant 0 : i32
    return %c0_i32, %c0_i32_0 : i32, i32
  }
  func.func @transform_2(%arg0: i32) -> (i32, i32) {
    %c0_i32 = arith.constant 0 : i32
    %c0_i32_0 = arith.constant 0 : i32
    %c0_i32_1 = arith.constant 0 : i32
    return %c0_i32, %c0_i32_0 : i32, i32
  }
  func.func @transform_3(%arg0: i32) -> (i32, i32) {
    %c0_i32 = arith.constant 0 : i32
    %c0_i32_0 = arith.constant 0 : i32
    %c0_i32_1 = arith.constant 0 : i32
    return %c0_i32, %c0_i32_0 : i32, i32
  }
  func.func @transform_4(%arg0: i32) -> (i32, i32) {
    %c0_i32 = arith.constant 0 : i32
    %c0_i32_0 = arith.constant 0 : i32
    %c0_i32_1 = arith.constant 0 : i32
    return %c0_i32, %c0_i32_0 : i32, i32
  }
  func.func @transform_5(%arg0: i32) -> (i32, i32) {
    %c0_i32 = arith.constant 0 : i32
    %c0_i32_0 = arith.constant 0 : i32
    %c0_i32_1 = arith.constant 0 : i32
    return %c0_i32, %c0_i32_0 : i32, i32
  }
  func.func @transform_6(%arg0: i32) -> (i32, i32) {
    %c0_i32 = arith.constant 0 : i32
    %c0_i32_0 = arith.constant 0 : i32
    %c0_i32_1 = arith.constant 0 : i32
    return %c0_i32, %c0_i32_0 : i32, i32
  }
  func.func @transform_7(%arg0: i32) -> (i32, i32, i32) {
    %c0_i32 = arith.constant 0 : i32
    %c0_i32_0 = arith.constant 0 : i32
    %c0_i32_1 = arith.constant 0 : i32
    %c0_i32_2 = arith.constant 0 : i32
    return %c0_i32, %c0_i32_0, %c0_i32_1 : i32, i32, i32
  }
  func.func @transform_8(%arg0: i32) -> (i32, i32, i32) {
    %c0_i32 = arith.constant 0 : i32
    %c0_i32_0 = arith.constant 0 : i32
    %c0_i32_1 = arith.constant 0 : i32
    %c0_i32_2 = arith.constant 0 : i32
    return %c0_i32, %c0_i32_0, %c0_i32_1 : i32, i32, i32
  }
  func.func @transform_9(%arg0: i32) -> (i32, i32, i32) {
    %c0_i32 = arith.constant 0 : i32
    %c0_i32_0 = arith.constant 0 : i32
    %c0_i32_1 = arith.constant 0 : i32
    return %arg0, %c0_i32, %c0_i32_0 : i32, i32, i32
  }
  func.func @transform_10(%arg0: i32) -> (i32, i32, i32) {
    %c0_i32 = arith.constant 0 : i32
    %c0_i32_0 = arith.constant 0 : i32
    %c0_i32_1 = arith.constant 0 : i32
    return %arg0, %c0_i32, %c0_i32_0 : i32, i32, i32
  }
  func.func @transform_11(%arg0: i32) -> (i32, i32, i32) {
    %c0_i32 = arith.constant 0 : i32
    %c0_i32_0 = arith.constant 0 : i32
    %c0_i32_1 = arith.constant 0 : i32
    return %arg0, %c0_i32, %c0_i32_0 : i32, i32, i32
  }
  func.func @transform_12(%arg0: i32) -> (i32, i32, i32, i32) {
    %c0_i32 = arith.constant 0 : i32
    %c0_i32_0 = arith.constant 0 : i32
    %c0_i32_1 = arith.constant 0 : i32
    %c0_i32_2 = arith.constant 0 : i32
    return %arg0, %c0_i32, %c0_i32_0, %c0_i32_1 : i32, i32, i32, i32
  }
  func.func @transform_13(%arg0: i32) -> (i32, i32, i32) {
    %c0_i32 = arith.constant 0 : i32
    %c0_i32_0 = arith.constant 0 : i32
    %c0_i32_1 = arith.constant 0 : i32
    return %arg0, %c0_i32, %c0_i32_0 : i32, i32, i32
  }
  func.func @transform_14(%arg0: i32) -> (i32, i32, i32) {
    %c0_i32 = arith.constant 0 : i32
    %c0_i32_0 = arith.constant 0 : i32
    %c0_i32_1 = arith.constant 0 : i32
    return %arg0, %c0_i32, %c0_i32_0 : i32, i32, i32
  }
  func.func @transform_15(%arg0: i32) -> (i32, i32, i32) {
    %c0_i32 = arith.constant 0 : i32
    %c0_i32_0 = arith.constant 0 : i32
    %c0_i32_1 = arith.constant 0 : i32
    return %arg0, %c0_i32, %c0_i32_0 : i32, i32, i32
  }
  func.func @transform_16(%arg0: i32) -> (i32, i32, i32) {
    %c0_i32 = arith.constant 0 : i32
    %c0_i32_0 = arith.constant 0 : i32
    %c0_i32_1 = arith.constant 0 : i32
    return %arg0, %c0_i32, %c0_i32_0 : i32, i32, i32
  }
  func.func @transform_17(%arg0: i32) -> (i32, i32, i32) {
    %c0_i32 = arith.constant 0 : i32
    %c0_i32_0 = arith.constant 0 : i32
    %c0_i32_1 = arith.constant 0 : i32
    return %arg0, %c0_i32, %c0_i32_0 : i32, i32, i32
  }
  func.func @transform_18(%arg0: i32) -> (i32, i32, i32) {
    %c0_i32 = arith.constant 0 : i32
    %c0_i32_0 = arith.constant 0 : i32
    %c0_i32_1 = arith.constant 0 : i32
    return %arg0, %c0_i32, %c0_i32_0 : i32, i32, i32
  }
  func.func @transform_19(%arg0: i32) -> (i32, i32, i32) {
    %c0_i32 = arith.constant 0 : i32
    %c0_i32_0 = arith.constant 0 : i32
    %c0_i32_1 = arith.constant 0 : i32
    return %arg0, %c0_i32, %c0_i32_0 : i32, i32, i32
  }
  func.func @transform_20(%arg0: i32) -> (i32, i32) {
    %c0_i32 = arith.constant 0 : i32
    %c0_i32_0 = arith.constant 0 : i32
    %c0_i32_1 = arith.constant 0 : i32
    return %c0_i32, %c0_i32_0 : i32, i32
  }
  func.func @transform_21(%arg0: i32) -> (i32, i32) {
    %c0_i32 = arith.constant 0 : i32
    %c0_i32_0 = arith.constant 0 : i32
    %c0_i32_1 = arith.constant 0 : i32
    return %c0_i32, %c0_i32_0 : i32, i32
  }
  func.func @transform_22(%arg0: i32) -> (i32, i32) {
    %c0_i32 = arith.constant 0 : i32
    %c0_i32_0 = arith.constant 0 : i32
    %c0_i32_1 = arith.constant 0 : i32
    return %c0_i32, %c0_i32_0 : i32, i32
  }
  func.func @transform_23(%arg0: i32) -> (i32, i32) {
    %c0_i32 = arith.constant 0 : i32
    %c0_i32_0 = arith.constant 0 : i32
    %c0_i32_1 = arith.constant 0 : i32
    return %c0_i32, %c0_i32_0 : i32, i32
  }
  func.func @transform_24(%arg0: i32) -> (i32, i32) {
    %c0_i32 = arith.constant 0 : i32
    %c0_i32_0 = arith.constant 0 : i32
    %c0_i32_1 = arith.constant 0 : i32
    return %c0_i32, %c0_i32_0 : i32, i32
  }
  func.func @transform_25(%arg0: i32) -> (i32, i32, i32, i32) {
    %c0_i32 = arith.constant 0 : i32
    %c0_i32_0 = arith.constant 0 : i32
    %c0_i32_1 = arith.constant 0 : i32
    %c0_i32_2 = arith.constant 0 : i32
    return %arg0, %c0_i32, %c0_i32_0, %c0_i32_1 : i32, i32, i32, i32
  }
}

</mosaic_0001>

<bundles_post_ra>
// kernel: basic_vit_forward.1
= control target key start
LH: loop header
LB: loop body
LE: loop exit
PB: predicated region body
PF: predicated region fallthrough
CT: control target
= control target key end

     0   :  { %s3647_s0 = inlined_call_operand.vmem [shape: f32[2,4,64], index: 0, kind: input, shape index: {}]   ;;  %s3648_s1 = inlined_call_operand.vmem [shape: f32[1,64], index: 1, kind: input, shape index: {}]   ;;  %s3649_s2 = inlined_call_operand.vmem [shape: f32[1,64], index: 2, kind: input, shape index: {}]   ;;  %s3650_s3 = inlined_call_operand.vmem [shape: bf16[64,32], index: 3, kind: input, shape index: {}]   ;;  %s3651_s4 = inlined_call_operand.vmem [shape: f32[1,32], index: 4, kind: input, shape index: {}]   ;;  %s3652_s5 = inlined_call_operand.vmem [shape: f32[1,32], index: 5, kind: input, shape index: {}]   ;;  %s3653_s6 = inlined_call_operand.vmem [shape: f32[1,32], index: 6, kind: input, shape index: {}]   ;;  %s3654_s7 = inlined_call_operand.vmem [shape: f32[1,1,32], index: 7, kind: input, shape index: {}]   ;;  %s3655_s8 = inlined_call_operand.vmem [shape: f32[1,5,32], index: 8, kind: input, shape index: {}]   ;;  %s3656_s9 = inlined_call_operand.vmem [shape: f32[2,1,32], index: 9, kind: input, shape index: {}]   ;;  %s3657_s10 = inlined_call_operand.vmem [shape: f32[2,1,32], index: 10, kind: input, shape index: {}]   ;;  %s3658_s11 = inlined_call_operand.vmem [shape: bf16[2,32,96], index: 11, kind: input, shape index: {}]   ;;  %s3659_s12 = inlined_call_operand.vmem [shape: bf16[2,4,8,32], index: 12, kind: input, shape index: {}]   ;;  %s3660_s13 = inlined_call_operand.vmem [shape: f32[2,1,32], index: 13, kind: input, shape index: {}]   ;;  %s3661_s14 = inlined_call_operand.vmem [shape: f32[2,1,32], index: 14, kind: input, shape index: {}]   ;;  %s3662_s15 = inlined_call_operand.vmem [shape: f32[2,1,32], index: 15, kind: input, shape index: {}]   ;;  %s3663_s16 = inlined_call_operand.vmem [shape: bf16[2,32,16], index: 16, kind: input, shape index: {}]   ;;  %s3664_s17 = inlined_call_operand.vmem [shape: f32[2,1,16], index: 17, kind: input, shape index: {}]   ;;  %s3665_s18 = inlined_call_operand.vmem [shape: bf16[2,16,32], index: 18, kind: input, shape index: {}]   ;;  %s3666_s19 = inlined_call_operand.vmem [shape: f32[2,1,32], index: 19, kind: input, shape index: {}]   ;;  %s3667_s20 = inlined_call_operand.vmem [shape: f32[1,32], index: 20, kind: input, shape index: {}]   ;;  %s3668_s21 = inlined_call_operand.vmem [shape: f32[1,32], index: 21, kind: input, shape index: {}]   ;;  %s3669_s22 = inlined_call_operand.vmem [shape: bf16[32,10], index: 22, kind: input, shape index: {}]   ;;  %s3670_s23 = inlined_call_operand.vmem [shape: f32[1,10], index: 23, kind: input, shape index: {}]   ;;  %s3671_s24 = inlined_call_operand.hbm [shape: f32[2,10], index: 24, kind: output, shape index: {0}]   ;;  %s3672_s25 = inlined_call_operand.vmem [shape: bf16[2,8,5,128], index: 25, kind: output, shape index: {1}]  }
   0x1   :  { %3684 = sst [smem:[#allocation7_spill]] %s3647_s0 }
   0x2   :  { %3685 = sst [smem:[#allocation8_spill]] %s3648_s1 }
   0x3   :  { %3686 = sst [smem:[#allocation9_spill]] %s3649_s2 }
   0x4   :  { %3687 = sst [smem:[#allocation10_spill]] %s3650_s3 }
   0x5   :  { %3688 = sst [smem:[#allocation11_spill]] %s3651_s4 }
   0x6   :  { %3689 = sst [smem:[#allocation12_spill]] %s3652_s5 }
   0x7   :  { %3690 = sst [smem:[#allocation13_spill]] %s3653_s6 }
   0x8   :  { %3691 = sst [smem:[#allocation14_spill]] %s3654_s7 }
   0x9   :  { %3692 = sst [smem:[#allocation15_spill]] %s3655_s8 }
   0xa   :  { %3693 = sst [smem:[#allocation16_spill]] %s3656_s9 }
   0xb   :  { %3694 = sst [smem:[#allocation17_spill]] %s3658_s11 }
   0xc   :  { %3695 = sst [smem:[#allocation18_spill]] %s3659_s12 }
   0xd   :  { %3696 = sst [smem:[#allocation19_spill]] %s3660_s13 }
   0xe   :  { %3697 = sst [smem:[#allocation20_spill]] %s3667_s20 }
   0xf   :  { %3698 = sst [smem:[#allocation21_spill]] %s3668_s21 }
  0x10   :  { %3699 = sst [smem:[#allocation22_spill]] %s3670_s23 }
  0x11   :  { %3700 = sst [smem:[#allocation23_spill]] %s3671_s24 }
  0x12   :  { %31 = vsyncpa [#allocation4], 0  ;;  %s3046_s29 = smov 0  }
  0x13 LB: > { %3701 = sst [smem:[#allocation6_spill]] %s2898_s29  ;;  %s3052_s2 = sadd.s32 4294967295, %s2898_s29   ;;  %s2898_s29 = sphi %s3046_s29, %s37_s29  }
  0x14   : > { %p2606_p0 = scmp.ge.s32.totalorder %s2898_s29, 1  ;;  %p772_p1 = scmp.lt.s32.totalorder %s2898_s29, 3 }
  0x16   : > { %p773_p2 = pnand %p2606_p0, %p772_p1 }
  0x17   : > { %p876_p3 = scmp.lt.s32.totalorder (!%p773_p2), %s3052_s2, 1  ;;  %s3703_s13 = sld [smem:[#allocation19_spill]] (!%p773_p2) }
  0x18   : > { %776 = sbr.rel (%p773_p2) target bundleno = 5686 (0x1636), region = 116  ;;  %s3704_s11 = sld [smem:[#allocation17_spill]] (!%p773_p2) }
  0x19   : > { %s3705_s12 = sld [smem:[#allocation18_spill]] (!%p773_p2)  ;;  %p2617_p4 = scmp.ne.s32.totalorder (!%p773_p2), %s3052_s2, 0 }
  0x1d   : > { %s3058_s6 = scalar_select %p876_p3, %s3052_s2, 1 }
  0x1e   : > { %s3706_s0 = sld [smem:[#allocation7_spill]] (!%p2617_p4) }
  0x1f   : > { %s2728_s4 = sshll.u32 %s3058_s6, 4  ;;  %s3073_s5 = scalar_lea.vmem %s3703_s13, %s3058_s6 }
  0x20   : > { %s3078_s7 = scalar_lea.vmem %s3704_s11, %s2728_s4  ;;  %s3083_s23 = scalar_lea.vmem %s3705_s12, %s2728_s4 }
  0x21   : > { %s3096_s21 = scalar_lea.vmem %s3663_s16, %s2728_s4  ;;  %s2731_s24 = sshll.u32 %s3058_s6, 3 }
  0x22   : > { %s3110_s1 = scalar_lea.vmem %s3665_s18, %s2731_s24  ;;  %s2732_s27 = sshll.u32 %s3058_s6, 5 }
  0x23   : > { %s3116_s13 = scalar_lea.vmem %s3672_s25, %s2732_s27  ;;  %926 = sbr.rel (%p2617_p4) target bundleno = 721 (0x2d1), region = 120 }
  0x24   : > { %s3707_s29 = sld [smem:[#allocation10_spill]] (!%p2617_p4) }
  0x25   : > { %s3709_s9 = sld [smem:[#allocation8_spill]] (!%p2617_p4) }
  0x26   : > { %s3710_s28 = sld [smem:[#allocation9_spill]] (!%p2617_p4) }
  0x27   : > { %s3711_s4 = sld [smem:[#allocation11_spill]] (!%p2617_p4) }
  0x28   : > { %v929_v0 = vld [vmem:[%s3706_s0] sm:$0xf]  ;;  %vm932_vm0 = vcmask 519168   ;;  %v2635_v2 = vld [vmem:[%s3706_s0 + $0x4] sm:$0xf]  ;;  %v2900_v4 = vmov 64.0  }
  0x29   : > { %v933_v1 = vsel %vm932_vm0, %v929_v0, 0.0  ;;  %v1080_v3 = vsel %vm932_vm0, %v2635_v2, 0.0  ;;  %2788 = vrcp.f32 %v2900_v4  ;;  %vm1007_vm7 = vcmask 523264   ;;  %s3712_s3 = sld [smem:[#allocation12_spill]] }
  0x2a   : > { %934 = vadd.xlane.f32.xlu0 %v933_v1  ;;  %s3708_s26 = smov %s3707_s29  ;;  %v2736_v21 = vld [vmem:[%s3707_s29 + $0x18] sm:$0xff]  ;;  %vm1026_vm9 = vcmask 257024   ;;  %s3713_s20 = sld [smem:[#allocation15_spill]] }
  0x2b   : > { %1015 = vmatpush.bf16.msra.mxu0 %v2736_v21  ;;  %v2735_v22 = vld [vmem:[%s3708_s26 + $0x10] sm:$0xff]  ;;  %v2734_v23 = vld [vmem:[%s3708_s26 + $0x8] sm:$0xff]  ;;  %v2740_v24 = vld [vmem:[%s3708_s26 + $0x18] sm:$0xff]  ;;  %s3714_s11 = sld [smem:[#allocation13_spill]] }
  0x2c   : > { %1154 = vmatpush.bf16.msra.mxu1 %v2740_v24  ;;  %v2733_v25 = vld [vmem:[%s3708_s26] sm:$0xff]  ;;  %v2739_v26 = vld [vmem:[%s3708_s26 + $0x10] sm:$0xff]  ;;  %v2738_v27 = vld [vmem:[%s3708_s26 + $0x8] sm:$0xff] }
  0x2d   : > { %v2737_v29 = vld [vmem:[%s3708_s26] sm:$0xff] }
  0x2e   : > { %v2778_v43 = vld [vmem:[%s3709_s9] ss:$0 sm:$0xff] }
  0x2f   : > { %v2789_v5 = vpop.eup %2788  ;;  %1016 = vmatpush.bf16.msra.mxu0 %v2735_v22  ;;  %v2779_v47 = vld [vmem:[%s3710_s28] ss:$0 sm:$0xff] }
  0x30   : > { %v937_v6 = vmul.f32 64.0, %v2789_v5  ;;  %vm941_vm1 = vweird.f32 %v2789_v5  ;;  %1155 = vmatpush.bf16.msra.mxu1 %v2739_v26  ;;  %v2780_v54 = vld [vmem:[%s3709_s9] ss:$0 sm:$0xff]  ;;  %s3715_s9 = sld [smem:[#allocation14_spill]] }
  0x31   : > { %v2781_v57 = vld [vmem:[%s3710_s28] ss:$0 sm:$0xff] }
  0x32   : > { %1081 = vadd.xlane.f32.xlu0 %v1080_v3  ;;  %v938_v7 = vsub.f32 1.0, %v937_v6  ;;  %v2782_v61 = vld [vmem:[%s3711_s4] ss:$0 sm:$0xff] }
  0x33   : > { %1017 = vmatpush.bf16.msra.mxu0 %v2734_v23  ;;  %v2783_v1 = vld [vmem:[%s3711_s4] ss:$0 sm:$0xff] }
  0x34   : > { %v939_v8 = vmul.f32 %v2789_v5, %v938_v7  ;;  %1156 = vmatpush.bf16.msra.mxu1 %v2738_v27  ;;  %v2901_v7 = vmov 32.0  }
  0x36   : > { %v940_v9 = vadd.f32 %v2789_v5, %v939_v8 }
  0x37   : > { %1018 = vmatpush.bf16.msra.mxu0 %v2733_v25 }
  0x38   : > { %v942_v10 = vsel %vm941_vm1, %v2789_v5, %v940_v9  ;;  %1157 = vmatpush.bf16.msra.mxu1 %v2737_v29  ;;  %vm1072_vm1 = vcmask 1040384  }
  0x9d   : > { %v935_v11 = vpop.xlane.xlu0 %934 }
  0x9e   : > { %v943_v12 = vmul.f32 %v942_v10, %v935_v11 }
  0xa0   : > { %v944_v13 = vsub.f32 %v929_v0, %v943_v12 }
  0xa2   : > { %v945_v14 = vmul.f32 %v944_v13, %v944_v13 }
  0xa4   : > { %v946_v15 = vsel %vm932_vm0, %v945_v14, 0.0 }
  0xa5   : > { %947 = vadd.xlane.f32.xlu1 %v946_v15  ;;  %v1082_v16 = vpop.xlane.xlu0 %1081 }
  0xa6   : > { %v1083_v17 = vmul.f32 %v1082_v16, %v942_v10 }
  0xa8   : > { %v1084_v18 = vsub.f32 %v2635_v2, %v1083_v17 }
  0xaa   : > { %v1085_v19 = vmul.f32 %v1084_v18, %v1084_v18 }
  0xac   : > { %v1086_v20 = vsel %vm932_vm0, %v1085_v19, 0.0 }
  0xad   : > { %1087 = vadd.xlane.f32.xlu1 %v1086_v20 }
 0x118   : > { %v948_v28 = vpop.xlane.xlu1 %947 }
 0x119   : > { %v949_v30 = vmul.f32 %v948_v28, %v942_v10 }
 0x11b   : > { %v950_v31 = vadd.f32 1e-05, %v949_v30 }
 0x11d   : > { %2790 = vrsqrt.f32 %v950_v31  ;;  %vm957_vm3 = vweird.f32 %v950_v31 }
 0x120   : > { %v1088_v32 = vpop.xlane.xlu1 %1087 }
 0x121   : > { %v1089_v33 = vmul.f32 %v1088_v32, %v942_v10 }
 0x123   : > { %v2791_v34 = vpop.eup %2790  ;;  %v1090_v35 = vadd.f32 1e-05, %v1089_v33 }
 0x124   : > { %v952_v36 = vmul.f32 %v2791_v34, %v950_v31  ;;  %vm958_vm2 = vweird.f32 %v2791_v34 }
 0x125   : > { %2792 = vrsqrt.f32 %v1090_v35  ;;  %vm959_vm4 = vmor %vm957_vm3, %vm958_vm2  ;;  %vm1097_vm6 = vweird.f32 %v1090_v35  ;;  %vm1074_vm2 = vcmask 258048  }
 0x126   : > { %v953_v37 = vmul.f32 %v2791_v34, %v952_v36  ;;  %2794 = vrcp.f32 %v2901_v7 }
 0x128   : > { %v954_v38 = vmul.f32 0.5, %v953_v37 }
 0x12a   : > { %v955_v39 = vsub.f32 1.5, %v954_v38  ;;  %v2784_v38 = vld [vmem:[%s3712_s3] ss:$0 sm:$0xff] }
 0x12b   : > { %v2793_v40 = vpop.eup %2792 }
 0x12c   : > { %v956_v41 = vmul.f32 %v2791_v34, %v955_v39  ;;  %v1092_v42 = vmul.f32 %v2793_v40, %v1090_v35  ;;  %vm1098_vm5 = vweird.f32 %v2793_v40  ;;  %v2795_v8 = vpop.eup %2794  ;;  %v927_v39 = vld [vmem:[%s3713_s20] sm:$0x1f] }
 0x12d   : > { %vm1099_vm8 = vmor %vm1097_vm6, %vm1098_vm5  ;;  %v1031_v9 = vmul.f32 32.0, %v2795_v8  ;;  %vm1035_vm10 = vweird.f32 %v2795_v8 }
 0x12e   : > { %v960_v44 = vsel %vm959_vm4, %v2791_v34, %v956_v41  ;;  %v1093_v45 = vmul.f32 %v2793_v40, %v1092_v42  ;;  %v2785_v42 = vld [vmem:[%s3714_s11] ss:$0 sm:$0xff] }
 0x12f   : > { %v961_v46 = vmul.f32 %v960_v44, %v944_v13  ;;  %v1032_v10 = vsub.f32 1.0, %v1031_v9 }
 0x130   : > { %v1094_v48 = vmul.f32 0.5, %v1093_v45 }
 0x131   : > { %v965_v49 = vmul.f32 %v2778_v43, %v961_v46  ;;  %v1033_v11 = vmul.f32 %v2795_v8, %v1032_v10  ;;  %v1066_v46 = vrot.slane %v927_v39, 1 }
 0x132   : > { %v1095_v50 = vsub.f32 1.5, %v1094_v48 }
 0x133   : > { %v969_v51 = vadd.f32 %v2779_v47, %v965_v49  ;;  %v1034_v12 = vadd.f32 %v2795_v8, %v1033_v11  ;;  %v928_v47 = vld [vmem:[%s3715_s9] sm:$0x1] }
 0x134   : > { %v1096_v52 = vmul.f32 %v2793_v40, %v1095_v50 }
 0x135   : > { %v970_v53 = vpack.c.bf16 %v969_v51, %v969_v51  ;;  %v1036_v13 = vsel %vm1035_vm10, %v2795_v8, %v1034_v12  ;;  %v1064_v51 = vadd.f32 %v928_v47, %v927_v39 }
 0x136   : > { %v1100_v55 = vsel %vm1099_vm8, %v2793_v40, %v1096_v52 }
 0x137   : > { %2634 = vmatmul.msk.bf16.vlgmr.msra.gmra.mxu0 %vm1007_vm7, %v970_v53  ;;  %v1101_v56 = vmul.f32 %v1100_v55, %v1084_v18  ;;  %v2786_v53 = vld [vmem:[%s3712_s3] ss:$0 sm:$0xff] }
 0x139   : > { %v1105_v58 = vmul.f32 %v2780_v54, %v1101_v56  ;;  %v2787_v56 = vld [vmem:[%s3714_s11] ss:$0 sm:$0xff] }
 0x13b   : > { %v1109_v59 = vadd.f32 %v2781_v57, %v1105_v58 }
 0x13d   : > { %v1110_v60 = vpack.c.bf16 %v1109_v59, %v1109_v59 }
 0x13f   : > { %2652 = vmatmul.msk.bf16.vlgmr.msra.gmra.mxu1 %vm1007_vm7, %v1110_v60 }
 0x1b4   : > { %v1020_v62 = vpop.f32.mrf.mxu0 }
 0x1b5   : > { %v1021_v63 = vadd.f32 %v2782_v61, %v1020_v62 }
 0x1b7   : > { %v1027_v0 = vsel %vm1026_vm9, %v1021_v63, 0.0 }
 0x1b8   : > { %1028 = vadd.xlane.f32.xlu2 %v1027_v0 }
 0x1bc   : > { %v1022_v2 = vpop.f32.mrf.mxu0  ;;  %v1159_v3 = vpop.f32.mrf.mxu1 }
 0x1bd   : > { %v1160_v4 = vadd.f32 %v2783_v1, %v1159_v3 }
 0x1bf   : > { %v1165_v5 = vsel %vm1026_vm9, %v1160_v4, 0.0 }
 0x1c0   : > { %1166 = vadd.xlane.f32.xlu2 %v1165_v5 }
 0x1c4   : > { %v1161_v6 = vpop.f32.mrf.mxu1 }
 0x22b   : > { %v1029_v14 = vpop.xlane.xlu2 %1028 }
 0x22c   : > { %v1037_v15 = vmul.f32 %v1036_v13, %v1029_v14 }
 0x22e   : > { %v1038_v16 = vsub.f32 %v1021_v63, %v1037_v15 }
 0x230   : > { %v1039_v17 = vmul.f32 %v1038_v16, %v1038_v16 }
 0x232   : > { %v1040_v18 = vsel %vm1026_vm9, %v1039_v17, 0.0 }
 0x233   : > { %1041 = vadd.xlane.f32.xlu0 %v1040_v18  ;;  %v1167_v19 = vpop.xlane.xlu2 %1166 }
 0x234   : > { %v1168_v20 = vmul.f32 %v1167_v19, %v1036_v13 }
 0x236   : > { %v1169_v21 = vsub.f32 %v1160_v4, %v1168_v20 }
 0x238   : > { %v1170_v22 = vmul.f32 %v1169_v21, %v1169_v21 }
 0x23a   : > { %v1171_v23 = vsel %vm1026_vm9, %v1170_v22, 0.0 }
 0x23b   : > { %1172 = vadd.xlane.f32.xlu1 %v1171_v23 }
 0x2a6   : > { %v1042_v24 = vpop.xlane.xlu0 %1041 }
 0x2a7   : > { %v1043_v25 = vmul.f32 %v1042_v24, %v1036_v13 }
 0x2a9   : > { %v1044_v26 = vadd.f32 1e-05, %v1043_v25 }
 0x2ab   : > { %2796 = vrsqrt.f32 %v1044_v26  ;;  %vm1051_vm12 = vweird.f32 %v1044_v26 }
 0x2ae   : > { %v1173_v27 = vpop.xlane.xlu1 %1172 }
 0x2af   : > { %v1174_v28 = vmul.f32 %v1173_v27, %v1036_v13 }
 0x2b1   : > { %v2797_v29 = vpop.eup %2796  ;;  %v1175_v30 = vadd.f32 1e-05, %v1174_v28 }
 0x2b2   : > { %v1046_v31 = vmul.f32 %v2797_v29, %v1044_v26  ;;  %vm1052_vm11 = vweird.f32 %v2797_v29 }
 0x2b3   : > { %2798 = vrsqrt.f32 %v1175_v30  ;;  %vm1053_vm13 = vmor %vm1051_vm12, %vm1052_vm11  ;;  %vm1182_vm15 = vweird.f32 %v1175_v30 }
 0x2b4   : > { %v1047_v32 = vmul.f32 %v2797_v29, %v1046_v31 }
 0x2b6   : > { %v1048_v33 = vmul.f32 0.5, %v1047_v32 }
 0x2b8   : > { %v1049_v34 = vsub.f32 1.5, %v1048_v33 }
 0x2b9   : > { %v2799_v35 = vpop.eup %2798 }
 0x2ba   : > { %v1050_v36 = vmul.f32 %v2797_v29, %v1049_v34  ;;  %v1177_v37 = vmul.f32 %v2799_v35, %v1175_v30  ;;  %vm1183_vm14 = vweird.f32 %v2799_v35 }
 0x2bb   : > { %vm1184_vm0 = vmor %vm1182_vm15, %vm1183_vm14 }
 0x2bc   : > { %v1054_v40 = vsel %vm1053_vm13, %v2797_v29, %v1050_v36  ;;  %v1178_v41 = vmul.f32 %v2799_v35, %v1177_v37 }
 0x2bd   : > { %v1055_v43 = vmul.f32 %v1054_v40, %v1038_v16 }
 0x2be   : > { %v1179_v44 = vmul.f32 0.5, %v1178_v41 }
 0x2bf   : > { %v1059_v45 = vmul.f32 %v2784_v38, %v1055_v43 }
 0x2c0   : > { %v1180_v48 = vsub.f32 1.5, %v1179_v44 }
 0x2c1   : > { %v1063_v49 = vadd.f32 %v2785_v42, %v1059_v45 }
 0x2c2   : > { %v1181_v50 = vmul.f32 %v2799_v35, %v1180_v48 }
 0x2c3   : > { %v1068_v52 = vadd.f32 %v1066_v46, %v1063_v49 }
 0x2c4   : > { %v1185_v54 = vsel %vm1184_vm0, %v2799_v35, %v1181_v50 }
 0x2c5   : > { %v1070_v55 = vrot.slane %v1068_v52, 7  ;;  %v1186_v57 = vmul.f32 %v1185_v54, %v1169_v21 }
 0x2c7   : > { %v1073_v58 = vsel %vm1072_vm1, %v1064_v51, %v1070_v55  ;;  %v1190_v59 = vmul.f32 %v2786_v53, %v1186_v57 }
 0x2c8   : > { %1075 = vst.msk [vmem:[#allocation2] sm:$0x1f] %vm1074_vm2, %v1073_v58 }
 0x2c9   : > { %v1194_v60 = vadd.f32 %v2787_v56, %v1190_v59 }
 0x2cb   : > { %v1195_v61 = vadd.f32 %v1194_v60, %v1066_v46 }
 0x2cd   : > { %v1197_v62 = vrot.slane %v1195_v61, 7 }
 0x2cf   : > { %v1199_v63 = vsel %vm1072_vm1, %v1064_v51, %v1197_v62 }
 0x2d0   : > { %1200 = vst.msk [vmem:[#allocation2 + $0x5] sm:$0x1f] %vm1074_vm2, %v1199_v63 }
 0x2d1 PF: > { %vm1205_vm3 = vcmask 261120   ;;  %vm1209_vm4 = vcmask 254976   ;;  %v2902_v4 = vmov 32.0   ;;  %v2742_v21 = vld [vmem:[%s3078_s7 + $0x8] sm:$0xff]  ;;  %v2741_v23 = vld [vmem:[%s3078_s7] sm:$0xff]  ;;  %v2903_v27 = vmov 0   ;;  %s3718_s29 = scalar_lea.vmem %s3657_s10, %s3058_s6 }
 0x2d2   : > { %2808 = vrcp.f32 %v2902_v4  ;;  %1294 = vmatpush.bf16.msra.mxu0 %v2742_v21  ;;  %s2904_s0 = smov 88   ;;  %s2905_s9 = smov 96   ;;  %v2801_v48 = vld [vmem:[%s3718_s29] ss:$0 sm:$0xff]  ;;  %vm1322_vm12 = vcmask 64512   ;;  %vm1307_vm13 = vcmask 1042432  }
 0x2d3   : > { %1424 = vrot.lane.b32.xlu2 %v2903_v27, %s2904_s0  ;;  %s3716_s20 = sld [smem:[#allocation16_spill]]  ;;  %s2906_s27 = smov 56   ;;  %vm1308_vm14 = vsmask.f32 2304  ;;  %vm1346_vm1 = vcmask 1044480  }
 0x2d4   : > { %vm3232_vm15 = vmand %vm1307_vm13, %vm1308_vm14  ;;  %s2907_s8 = smov 120   ;;  %s2908_s7 = smov 80  }
 0x2d5   : > { %s2909_s4 = smov 112   ;;  %s2912_s30 = smov 104  }
 0x2d6   : > { %1295 = vmatpush.bf16.msra.mxu0 %v2741_v23  ;;  %s2913_s24 = smov 64   ;;  %s2914_s29 = smov 40  }
 0x2d7   : > { %v3193_v0 = vld [vmem:[#allocation2] sm:$0xff]  ;;  %v1202_v2 = vld [vmem:[#allocation2 + $0x8] sm:$0x3]  ;;  %p2714_p5 = scmp.ne.s32.totalorder %s3052_s2, 1 }
 0x2d8   : > { %v1206_v1 = vsel %vm1205_vm3, %v3193_v0, 0.0  ;;  %v1210_v3 = vsel %vm1209_vm4, %v1202_v2, 0.0  ;;  %v2809_v5 = vpop.eup %2808 }
 0x2d9   : > { %1207 = vadd.xlane.f32.xlu0 %v1206_v1  ;;  %v1214_v6 = vmul.f32 32.0, %v2809_v5  ;;  %vm1218_vm5 = vweird.f32 %v2809_v5  ;;  %s3717_s12 = scalar_lea.vmem %s3716_s20, %s3058_s6  ;;  %s2910_s20 = smov 72  }
 0x2da   : > { %v2800_v43 = vld [vmem:[%s3717_s12] ss:$0 sm:$0xff]  ;;  %s2911_s12 = smov 48  }
 0x2db   : > { %v1215_v7 = vsub.f32 1.0, %v1214_v6 }
 0x2dd   : > { %v1216_v8 = vmul.f32 %v2809_v5, %v1215_v7 }
 0x2df   : > { %v1217_v9 = vadd.f32 %v2809_v5, %v1216_v8 }
 0x2e1   : > { %1211 = vadd.xlane.f32.xlu0 %v1210_v3  ;;  %v3198_v10 = vsel %vm1218_vm5, %v2809_v5, %v1217_v9  ;;  %v1304_v9 = vlaneseq }
 0x32d   : > { %v1425_v53 = vpop.permute.xlu2 %1424 }
 0x32e   : > { %v3227_v54 = vsel %vm1322_vm12, %v1425_v53, 0 }
 0x32f   : > { %1435 = vmatpush.bf16.xpose.msra.mxu3 %v3227_v54 }
 0x337   : > { %1436 = vmatpush.bf16.xpose.msra.mxu3 %v3227_v54 }
 0x33f   : > { %1437 = vmatpush.bf16.xpose.msra.mxu3 %v3227_v54 }
 0x347   : > { %1438 = vmatpush.bf16.xpose.msra.mxu3 %v3227_v54 }
 0x34c   : > { %v1208_v11 = vpop.xlane.xlu0 %1207 }
 0x34d   : > { %v1220_v12 = vmul.f32 %v3198_v10, %v1208_v11  ;;  %v3297_v11 = vand.u32 127, %v1304_v9 }
 0x34f   : > { %v1222_v13 = vsub.f32 %v3193_v0, %v1220_v12  ;;  %1439 = vmatpush.bf16.xpose.msra.mxu3 %v3227_v54  ;;  %vm1306_vm0 = vcmp.lt.s32.totalorder %v3297_v11, 5 }
 0x351   : > { %v1224_v14 = vmul.f32 %v1222_v13, %v1222_v13 }
 0x353   : > { %v1226_v15 = vsel %vm1205_vm3, %v1224_v14, 0.0 }
 0x354   : > { %1227 = vadd.xlane.f32.xlu1 %v1226_v15  ;;  %v1212_v16 = vpop.xlane.xlu0 %1211 }
 0x355   : > { %v1221_v17 = vmul.f32 %v3198_v10, %v1212_v16 }
 0x357   : > { %v1223_v18 = vsub.f32 %v1202_v2, %v1221_v17  ;;  %1440 = vmatpush.bf16.xpose.msra.mxu3 %v3227_v54 }
 0x359   : > { %v1225_v19 = vmul.f32 %v1223_v18, %v1223_v18 }
 0x35b   : > { %v1229_v20 = vsel %vm1209_vm4, %v1225_v19, 0.0 }
 0x35c   : > { %1230 = vadd.xlane.f32.xlu1 %v1229_v20 }
 0x35f   : > { %1441 = vmatpush.bf16.xpose.msra.mxu3 %v3227_v54 }
 0x375   : > { %1320 = vrot.lane.b32.xlu1 %v2903_v27, %s2905_s9 }
 0x37d   : > { %1480 = vrot.lane.b32.xlu1 %v2903_v27, %s2906_s27 }
 0x3c7   : > { %v1228_v22 = vpop.xlane.xlu1 %1227 }
 0x3c8   : > { %v1232_v24 = vmul.f32 %v1228_v22, %v3198_v10 }
 0x3ca   : > { %v1234_v25 = vadd.f32 1e-05, %v1232_v24 }
 0x3cc   : > { %2810 = vrsqrt.f32 %v1234_v25  ;;  %vm1242_vm7 = vweird.f32 %v1234_v25 }
 0x3cf   : > { %v1231_v26 = vpop.xlane.xlu1 %1230 }
 0x3d0   : > { %v1233_v28 = vmul.f32 %v1231_v26, %v3198_v10 }
 0x3d2   : > { %v2811_v29 = vpop.eup %2810  ;;  %v1235_v30 = vadd.f32 1e-05, %v1233_v28 }
 0x3d3   : > { %v1237_v31 = vmul.f32 %v2811_v29, %v1234_v25  ;;  %vm1243_vm6 = vweird.f32 %v2811_v29 }
 0x3d4   : > { %2812 = vrsqrt.f32 %v1235_v30  ;;  %vm1244_vm8 = vmor %vm1242_vm7, %vm1243_vm6  ;;  %vm1252_vm10 = vweird.f32 %v1235_v30 }
 0x3d5   : > { %v1238_v32 = vmul.f32 %v2811_v29, %v1237_v31 }
 0x3d7   : > { %v1239_v33 = vmul.f32 0.5, %v1238_v32 }
 0x3d9   : > { %v1240_v34 = vsub.f32 1.5, %v1239_v33 }
 0x3da   : > { %v2813_v35 = vpop.eup %2812 }
 0x3db   : > { %v1241_v36 = vmul.f32 %v2811_v29, %v1240_v34  ;;  %v1247_v37 = vmul.f32 %v2813_v35, %v1235_v30  ;;  %vm1253_vm9 = vweird.f32 %v2813_v35 }
 0x3dc   : > { %vm1254_vm11 = vmor %vm1252_vm10, %vm1253_vm9 }
 0x3dd   : > { %v1248_v38 = vmul.f32 %v2813_v35, %v1247_v37  ;;  %v1245_v39 = vsel %vm1244_vm8, %v2811_v29, %v1241_v36  ;;  %vm1399_vm8 = vcmask 1043456  }
 0x3de   : > { %v1256_v42 = vmul.f32 %v1245_v39, %v1222_v13 }
 0x3df   : > { %v1249_v40 = vmul.f32 0.5, %v1248_v38 }
 0x3e0   : > { %v1261_v47 = vmul.f32 %v2800_v43, %v1256_v42 }
 0x3e1   : > { %v1250_v41 = vsub.f32 1.5, %v1249_v40 }
 0x3e2   : > { %v1266_v50 = vadd.f32 %v2801_v48, %v1261_v47 }
 0x3e3   : > { %v1251_v44 = vmul.f32 %v2813_v35, %v1250_v41 }
 0x3e5   : > { %v1255_v45 = vsel %vm1254_vm11, %v2813_v35, %v1251_v44 }
 0x3e6   : > { %v1257_v46 = vmul.f32 %v1255_v45, %v1223_v18 }
 0x3e7   : > { %v1321_v61 = vpop.permute.xlu1 %1320 }
 0x3e8   : > { %v1262_v49 = vmul.f32 %v2800_v43, %v1257_v46  ;;  %v3252_v62 = vsel %vm1322_vm12, %v1321_v61, 0 }
 0x3e9   : > { %1332 = vmatpush.bf16.xpose.msra.mxu1 %v3252_v62 }
 0x3ea   : > { %v1267_v51 = vadd.f32 %v2801_v48, %v1262_v49  ;;  %v2665_v48 = vld [vmem:[%s3116_s13 + $0x4] sm:$0x7] }
 0x3ec   : > { %v1268_v52 = vpack.c.bf16 %v1267_v51, %v1266_v50 }
 0x3ee   : > { %2661 = vmatmul.msk.bf16.vlgmr.msra.gmra.mxu0 %vm1205_vm3, %v1268_v52 }
 0x3ef   : > { %v3274_v63 = vpop.permute.xlu1 %1480 }
 0x3f0   : > { %1484 = vmatpush.bf16.msrb.mxu0 %v3274_v63 }
 0x3f1   : > { %1333 = vmatpush.bf16.xpose.msra.mxu1 %v3252_v62 }
 0x3f4   : > { %1485 = vmatpush.bf16.msrb.mxu0 %v3274_v63 }
 0x3f8   : > { %1486 = vmatpush.bf16.msrb.mxu0 %v3274_v63 }
 0x3f9   : > { %1334 = vmatpush.bf16.xpose.msra.mxu1 %v3252_v62 }
 0x3fc   : > { %1487 = vmatpush.bf16.msrb.mxu0 %v3274_v63 }
 0x400   : > { %1488 = vmatpush.bf16.msrb.mxu0 %v3274_v63 }
 0x401   : > { %1335 = vmatpush.bf16.xpose.msra.mxu1 %v3252_v62 }
 0x404   : > { %1489 = vmatpush.bf16.msrb.mxu0 %v3274_v63 }
 0x408   : > { %1490 = vmatpush.bf16.msrb.mxu0 %v3274_v63 }
 0x409   : > { %1336 = vmatpush.bf16.xpose.msra.mxu1 %v3252_v62 }
 0x411   : > { %1337 = vmatpush.bf16.xpose.msra.mxu1 %v3252_v62 }
 0x419   : > { %1338 = vmatpush.bf16.xpose.msra.mxu1 %v3252_v62 }
 0x46b   : > { %v1297_v55 = vpop.f32.mrf.mxu0 }
 0x46c   : > { %v1302_v57 = vpack.c.bf16 %v1297_v55, %v1297_v55 }
 0x46e   : > { %v3238_v58 = vsel %vm3232_vm15, %v1302_v57, 0  ;;  %v3240_v59 = vunpack.c.l.b16 %v1302_v57 }
 0x46f   : > { %1422 = vrot.lane.b32.xlu2 %v3238_v58, %s2904_s0 }
 0x470   : > { %v3247_v60 = vpack.c.b16 %v3240_v59, %v3240_v59 }
 0x472   : > { %1420 = vrot.lane.b32.xlu0 %v3247_v60, %s2907_s8 }
 0x473   : > { %v1299_v53 = vpop.f32.mrf.mxu0 }
 0x47a   : > { %1524 = vrot.lane.b32.xlu0 %v2903_v27, %s2908_s7 }
 0x482   : > { %1318 = vrot.lane.b32.xlu0 %v3238_v58, %s2905_s9 }
 0x48a   : > { %1478 = vrot.lane.b32.xlu0 %v3238_v58, %s2906_s27 }
 0x492   : > { %1520 = vrot.lane.b32.xlu0 %v3247_v60, %s2909_s4 }
 0x49a   : > { %1624 = vrot.lane.b32.xlu0 %v2903_v27, %s2910_s20 }
 0x4c9   : > { %v1423_v1 = vpop.permute.xlu2 %1422 }
 0x4ca   : > { %v1430_v2 = vsel %vm1322_vm12, %v1423_v1, 0 }
 0x4cb   : > { %1442 = vmatpush.bf16.xpose.msra.mxu3 %v1430_v2 }
 0x4e4   : > { %v1421_v3 = vpop.permute.xlu0 %1420 }
 0x4e5   : > { %2664 = vmatmul.msk.bf16.vlgmr.msra.gmra.mxu3 %vm1322_vm12, %v1421_v3 }
 0x4ec   : > { %v1525_v4 = vpop.permute.xlu0 %1524 }
 0x4ed   : > { %v3287_v7 = vsel %vm1322_vm12, %v1525_v4, 0 }
 0x4f4   : > { %v1319_v5 = vpop.permute.xlu0 %1318 }
 0x4f5   : > { %v1327_v6 = vsel %vm1322_vm12, %v1319_v5, 0 }
 0x4f6   : > { %1339 = vmatpush.bf16.xpose.msra.mxu1 %v1327_v6 }
 0x4fc   : > { %v1479_v8 = vpop.permute.xlu0 %1478 }
 0x4fd   : > { %2662 = vmatmul.msk.bf16.vlgmr.msra.gmra.mxu1 %vm1322_vm12, %v1302_v57  ;;  %1491 = vmatpush.bf16.msrb.mxu0 %v1479_v8 }
 0x501   : > { %1535 = vmatpush.bf16.xpose.msra.mxu0 %v3287_v7 }
 0x504   : > { %v3303_v17 = vpop.permute.xlu0 %1520 }
 0x509   : > { %1536 = vmatpush.bf16.xpose.msra.mxu0 %v3287_v7 }
 0x50c   : > { %v1625_v21 = vpop.permute.xlu0 %1624 }
 0x50d   : > { %v3314_v22 = vsel %vm1322_vm12, %v1625_v21, 0 }
 0x50e   : > { %1635 = vmatpush.bf16.xpose.msrb.mxu3 %v3314_v22 }
 0x511   : > { %1537 = vmatpush.bf16.xpose.msra.mxu0 %v3287_v7 }
 0x516   : > { %1636 = vmatpush.bf16.xpose.msrb.mxu3 %v3314_v22 }
 0x519   : > { %1538 = vmatpush.bf16.xpose.msra.mxu0 %v3287_v7 }
 0x51e   : > { %1637 = vmatpush.bf16.xpose.msrb.mxu3 %v3314_v22 }
 0x521   : > { %1539 = vmatpush.bf16.xpose.msra.mxu0 %v3287_v7 }
 0x526   : > { %1638 = vmatpush.bf16.xpose.msrb.mxu3 %v3314_v22 }
 0x529   : > { %1540 = vmatpush.bf16.xpose.msra.mxu0 %v3287_v7 }
 0x52e   : > { %1639 = vmatpush.bf16.xpose.msrb.mxu3 %v3314_v22 }
 0x531   : > { %1541 = vmatpush.bf16.xpose.msra.mxu0 %v3287_v7 }
 0x536   : > { %1640 = vmatpush.bf16.xpose.msrb.mxu3 %v3314_v22 }
 0x53e   : > { %1641 = vmatpush.bf16.xpose.msrb.mxu3 %v3314_v22 }
 0x568   : > { %v1444_v12 = vpop.f32.mrf.mxu3 }
 0x569   : > { %v1448_v13 = vsel %vm1306_vm0, %v1444_v12, -1e+30  ;;  %v1303_v12 = vpack.c.bf16 %v1299_v53, %v1299_v53 }
 0x56a   : > { %v1449_v14 = vsel %vm1346_vm1, %v1448_v13, -inf }
 0x56b   : > { %1450 = vmax.xlane.f32.xlu2 %v1449_v14 }
 0x570   : > { %v1446_v15 = vpop.f32.mrf.mxu3 }
 0x57a   : > { %v1341_v16 = vpop.f32.mrf.mxu1 }
 0x57b   : > { %v3307_v18 = vsel %vm1306_vm0, %v1341_v16, -1e+30 }
 0x57c   : > { %v1347_v19 = vsel %vm1346_vm1, %v3307_v18, -inf }
 0x57d   : > { %1348 = vmax.xlane.f32.xlu0 %v1347_v19 }
 0x582   : > { %v1343_v20 = vpop.f32.mrf.mxu1 }
 0x583   : > { %1522 = vrot.lane.b32.xlu2 %v3238_v58, %s2908_s7  ;;  %v2667_v20 = vld [vmem:[%s3083_s23 + $0x4] sm:$0xf] }
 0x58b   : > { %1622 = vrot.lane.b32.xlu2 %v3238_v58, %s2910_s20 }
 0x591   : > { %1578 = vrot.lane.b32.xlu0 %v3238_v58, %s2911_s12 }
 0x593   : > { %1620 = vrot.lane.b32.xlu2 %v3247_v60, %s2912_s30 }
 0x599   : > { %1680 = vrot.lane.b32.xlu0 %v2903_v27, %s2914_s29 }
 0x59b   : > { %1377 = vrot.lane.b32.xlu2 %v2903_v27, %s2913_s24 }
 0x5a3   : > { %1375 = vrot.lane.b32.xlu2 %v3238_v58, %s2913_s24 }
 0x5de   : > { %v1451_v23 = vpop.xlane.xlu2 %1450 }
 0x5df   : > { %v1452_v24 = vsub.f32 %v1448_v13, %v1451_v23  ;;  %v1723_v13 = vunpack.c.l.b16 %v1303_v12 }
 0x5e1   : > { %v1453_v25 = vmul.f32 1.442695, %v1452_v24  ;;  %v1724_v14 = vpack.c.b16 %v1723_v13, %v3240_v59  ;;  %v1504_v59 = vsel %vm1399_vm8, %v2667_v20, 0  ;;  %v2670_v13 = vld [vmem:[%s3116_s13 + $0x8] sm:$0x7] }
 0x5e3   : > { %2814 = vpow2.f32 %v1453_v25  ;;  %v1726_v15 = vshrl.u32 %v1724_v14, 16  ;;  %v1729_v16 = vshll.u32 %v1724_v14, 16 }
 0x5e6   : > { %v1523_v26 = vpop.permute.xlu2 %1522 }
 0x5e7   : > { %v1530_v28 = vsel %vm1322_vm12, %v1523_v26, 0 }
 0x5e8   : > { %1542 = vmatpush.bf16.xpose.msra.mxu0 %v1530_v28 }
 0x5e9   : > { %v2815_v29 = vpop.eup %2814 }
 0x5ea   : > { %v1455_v30 = vsel %vm1346_vm1, %v2815_v29, 0.0 }
 0x5eb   : > { %1456 = vadd.xlane.f32.xlu1 %v1455_v30 }
 0x5ee   : > { %v1623_v31 = vpop.permute.xlu2 %1622 }
 0x5ef   : > { %v1630_v32 = vsel %vm1322_vm12, %v1623_v31, 0 }
 0x5f0   : > { %1642 = vmatpush.bf16.xpose.msrb.mxu3 %v1630_v32  ;;  %v1349_v57 = vpop.xlane.xlu0 %1348 }
 0x5f1   : > { %v1350_v61 = vsub.f32 %v3307_v18, %v1349_v57  ;;  %v1731_v18 = vrot.slane %v1729_v16, 3  ;;  %v2672_v57 = vld [vmem:[%s3083_s23 + $0x8] sm:$0xf] }
 0x5f6   : > { %v1621_v33 = vpop.permute.xlu2 %1620 }
 0x5f7   : > { %2674 = vmatmul.msk.bf16.vlgmr.msrb.gmra.mxu3 %vm1322_vm12, %v1621_v33 }
 0x5f8   : > { %1891 = vmatpush.bf16.msra.mxu3 %v3274_v63 }
 0x5fc   : > { %1892 = vmatpush.bf16.msra.mxu3 %v3274_v63 }
 0x5fe   : > { %v1378_v34 = vpop.permute.xlu2 %1377 }
 0x5ff   : > { %1381 = vmatpush.bf16.msra.mxu2 %v1378_v34 }
 0x600   : > { %1893 = vmatpush.bf16.msra.mxu3 %v3274_v63 }
 0x603   : > { %1382 = vmatpush.bf16.msra.mxu2 %v1378_v34 }
 0x604   : > { %1894 = vmatpush.bf16.msra.mxu3 %v3274_v63 }
 0x606   : > { %v1376_v35 = vpop.permute.xlu2 %1375 }
 0x607   : > { %1383 = vmatpush.bf16.msra.mxu2 %v1378_v34 }
 0x608   : > { %1895 = vmatpush.bf16.msra.mxu3 %v3274_v63 }
 0x60b   : > { %1384 = vmatpush.bf16.msra.mxu2 %v1378_v34 }
 0x60c   : > { %1896 = vmatpush.bf16.msra.mxu3 %v3274_v63 }
 0x60f   : > { %1385 = vmatpush.bf16.msra.mxu2 %v1378_v34 }
 0x610   : > { %1897 = vmatpush.bf16.msra.mxu3 %v3274_v63  ;;  %v1351_v63 = vmul.f32 1.442695, %v1350_v61 }
 0x613   : > { %1386 = vmatpush.bf16.msra.mxu2 %v1378_v34 }
 0x617   : > { %1387 = vmatpush.bf16.msra.mxu2 %v1378_v34 }
 0x61b   : > { %1388 = vmatpush.bf16.msra.mxu2 %v1376_v35 }
 0x61f   : > { %1513 = vmatpush.bf16.msrb.mxu2 %v1504_v59 }
 0x65e   : > { %v1457_v36 = vpop.xlane.xlu1 %1456 }
 0x65f   : > { %2816 = vrcp.f32 %v1457_v36  ;;  %v1469_v40 = vand.u32 2147483648, %v1457_v36  ;;  %v1467_v42 = vand.u32 2147483647, %v1457_v36  ;;  %vm1463_vm5 = vweird.f32 %v1457_v36 }
 0x660   : > { %2818 = vpow2.f32 %v1351_v63 }
 0x661   : > { %v1470_v44 = vor.u32 1.1754944e-38, %v1469_v40  ;;  %vm1468_vm7 = vcmp.eq.f32.partialorder %v1467_v42, 8.507059e+37  ;;  %v1372_v40 = vld [vmem:[%s3116_s13] sm:$0x7] }
 0x665   : > { %v2817_v37 = vpop.eup %2816 }
 0x666   : > { %v1459_v38 = vmul.f32 %v2817_v37, %v1457_v36  ;;  %vm1464_vm2 = vweird.f32 %v2817_v37  ;;  %v2819_v4 = vpop.eup %2818 }
 0x667   : > { %vm1465_vm6 = vmor %vm1463_vm5, %vm1464_vm2  ;;  %v1353_v6 = vsel %vm1346_vm1, %v2819_v4, 0.0 }
 0x668   : > { %v1460_v39 = vsub.f32 1.0, %v1459_v38 }
 0x66a   : > { %v1461_v41 = vmul.f32 %v2817_v37, %v1460_v39 }
 0x66c   : > { %v1462_v43 = vadd.f32 %v2817_v37, %v1461_v41 }
 0x66e   : > { %v1466_v45 = vsel %vm1465_vm6, %v2817_v37, %v1462_v43 }
 0x66f   : > { %v1471_v46 = vsel %vm1468_vm7, %v1470_v44, %v1466_v45 }
 0x670   : > { %v1472_v47 = vmul.f32 %v2815_v29, %v1471_v46 }
 0x672   : > { %v1473_v49 = vpack.c.bf16 %v1472_v47, %v1472_v47 }
 0x674   : > { %v1476_v50 = vsel %vm3232_vm15, %v1473_v49, %v2665_v48  ;;  %1492 = vmatmul.bf16.vlgmr.msrb.gmra.mxu0 %v1473_v49 }
 0x675   : > { %2666 = vst [vmem:[%s3116_s13 + $0x4] sm:$0x7] %v1476_v50  ;;  %1796 = vmatpush.bf16.msrb.mxu0 %v1378_v34  ;;  %v2677_v50 = vld [vmem:[%s3083_s23 + $0xc] sm:$0xf] }
 0x679   : > { %1797 = vmatpush.bf16.msrb.mxu0 %v1378_v34 }
 0x67a   : > { %v1644_v51 = vpop.f32.mrf.mxu3 }
 0x67b   : > { %v3363_v8 = vsel %vm1306_vm0, %v1644_v51, -1e+30  ;;  %v1704_v51 = vsel %vm1399_vm8, %v2677_v50, 0  ;;  %v2802_v50 = vld [vmem:[%s3073_s5] ss:$0 sm:$0xff] }
 0x67c   : > { %v1649_v9 = vsel %vm1346_vm1, %v3363_v8, -inf }
 0x67d   : > { %1798 = vmatpush.bf16.msrb.mxu0 %v1378_v34 }
 0x681   : > { %1799 = vmatpush.bf16.msrb.mxu0 %v1378_v34 }
 0x682   : > { %v1646_v52 = vpop.f32.mrf.mxu3 }
 0x683   : > { %v1395_v52 = vld [vmem:[%s3083_s23] sm:$0xf] }
 0x684   : > { %2669 = vmatmul.msk.bf16.vlgmr.msra.gmra.mxu0 %vm1322_vm12, %v3303_v17  ;;  %v1728_v17 = vrot.slane %v1726_v15, 2 }
 0x685   : > { %1800 = vmatpush.bf16.msrb.mxu0 %v1378_v34 }
 0x686   : > { %v3368_v19 = vor.u32 %v1731_v18, %v1728_v17 }
 0x689   : > { %1801 = vmatpush.bf16.msrb.mxu0 %v1378_v34 }
 0x68d   : > { %1802 = vmatpush.bf16.msrb.mxu0 %v1378_v34 }
 0x6f1   : > { %v3350_v55 = vpop.f32.mrf.mxu0 }
 0x6f2   : > { %v1497_v44 = vpack.c.bf16 %v3350_v55, %v3350_v55  ;;  %v1401_v55 = vsel %vm1399_vm8, %v1395_v52, 0 }
 0x6f3   : > { %1410 = vmatpush.bf16.msrb.mxu1 %v1401_v55 }
 0x6f9   : > { %v1495_v60 = vpop.f32.mrf.mxu0 }
 0x6fa   : > { %v1604_v60 = vsel %vm1399_vm8, %v2672_v57, 0 }
 0x6fb   : > { %1613 = vmatpush.bf16.msra.mxu1 %v1604_v60 }
 0x701   : > { %v1544_v1 = vpop.f32.mrf.mxu0 }
 0x702   : > { %v1548_v2 = vsel %vm1306_vm0, %v1544_v1, -1e+30 }
 0x703   : > { %v1549_v3 = vsel %vm1346_vm1, %v1548_v2, -inf }
 0x704   : > { %1550 = vmax.xlane.f32.xlu1 %v1549_v3 }
 0x709   : > { %v1546_v5 = vpop.f32.mrf.mxu0 }
 0x70c   : > { %1354 = vadd.xlane.f32.xlu1 %v1353_v6 }
 0x725   : > { %1580 = vrot.lane.b32.xlu1 %v2903_v27, %s2911_s12  ;;  %v3373_v27 = vsel %vm3232_vm15, %v3368_v19, 0 }
 0x74f   : > { %1650 = vmax.xlane.f32.xlu1 %v1649_v9 }
 0x768   : > { %1742 = vrot.lane.b32.xlu1 %v3373_v27, %s2905_s9  ;;  %s3722_s9 = scalar_lea.vmem %s3662_s15, %s3058_s6 }
 0x770   : > { %1837 = vrot.lane.b32.xlu1 %v3373_v27, %s2904_s0  ;;  %s3726_s0 = sld [smem:[#allocation21_spill]] (!%p2714_p5) }
 0x777   : > { %v1551_v21 = vpop.xlane.xlu1 %1550 }
 0x778   : > { %v1552_v23 = vsub.f32 %v1548_v2, %v1551_v21  ;;  %1835 = vrot.lane.b32.xlu1 %v3368_v19, %s2907_s8  ;;  %s3727_s8 = sld [smem:[#allocation22_spill]] (!%p2714_p5) }
 0x77a   : > { %v1553_v24 = vmul.f32 1.442695, %v1552_v23 }
 0x77c   : > { %2820 = vpow2.f32 %v1553_v24 }
 0x77f   : > { %v1355_v25 = vpop.xlane.xlu1 %1354 }
 0x780   : > { %2822 = vrcp.f32 %v1355_v25  ;;  %v1367_v32 = vand.u32 2147483648, %v1355_v25  ;;  %v1365_v34 = vand.u32 2147483647, %v1355_v25  ;;  %vm1361_vm10 = vweird.f32 %v1355_v25 }
 0x782   : > { %v3383_v26 = vpop.eup %2820  ;;  %v1368_v36 = vor.u32 1.1754944e-38, %v1367_v32  ;;  %vm1366_vm13 = vcmp.eq.f32.partialorder %v1365_v34, 8.507059e+37 }
 0x783   : > { %v1555_v28 = vsel %vm1346_vm1, %v3383_v26, 0.0 }
 0x784   : > { %1556 = vadd.xlane.f32.xlu2 %v1555_v28 }
 0x786   : > { %v2823_v29 = vpop.eup %2822 }
 0x787   : > { %v1357_v30 = vmul.f32 %v2823_v29, %v1355_v25  ;;  %vm1362_vm9 = vweird.f32 %v2823_v29 }
 0x788   : > { %vm1363_vm11 = vmor %vm1361_vm10, %vm1362_vm9 }
 0x789   : > { %v1358_v31 = vsub.f32 1.0, %v1357_v30 }
 0x78b   : > { %v1359_v33 = vmul.f32 %v2823_v29, %v1358_v31 }
 0x78d   : > { %v1360_v35 = vadd.f32 %v2823_v29, %v1359_v33 }
 0x78f   : > { %v1364_v37 = vsel %vm1363_vm11, %v2823_v29, %v1360_v35 }
 0x790   : > { %v1369_v38 = vsel %vm1366_vm13, %v1368_v36, %v1364_v37  ;;  %vm1720_vm13 = vcmask 258048  }
 0x791   : > { %v1370_v39 = vmul.f32 %v2819_v4, %v1369_v38  ;;  %v2675_v38 = vld [vmem:[%s3116_s13 + $0xc] sm:$0x7] }
 0x793   : > { %v1371_v41 = vpack.c.bf16 %v1370_v39, %v1370_v39 }
 0x795   : > { %v1373_v42 = vsel %vm3232_vm15, %v1371_v41, %v1372_v40  ;;  %1389 = vmatmul.bf16.vlgmr.msra.gmra.mxu2 %v1371_v41  ;;  %v1810_v41 = vld [vmem:[%s3083_s23] sm:$0xf] }
 0x796   : > { %1374 = vst [vmem:[%s3116_s13] sm:$0x7] %v1373_v42 }
 0x797   : > { %v3391_v43 = vpop.permute.xlu1 %1580 }
 0x798   : > { %1584 = vmatpush.bf16.msra.mxu2 %v3391_v43 }
 0x79c   : > { %1678 = vrot.lane.b32.xlu2 %v3238_v58, %s2914_s29  ;;  %1585 = vmatpush.bf16.msra.mxu2 %v3391_v43  ;;  %v1579_v58 = vpop.permute.xlu0 %1578 }
 0x7a0   : > { %1586 = vmatpush.bf16.msra.mxu2 %v3391_v43 }
 0x7a4   : > { %1587 = vmatpush.bf16.msra.mxu2 %v3391_v43  ;;  %v3423_v18 = vpop.permute.xlu0 %1680 }
 0x7a5   : > { %2668 = vmatmul.msk.bf16.vlgmr.msrb.gmra.mxu2 %vm1322_vm12, %v1497_v44 }
 0x7a8   : > { %1588 = vmatpush.bf16.msra.mxu2 %v3391_v43 }
 0x7ac   : > { %1589 = vmatpush.bf16.msra.mxu2 %v3391_v43 }
 0x7b0   : > { %1590 = vmatpush.bf16.msra.mxu2 %v3391_v43 }
 0x7b4   : > { %1591 = vmatpush.bf16.msra.mxu2 %v1579_v58  ;;  %v1815_v58 = vsel %vm1399_vm8, %v1810_v41, 0 }
 0x7b8   : > { %1713 = vmatpush.bf16.msrb.mxu2 %v1704_v51  ;;  %v1315_v51 = vadd.f32 %v2802_v50, %v3193_v0 }
 0x7c2   : > { %v1651_v45 = vpop.xlane.xlu1 %1650 }
 0x7c3   : > { %v1652_v46 = vsub.f32 %v3363_v8, %v1651_v45 }
 0x7c5   : > { %v1653_v47 = vmul.f32 1.442695, %v1652_v46 }
 0x7c7   : > { %2824 = vpow2.f32 %v1653_v47 }
 0x7cd   : > { %v3406_v48 = vpop.eup %2824 }
 0x7ce   : > { %v1655_v49 = vsel %vm1346_vm1, %v3406_v48, 0.0 }
 0x7cf   : > { %1656 = vadd.xlane.f32.xlu0 %v1655_v49 }
 0x7da   : > { %v1743_v24 = vpop.permute.xlu1 %1742 }
 0x7f7   : > { %v1557_v53 = vpop.xlane.xlu2 %1556 }
 0x7f8   : > { %2826 = vrcp.f32 %v1557_v53  ;;  %v1569_v2 = vand.u32 2147483648, %v1557_v53  ;;  %v1567_v4 = vand.u32 2147483647, %v1557_v53  ;;  %vm1563_vm2 = vweird.f32 %v1557_v53 }
 0x7fa   : > { %v1570_v6 = vor.u32 1.1754944e-38, %v1569_v2  ;;  %vm1568_vm6 = vcmp.eq.f32.partialorder %v1567_v4, 8.507059e+37 }
 0x7fe   : > { %v2827_v61 = vpop.eup %2826 }
 0x7ff   : > { %v1559_v63 = vmul.f32 %v2827_v61, %v1557_v53  ;;  %vm1564_vm14 = vweird.f32 %v2827_v61  ;;  %v1679_v23 = vpop.permute.xlu2 %1678 }
 0x800   : > { %vm1565_vm5 = vmor %vm1563_vm2, %vm1564_vm14 }
 0x801   : > { %v1560_v1 = vsub.f32 1.0, %v1559_v63 }
 0x803   : > { %v1561_v3 = vmul.f32 %v2827_v61, %v1560_v1 }
 0x805   : > { %v1562_v5 = vadd.f32 %v2827_v61, %v1561_v3 }
 0x807   : > { %v1566_v8 = vsel %vm1565_vm5, %v2827_v61, %v1562_v5 }
 0x808   : > { %v1571_v9 = vsel %vm1568_vm6, %v1570_v6, %v1566_v8 }
 0x809   : > { %v1572_v12 = vmul.f32 %v3383_v26, %v1571_v9  ;;  %v1748_v26 = vsel %vm1322_vm12, %v1743_v24, 0 }
 0x80b   : > { %v1573_v14 = vpack.c.bf16 %v1572_v12, %v1572_v12 }
 0x80d   : > { %v1576_v15 = vsel %vm3232_vm15, %v1573_v14, %v2670_v13  ;;  %1592 = vmatmul.bf16.vlgmr.msra.gmra.mxu2 %v1573_v14 }
 0x80e   : > { %2671 = vst [vmem:[%s3116_s13 + $0x8] sm:$0x7] %v1576_v15  ;;  %1750 = vmatpush.bf16.xpose.msra.mxu2 %v3252_v62 }
 0x816   : > { %1751 = vmatpush.bf16.xpose.msra.mxu2 %v3252_v62 }
 0x818   : > { %v1390_v16 = vpop.f32.mrf.mxu2 }
 0x819   : > { %v1394_v17 = vpack.c.bf16 %v1390_v16, %v1390_v16 }
 0x81b   : > { %2663 = vmatmul.msk.bf16.vlgmr.msrb.gmra.mxu1 %vm1322_vm12, %v1394_v17 }
 0x81c   : > { %1684 = vmatpush.bf16.msrb.mxu1 %v3423_v18 }
 0x81e   : > { %1752 = vmatpush.bf16.xpose.msra.mxu2 %v3252_v62 }
 0x820   : > { %1685 = vmatpush.bf16.msrb.mxu1 %v3423_v18  ;;  %v1392_v20 = vpop.f32.mrf.mxu2 }
 0x824   : > { %1686 = vmatpush.bf16.msrb.mxu1 %v3423_v18 }
 0x826   : > { %1753 = vmatpush.bf16.xpose.msra.mxu2 %v3252_v62 }
 0x828   : > { %1687 = vmatpush.bf16.msrb.mxu1 %v3423_v18  ;;  %v1515_v59 = vpop.f32.mrf.mxu2 }
 0x82c   : > { %1688 = vmatpush.bf16.msrb.mxu1 %v3423_v18 }
 0x82e   : > { %1754 = vmatpush.bf16.xpose.msra.mxu2 %v3252_v62 }
 0x830   : > { %1689 = vmatpush.bf16.msrb.mxu1 %v3423_v18  ;;  %v1517_v21 = vpop.f32.mrf.mxu2 }
 0x834   : > { %1690 = vmatpush.bf16.msrb.mxu1 %v3423_v18 }
 0x836   : > { %1755 = vmatpush.bf16.xpose.msra.mxu2 %v3252_v62 }
 0x838   : > { %1691 = vmatpush.bf16.msrb.mxu1 %v1679_v23 }
 0x83e   : > { %1756 = vmatpush.bf16.xpose.msra.mxu2 %v3252_v62 }
 0x842   : > { %v1657_v25 = vpop.xlane.xlu0 %1656 }
 0x843   : > { %2828 = vrcp.f32 %v1657_v25  ;;  %v1669_v31 = vand.u32 2147483648, %v1657_v25  ;;  %v1667_v33 = vand.u32 2147483647, %v1657_v25  ;;  %vm1663_vm9 = vweird.f32 %v1657_v25 }
 0x845   : > { %v1670_v62 = vor.u32 1.1754944e-38, %v1669_v31  ;;  %vm1668_vm11 = vcmp.eq.f32.partialorder %v1667_v33, 8.507059e+37  ;;  %v2686_v31 = vld [vmem:[%s3083_s23 + $0x4] sm:$0xf] }
 0x846   : > { %1757 = vmatpush.bf16.xpose.msra.mxu2 %v1748_v26 }
 0x849   : > { %v2829_v28 = vpop.eup %2828 }
 0x84a   : > { %v1659_v29 = vmul.f32 %v2829_v28, %v1657_v25  ;;  %vm1664_vm7 = vweird.f32 %v2829_v28 }
 0x84b   : > { %vm1665_vm10 = vmor %vm1663_vm9, %vm1664_vm7 }
 0x84c   : > { %v1660_v30 = vsub.f32 1.0, %v1659_v29 }
 0x84e   : > { %v1661_v32 = vmul.f32 %v2829_v28, %v1660_v30 }
 0x850   : > { %v1662_v34 = vadd.f32 %v2829_v28, %v1661_v32 }
 0x852   : > { %v1666_v35 = vsel %vm1665_vm10, %v2829_v28, %v1662_v34 }
 0x853   : > { %v1671_v36 = vsel %vm1668_vm11, %v1670_v62, %v1666_v35  ;;  %v1910_v62 = vsel %vm1399_vm8, %v2686_v31, 0 }
 0x854   : > { %v1672_v37 = vmul.f32 %v3406_v48, %v1671_v36  ;;  %v1838_v48 = vpop.permute.xlu1 %1837  ;;  %v2680_v36 = vld [vmem:[%s3116_s13 + $0x10] sm:$0x7] }
 0x855   : > { %v1843_v49 = vsel %vm1322_vm12, %v1838_v48, 0 }
 0x856   : > { %v1673_v39 = vpack.c.bf16 %v1672_v37, %v1672_v37 }
 0x858   : > { %v1676_v40 = vsel %vm3232_vm15, %v1673_v39, %v2675_v38 }
 0x859   : > { %2676 = vst [vmem:[%s3116_s13 + $0xc] sm:$0x7] %v1676_v40 }
 0x890   : > { %v1593_v42 = vpop.f32.mrf.mxu2 }
 0x891   : > { %v1597_v44 = vpack.c.bf16 %v1593_v42, %v1593_v42 }
 0x893   : > { %2673 = vmatmul.msk.bf16.vlgmr.msra.gmra.mxu1 %vm1322_vm12, %v1597_v44  ;;  %v1836_v44 = vpop.permute.xlu1 %1835 }
 0x894   : > { %1824 = vmatpush.bf16.msra.mxu1 %v1815_v58 }
 0x898   : > { %v1412_v45 = vpop.f32.mrf.mxu1  ;;  %v1595_v46 = vpop.f32.mrf.mxu2 }
 0x899   : > { %v1416_v52 = vadd.f32 %v1412_v45, %v1315_v51 }
 0x89b   : > { %v1519_v53 = vadd.f32 %v1515_v59, %v1416_v52 }
 0x8a0   : > { %v1414_v47 = vpop.f32.mrf.mxu1 }
 0x8a3   : > { %1692 = vmatmul.bf16.vlgmr.msrb.gmra.mxu1 %v1673_v39 }
 0x8a4   : > { %1845 = vmatpush.bf16.xpose.msrb.mxu1 %v3227_v54 }
 0x8ac   : > { %1846 = vmatpush.bf16.xpose.msrb.mxu1 %v3227_v54 }
 0x8b4   : > { %1847 = vmatpush.bf16.xpose.msrb.mxu1 %v3227_v54 }
 0x8bc   : > { %1848 = vmatpush.bf16.xpose.msrb.mxu1 %v3227_v54 }
 0x8c4   : > { %1849 = vmatpush.bf16.xpose.msrb.mxu1 %v3227_v54 }
 0x8cc   : > { %1850 = vmatpush.bf16.xpose.msrb.mxu1 %v3227_v54 }
 0x8d4   : > { %1851 = vmatpush.bf16.xpose.msrb.mxu1 %v3227_v54 }
 0x8dc   : > { %1852 = vmatpush.bf16.xpose.msrb.mxu1 %v1843_v49 }
 0x910   : > { %v1615_v55 = vpop.f32.mrf.mxu1 }
 0x911   : > { %v1619_v57 = vadd.f32 %v1615_v55, %v1519_v53  ;;  %v2691_v55 = vld [vmem:[%s3083_s23 + $0x8] sm:$0xf] }
 0x918   : > { %v1617_v60 = vpop.f32.mrf.mxu1 }
 0x920   : > { %v1693_v61 = vpop.f32.mrf.mxu1 }
 0x921   : > { %v1697_v63 = vpack.c.bf16 %v1693_v61, %v1693_v61 }
 0x923   : > { %2678 = vmatmul.msk.bf16.vlgmr.msrb.gmra.mxu2 %vm1322_vm12, %v1697_v63 }
 0x924   : > { %1986 = vmatpush.bf16.msrb.mxu2 %v3391_v43 }
 0x928   : > { %1987 = vmatpush.bf16.msrb.mxu2 %v3391_v43  ;;  %v1695_v54 = vpop.f32.mrf.mxu1 }
 0x92c   : > { %1988 = vmatpush.bf16.msrb.mxu2 %v3391_v43 }
 0x930   : > { %1989 = vmatpush.bf16.msrb.mxu2 %v3391_v43 }
 0x933   : > { %2679 = vmatmul.msk.bf16.vlgmr.msra.gmra.mxu2 %vm1322_vm12, %v3368_v19 }
 0x934   : > { %1990 = vmatpush.bf16.msrb.mxu2 %v3391_v43 }
 0x938   : > { %1991 = vmatpush.bf16.msrb.mxu2 %v3391_v43 }
 0x93c   : > { %1992 = vmatpush.bf16.msrb.mxu2 %v3391_v43 }
 0x9a6   : > { %v1715_v1 = vpop.f32.mrf.mxu2 }
 0x9a7   : > { %v1719_v2 = vadd.f32 %v1715_v1, %v1619_v57 }
 0x9a9   : > { %1721 = vst.msk [vmem:[#allocation2] sm:$0x1f] %vm1720_vm13, %v1719_v2 }
 0x9ae   : > { %v1717_v3 = vpop.f32.mrf.mxu2 }
 0x9b6   : > { %v1759_v4 = vpop.f32.mrf.mxu2 }
 0x9b7   : > { %v1763_v5 = vsel %vm1306_vm0, %v1759_v4, -1e+30 }
 0x9b8   : > { %v1764_v6 = vsel %vm1346_vm1, %v1763_v5, -inf }
 0x9b9   : > { %1765 = vmax.xlane.f32.xlu2 %v1764_v6 }
 0x9be   : > { %v1761_v8 = vpop.f32.mrf.mxu2 }
 0x9d1   : > { %1888 = vrot.lane.b32.xlu2 %v3373_v27, %s2906_s27 }
 0x9d9   : > { %1932 = vrot.lane.b32.xlu2 %v3373_v27, %s2908_s7  ;;  %s3723_s7 = scalar_lea.vmem %s3664_s17, %s3058_s6 }
 0x9e1   : > { %1930 = vrot.lane.b32.xlu2 %v3368_v19, %s2909_s4 }
 0x9e9   : > { %1983 = vrot.lane.b32.xlu2 %v3373_v27, %s2911_s12 }
 0xa2c   : > { %v1766_v43 = vpop.xlane.xlu2 %1765 }
 0xa2d   : > { %v1767_v9 = vsub.f32 %v1763_v5, %v1766_v43  ;;  %v2684_v43 = vld [vmem:[%s3116_s13 + $0x14] sm:$0x7] }
 0xa2f   : > { %v1768_v12 = vmul.f32 1.442695, %v1767_v9 }
 0xa31   : > { %2830 = vpow2.f32 %v1768_v12 }
 0xa34   : > { %v1889_v13 = vpop.permute.xlu2 %1888 }
 0xa35   : > { %1898 = vmatpush.bf16.msra.mxu3 %v1889_v13 }
 0xa37   : > { %v2831_v14 = vpop.eup %2830 }
 0xa38   : > { %v1770_v15 = vsel %vm1346_vm1, %v2831_v14, 0.0 }
 0xa39   : > { %1771 = vadd.xlane.f32.xlu0 %v1770_v15 }
 0xa3c   : > { %v1933_v16 = vpop.permute.xlu2 %1932 }
 0xa3d   : > { %v1938_v39 = vsel %vm1322_vm12, %v1933_v16, 0  ;;  %v2803_v16 = vld [vmem:[%s3073_s5] ss:$0 sm:$0xff]  ;;  %s3721_s5 = scalar_lea.vmem %s3661_s14, %s3058_s6 }
 0xa44   : > { %v3479_v17 = vpop.permute.xlu2 %1930 }
 0xa4c   : > { %v1984_v20 = vpop.permute.xlu2 %1983 }
 0xa4d   : > { %1793 = vrot.lane.b32.xlu0 %v3373_v27, %s2913_s24  ;;  %1993 = vmatpush.bf16.msrb.mxu2 %v1984_v20  ;;  %v1739_v20 = vadd.f32 %v2803_v16, %v3193_v0 }
 0xaac   : > { %v1772_v59 = vpop.xlane.xlu0 %1771 }
 0xaad   : > { %2832 = vrcp.f32 %v1772_v59  ;;  %v1784_v25 = vand.u32 2147483648, %v1772_v59  ;;  %v1782_v28 = vand.u32 2147483647, %v1772_v59  ;;  %vm1778_vm2 = vweird.f32 %v1772_v59 }
 0xaaf   : > { %v1785_v30 = vor.u32 1.1754944e-38, %v1784_v25  ;;  %vm1783_vm6 = vcmp.eq.f32.partialorder %v1782_v28, 8.507059e+37 }
 0xab3   : > { %v2833_v21 = vpop.eup %2832 }
 0xab4   : > { %v1774_v23 = vmul.f32 %v2833_v21, %v1772_v59  ;;  %vm1779_vm14 = vweird.f32 %v2833_v21  ;;  %v2854_v59 = vld [vmem:[#allocation2 + $0x8] sm:$0x3] }
 0xab5   : > { %vm1780_vm5 = vmor %vm1778_vm2, %vm1779_vm14 }
 0xab6   : > { %v1775_v24 = vsub.f32 1.0, %v1774_v23 }
 0xab8   : > { %v1776_v26 = vmul.f32 %v2833_v21, %v1775_v24 }
 0xaba   : > { %v1777_v29 = vadd.f32 %v2833_v21, %v1776_v26 }
 0xabc   : > { %v1781_v32 = vsel %vm1780_vm5, %v2833_v21, %v1777_v29  ;;  %v1740_v21 = vadd.f32 %v2854_v59, %v2803_v16 }
 0xabd   : > { %v1786_v33 = vsel %vm1783_vm6, %v1785_v30, %v1781_v32 }
 0xabe   : > { %v1787_v34 = vmul.f32 %v2831_v14, %v1786_v33 }
 0xabf   : > { %v1794_v35 = vpop.permute.xlu0 %1793 }
 0xac0   : > { %1803 = vmatpush.bf16.msrb.mxu0 %v1794_v35  ;;  %v1788_v37 = vpack.c.bf16 %v1787_v34, %v1787_v34 }
 0xac2   : > { %v1791_v38 = vsel %vm3232_vm15, %v1788_v37, %v2680_v36 }
 0xac3   : > { %2681 = vst [vmem:[%s3116_s13 + $0x10] sm:$0x7] %v1791_v38  ;;  %1804 = vmatmul.bf16.vlgmr.msrb.gmra.mxu0 %v1788_v37 }
 0xac4   : > { %1919 = vmatpush.bf16.msra.mxu0 %v1910_v62 }
 0xac8   : > { %1940 = vmatpush.bf16.xpose.msrb.mxu0 %v3287_v7 }
 0xad0   : > { %1941 = vmatpush.bf16.xpose.msrb.mxu0 %v3287_v7 }
 0xad8   : > { %1942 = vmatpush.bf16.xpose.msrb.mxu0 %v3287_v7 }
 0xae0   : > { %1943 = vmatpush.bf16.xpose.msrb.mxu0 %v3287_v7 }
 0xae8   : > { %1944 = vmatpush.bf16.xpose.msrb.mxu0 %v3287_v7 }
 0xaf0   : > { %1945 = vmatpush.bf16.xpose.msrb.mxu0 %v3287_v7 }
 0xaf8   : > { %1946 = vmatpush.bf16.xpose.msrb.mxu0 %v3287_v7 }
 0xb00   : > { %1947 = vmatpush.bf16.xpose.msrb.mxu0 %v1938_v39 }
 0xb40   : > { %v1805_v40 = vpop.f32.mrf.mxu0 }
 0xb41   : > { %v1809_v41 = vpack.c.bf16 %v1805_v40, %v1805_v40 }
 0xb43   : > { %2682 = vmatmul.msk.bf16.vlgmr.msra.gmra.mxu1 %vm1322_vm12, %v1809_v41 }
 0xb44   : > { %2081 = vmatpush.bf16.msra.mxu1 %v3423_v18 }
 0xb48   : > { %2082 = vmatpush.bf16.msra.mxu1 %v3423_v18  ;;  %v1807_v42 = vpop.f32.mrf.mxu0 }
 0xb4c   : > { %2083 = vmatpush.bf16.msra.mxu1 %v3423_v18 }
 0xb50   : > { %2084 = vmatpush.bf16.msra.mxu1 %v3423_v18 }
 0xb53   : > { %2683 = vmatmul.msk.bf16.vlgmr.msrb.gmra.mxu1 %vm1322_vm12, %v1836_v44 }
 0xb54   : > { %2085 = vmatpush.bf16.msra.mxu1 %v3423_v18 }
 0xb58   : > { %2086 = vmatpush.bf16.msra.mxu1 %v3423_v18 }
 0xb5c   : > { %2087 = vmatpush.bf16.msra.mxu1 %v3423_v18  ;;  %v2005_v18 = vsel %vm1399_vm8, %v2691_v55, 0 }
 0xb5d   : > { %2014 = vmatpush.bf16.msrb.mxu3 %v2005_v18 }
 0xbc0   : > { %v1826_v7 = vpop.f32.mrf.mxu1 }
 0xbc1   : > { %v1831_v23 = vrot.slane %v1826_v7, 3 }
 0xbc3   : > { %v1833_v25 = vadd.f32 %v1831_v23, %v1739_v20  ;;  %v1834_v26 = vadd.f32 %v1831_v23, %v1740_v21 }
 0xbc8   : > { %v1828_v58 = vpop.f32.mrf.mxu1 }
 0xbd0   : > { %v1854_v45 = vpop.f32.mrf.mxu1 }
 0xbd1   : > { %v1858_v46 = vsel %vm1306_vm0, %v1854_v45, -1e+30 }
 0xbd2   : > { %v1859_v47 = vsel %vm1346_vm1, %v1858_v46, -inf }
 0xbd3   : > { %1860 = vmax.xlane.f32.xlu1 %v1859_v47 }
 0xbd8   : > { %v1856_v48 = vpop.f32.mrf.mxu1 }
 0xc46   : > { %v1861_v49 = vpop.xlane.xlu1 %1860 }
 0xc47   : > { %v1862_v50 = vsub.f32 %v1858_v46, %v1861_v49  ;;  %v2689_v49 = vld [vmem:[%s3116_s13 + $0x18] sm:$0x7] }
 0xc49   : > { %v1863_v51 = vmul.f32 1.442695, %v1862_v50 }
 0xc4b   : > { %2834 = vpow2.f32 %v1863_v51 }
 0xc51   : > { %v2835_v52 = vpop.eup %2834 }
 0xc52   : > { %v1865_v53 = vsel %vm1346_vm1, %v2835_v52, 0.0 }
 0xc53   : > { %1866 = vadd.xlane.f32.xlu0 %v1865_v53 }
 0xcc6   : > { %v1867_v57 = vpop.xlane.xlu0 %1866 }
 0xcc7   : > { %2836 = vrcp.f32 %v1867_v57  ;;  %v1879_v54 = vand.u32 2147483648, %v1867_v57  ;;  %v1877_v2 = vand.u32 2147483647, %v1867_v57  ;;  %vm1873_vm9 = vweird.f32 %v1867_v57 }
 0xcc9   : > { %v1880_v4 = vor.u32 1.1754944e-38, %v1879_v54  ;;  %vm1878_vm11 = vcmp.eq.f32.partialorder %v1877_v2, 8.507059e+37 }
 0xccd   : > { %v2837_v60 = vpop.eup %2836 }
 0xcce   : > { %v1869_v61 = vmul.f32 %v2837_v60, %v1867_v57  ;;  %vm1874_vm7 = vweird.f32 %v2837_v60 }
 0xccf   : > { %vm1875_vm10 = vmor %vm1873_vm9, %vm1874_vm7 }
 0xcd0   : > { %v1870_v63 = vsub.f32 1.0, %v1869_v61 }
 0xcd2   : > { %v1871_v1 = vmul.f32 %v2837_v60, %v1870_v63 }
 0xcd4   : > { %v1872_v3 = vadd.f32 %v2837_v60, %v1871_v1 }
 0xcd6   : > { %v1876_v5 = vsel %vm1875_vm10, %v2837_v60, %v1872_v3 }
 0xcd7   : > { %v1881_v6 = vsel %vm1878_vm11, %v1880_v4, %v1876_v5 }
 0xcd8   : > { %v1882_v8 = vmul.f32 %v2835_v52, %v1881_v6 }
 0xcda   : > { %v1883_v9 = vpack.c.bf16 %v1882_v8, %v1882_v8 }
 0xcdc   : > { %v1886_v12 = vsel %vm3232_vm15, %v1883_v9, %v2684_v43  ;;  %1899 = vmatmul.bf16.vlgmr.msra.gmra.mxu3 %v1883_v9 }
 0xcdd   : > { %2685 = vst [vmem:[%s3116_s13 + $0x14] sm:$0x7] %v1886_v12  ;;  %2035 = vmatpush.bf16.xpose.msra.mxu3 %v3314_v22  ;;  %v2696_v12 = vld [vmem:[%s3083_s23 + $0xc] sm:$0xf]  ;;  %s3725_s23 = sld [smem:[#allocation20_spill]] (!%p2714_p5) }
 0xce5   : > { %2036 = vmatpush.bf16.xpose.msra.mxu3 %v3314_v22 }
 0xced   : > { %2037 = vmatpush.bf16.xpose.msra.mxu3 %v3314_v22 }
 0xcf5   : > { %2038 = vmatpush.bf16.xpose.msra.mxu3 %v3314_v22 }
 0xcfd   : > { %2039 = vmatpush.bf16.xpose.msra.mxu3 %v3314_v22 }
 0xd05   : > { %2040 = vmatpush.bf16.xpose.msra.mxu3 %v3314_v22 }
 0xd0d   : > { %2041 = vmatpush.bf16.xpose.msra.mxu3 %v3314_v22 }
 0xd5f   : > { %v1900_v13 = vpop.f32.mrf.mxu3 }
 0xd60   : > { %v1904_v14 = vpack.c.bf16 %v1900_v13, %v1900_v13  ;;  %v2100_v13 = vsel %vm1399_vm8, %v2696_v12, 0  ;;  %vm2120_vm8 = vcmask 261125   ;;  %v2805_v12 = vld [vmem:[%s3722_s9] ss:$0 sm:$0xff] }
 0xd61   : > { %2109 = vmatpush.bf16.msra.mxu2 %v2100_v13 }
 0xd62   : > { %2687 = vmatmul.msk.bf16.vlgmr.msra.gmra.mxu0 %vm1322_vm12, %v1904_v14 }
 0xd67   : > { %v1902_v15 = vpop.f32.mrf.mxu3 }
 0xd72   : > { %2688 = vmatmul.msk.bf16.vlgmr.msrb.gmra.mxu0 %vm1322_vm12, %v3479_v17 }
 0xddf   : > { %v1921_v24 = vpop.f32.mrf.mxu0 }
 0xde0   : > { %v1926_v28 = vrot.slane %v1921_v24, 3 }
 0xde2   : > { %v1928_v29 = vadd.f32 %v1926_v28, %v1833_v25  ;;  %v1929_v22 = vadd.f32 %v1926_v28, %v1834_v26 }
 0xde7   : > { %v1923_v30 = vpop.f32.mrf.mxu0 }
 0xdef   : > { %v1949_v31 = vpop.f32.mrf.mxu0 }
 0xdf0   : > { %v1953_v32 = vsel %vm1306_vm0, %v1949_v31, -1e+30 }
 0xdf1   : > { %v1954_v33 = vsel %vm1346_vm1, %v1953_v32, -inf }
 0xdf2   : > { %1955 = vmax.xlane.f32.xlu1 %v1954_v33 }
 0xdf7   : > { %v1951_v17 = vpop.f32.mrf.mxu0 }
 0xe0b   : > { %2027 = vrot.lane.b32.xlu1 %v3373_v27, %s2910_s20  ;;  %s3724_s20 = scalar_lea.vmem %s3666_s19, %s3058_s6 }
 0xe13   : > { %2078 = vrot.lane.b32.xlu1 %v3373_v27, %s2914_s29 }
 0xe65   : > { %v1956_v0 = vpop.xlane.xlu1 %1955 }
 0xe66   : > { %v1957_v34 = vsub.f32 %v1953_v32, %v1956_v0 }
 0xe68   : > { %v1958_v62 = vmul.f32 1.442695, %v1957_v34 }
 0xe6a   : > { %2838 = vpow2.f32 %v1958_v62 }
 0xe70   : > { %v2839_v35 = vpop.eup %2838 }
 0xe71   : > { %v1960_v36 = vsel %vm1346_vm1, %v2839_v35, 0.0 }
 0xe72   : > { %1961 = vadd.xlane.f32.xlu0 %v1960_v36 }
 0xe7d   : > { %v2028_v37 = vpop.permute.xlu1 %2027 }
 0xe7e   : > { %v2033_v38 = vsel %vm1322_vm12, %v2028_v37, 0 }
 0xe7f   : > { %2042 = vmatpush.bf16.xpose.msra.mxu3 %v2033_v38 }
 0xe85   : > { %v2079_v39 = vpop.permute.xlu1 %2078 }
 0xe86   : > { %2025 = vrot.lane.b32.xlu0 %v3368_v19, %s2912_s30  ;;  %2088 = vmatpush.bf16.msra.mxu1 %v2079_v39 }
 0xee5   : > { %v1962_v40 = vpop.xlane.xlu0 %1961 }
 0xee6   : > { %2840 = vrcp.f32 %v1962_v40  ;;  %v1974_v44 = vand.u32 2147483648, %v1962_v40  ;;  %v1972_v58 = vand.u32 2147483647, %v1962_v40  ;;  %vm1968_vm14 = vweird.f32 %v1962_v40 }
 0xee8   : > { %v1975_v46 = vor.u32 1.1754944e-38, %v1974_v44  ;;  %vm1973_vm5 = vcmp.eq.f32.partialorder %v1972_v58, 8.507059e+37 }
 0xeec   : > { %v2841_v27 = vpop.eup %2840 }
 0xeed   : > { %v1964_v41 = vmul.f32 %v2841_v27, %v1962_v40  ;;  %vm1969_vm13 = vweird.f32 %v2841_v27 }
 0xeee   : > { %vm1970_vm2 = vmor %vm1968_vm14, %vm1969_vm13 }
 0xeef   : > { %v1965_v42 = vsub.f32 1.0, %v1964_v41 }
 0xef1   : > { %v1966_v7 = vmul.f32 %v2841_v27, %v1965_v42 }
 0xef3   : > { %v1967_v45 = vadd.f32 %v2841_v27, %v1966_v7 }
 0xef5   : > { %v1971_v47 = vsel %vm1970_vm2, %v2841_v27, %v1967_v45 }
 0xef6   : > { %v1976_v48 = vsel %vm1973_vm5, %v1975_v46, %v1971_v47  ;;  %v2744_v47 = vld [vmem:[%s3096_s21 + $0x8] sm:$0xff] }
 0xef7   : > { %v1977_v19 = vmul.f32 %v2839_v35, %v1976_v48 }
 0xef8   : > { %v2026_v18 = vpop.permute.xlu0 %2025 }
 0xef9   : > { %v1978_v50 = vpack.c.bf16 %v1977_v19, %v1977_v19 }
 0xefb   : > { %v1981_v51 = vsel %vm3232_vm15, %v1978_v50, %v2689_v49  ;;  %1994 = vmatmul.bf16.vlgmr.msrb.gmra.mxu2 %v1978_v50  ;;  %v2743_v50 = vld [vmem:[%s3096_s21] sm:$0xff] }
 0xefc   : > { %2690 = vst [vmem:[%s3116_s13 + $0x18] sm:$0x7] %v1981_v51  ;;  %2211 = vmatpush.bf16.msrb.mxu2 %v2744_v47 }
 0xf00   : > { %2212 = vmatpush.bf16.msrb.mxu2 %v2743_v50 }
 0xf7e   : > { %v1995_v52 = vpop.f32.mrf.mxu2 }
 0xf7f   : > { %v1999_v53 = vpack.c.bf16 %v1995_v52, %v1995_v52 }
 0xf81   : > { %2692 = vmatmul.msk.bf16.vlgmr.msrb.gmra.mxu3 %vm1322_vm12, %v1999_v53 }
 0xf86   : > { %v1997_v55 = vpop.f32.mrf.mxu2 }
 0xf91   : > { %2693 = vmatmul.msk.bf16.vlgmr.msra.gmra.mxu3 %vm1322_vm12, %v2026_v18 }
0x1004   : > { %v2016_v57 = vpop.f32.mrf.mxu3 }
0x1005   : > { %v2021_v60 = vrot.slane %v2016_v57, 3 }
0x1007   : > { %v2023_v61 = vadd.f32 %v2021_v60, %v1928_v29  ;;  %v2024_v63 = vadd.f32 %v2021_v60, %v1929_v22  ;;  %v2694_v29 = vld [vmem:[%s3116_s13 + $0x1c] sm:$0x7] }
0x100c   : > { %v2018_v54 = vpop.f32.mrf.mxu3 }
0x1014   : > { %v2044_v1 = vpop.f32.mrf.mxu3 }
0x1015   : > { %v2048_v2 = vsel %vm1306_vm0, %v2044_v1, -1e+30 }
0x1016   : > { %v2049_v3 = vsel %vm1346_vm1, %v2048_v2, -inf }
0x1017   : > { %2050 = vmax.xlane.f32.xlu2 %v2049_v3 }
0x101c   : > { %v2046_v4 = vpop.f32.mrf.mxu3 }
0x108a   : > { %v2051_v5 = vpop.xlane.xlu2 %2050 }
0x108b   : > { %v2052_v6 = vsub.f32 %v2048_v2, %v2051_v5 }
0x108d   : > { %v2053_v8 = vmul.f32 1.442695, %v2052_v6  ;;  %v2804_v6 = vld [vmem:[%s3721_s5] ss:$0 sm:$0xff] }
0x108f   : > { %2842 = vpow2.f32 %v2053_v8 }
0x1095   : > { %v2843_v43 = vpop.eup %2842 }
0x1096   : > { %v2055_v9 = vsel %vm1346_vm1, %v2843_v43, 0.0 }
0x1097   : > { %2056 = vadd.xlane.f32.xlu0 %v2055_v9 }
0x110a   : > { %v2057_v14 = vpop.xlane.xlu0 %2056 }
0x110b   : > { %2844 = vrcp.f32 %v2057_v14  ;;  %v2069_v20 = vand.u32 2147483648, %v2057_v14  ;;  %v2067_v21 = vand.u32 2147483647, %v2057_v14  ;;  %vm2063_vm6 = vweird.f32 %v2057_v14 }
0x110d   : > { %v2070_v24 = vor.u32 1.1754944e-38, %v2069_v20  ;;  %vm2068_vm1 = vcmp.eq.f32.partialorder %v2067_v21, 8.507059e+37 }
0x1111   : > { %v2845_v11 = vpop.eup %2844 }
0x1112   : > { %v2059_v15 = vmul.f32 %v2845_v11, %v2057_v14  ;;  %vm2064_vm0 = vweird.f32 %v2845_v11 }
0x1113   : > { %vm2065_vm7 = vmor %vm2063_vm6, %vm2064_vm0 }
0x1114   : > { %v2060_v16 = vsub.f32 1.0, %v2059_v15 }
0x1116   : > { %v2061_v59 = vmul.f32 %v2845_v11, %v2060_v16 }
0x1118   : > { %v2062_v23 = vadd.f32 %v2845_v11, %v2061_v59  ;;  %v2806_v59 = vld [vmem:[%s3723_s7] ss:$0 sm:$0xff] }
0x111a   : > { %v2066_v25 = vsel %vm2065_vm7, %v2845_v11, %v2062_v23 }
0x111b   : > { %v2071_v26 = vsel %vm2068_vm1, %v2070_v24, %v2066_v25 }
0x111c   : > { %v2072_v28 = vmul.f32 %v2843_v43, %v2071_v26 }
0x111e   : > { %v2073_v22 = vpack.c.bf16 %v2072_v28, %v2072_v28 }
0x1120   : > { %v2076_v30 = vsel %vm3232_vm15, %v2073_v22, %v2694_v29  ;;  %2089 = vmatmul.bf16.vlgmr.msra.gmra.mxu1 %v2073_v22 }
0x1121   : > { %2695 = vst [vmem:[%s3116_s13 + $0x1c] sm:$0x7] %v2076_v30 }
0x119d   : > { %v2090_v31 = vpop.f32.mrf.mxu1 }
0x119e   : > { %v2094_v32 = vpack.c.bf16 %v2090_v31, %v2090_v31 }
0x11a0   : > { %2697 = vmatmul.msk.bf16.vlgmr.msra.gmra.mxu2 %vm1322_vm12, %v2094_v32 }
0x11a5   : > { %v2092_v33 = vpop.f32.mrf.mxu1 }
0x1223   : > { %v2111_v17 = vpop.f32.mrf.mxu2 }
0x1224   : > { %v2116_v0 = vrot.slane %v2111_v17, 3 }
0x1226   : > { %v2118_v34 = vadd.f32 %v2116_v0, %v2023_v61  ;;  %v2119_v62 = vadd.f32 %v2116_v0, %v2024_v63 }
0x1228   : > { %2121 = vst.msk [vmem:[#allocation2] sm:$0xe0] %vm2120_vm8, %v2118_v34 }
0x1229   : > { %2122 = vst.msk [vmem:[#allocation2 + $0x8] sm:$0x3] %vm1209_vm4, %v2119_v62 }
0x122b   : > { %v2113_v35 = vpop.f32.mrf.mxu2 }
0x122f   : > { %v3557_v36 = vld [vmem:[#allocation2] sm:$0xff] }
0x1230   : > { %v3559_v56 = vld [vmem:[#allocation2 + $0x8] sm:$0x3]  ;;  %v2127_v37 = vsel %vm1205_vm3, %v3557_v36, 0.0 }
0x1231   : > { %v2130_v38 = vsel %vm1209_vm4, %v3559_v56, 0.0  ;;  %2128 = vadd.xlane.f32.xlu1 %v2127_v37 }
0x1232   : > { %2131 = vadd.xlane.f32.xlu2 %v2130_v38 }
0x12a4   : > { %v2129_v39 = vpop.xlane.xlu1 %2128 }
0x12a5   : > { %v2132_v40 = vpop.xlane.xlu2 %2131  ;;  %v2133_v27 = vmul.f32 %v2129_v39, %v3198_v10 }
0x12a6   : > { %v2134_v41 = vmul.f32 %v2132_v40, %v3198_v10 }
0x12a7   : > { %v2135_v42 = vsub.f32 %v3557_v36, %v2133_v27 }
0x12a8   : > { %v2136_v7 = vsub.f32 %v3559_v56, %v2134_v41 }
0x12a9   : > { %v2137_v44 = vmul.f32 %v2135_v42, %v2135_v42 }
0x12aa   : > { %v2138_v45 = vmul.f32 %v2136_v7, %v2136_v7 }
0x12ab   : > { %v2139_v58 = vsel %vm1205_vm3, %v2137_v44, 0.0 }
0x12ac   : > { %2140 = vadd.xlane.f32.xlu2 %v2139_v58  ;;  %v2142_v46 = vsel %vm1209_vm4, %v2138_v45, 0.0 }
0x12b4   : > { %2143 = vadd.xlane.f32.xlu2 %v2142_v46 }
0x131f   : > { %v2141_v48 = vpop.xlane.xlu2 %2140 }
0x1320   : > { %v2145_v19 = vmul.f32 %v2141_v48, %v3198_v10 }
0x1322   : > { %v2147_v49 = vadd.f32 1e-05, %v2145_v19 }
0x1324   : > { %2846 = vrsqrt.f32 %v2147_v49  ;;  %vm2155_vm15 = vweird.f32 %v2147_v49 }
0x1327   : > { %v2144_v51 = vpop.xlane.xlu2 %2143 }
0x1328   : > { %v2146_v52 = vmul.f32 %v2144_v51, %v3198_v10 }
0x132a   : > { %v2847_v53 = vpop.eup %2846  ;;  %v2148_v55 = vadd.f32 1e-05, %v2146_v52 }
0x132b   : > { %v2150_v18 = vmul.f32 %v2847_v53, %v2147_v49  ;;  %vm2156_vm12 = vweird.f32 %v2847_v53 }
0x132c   : > { %2848 = vrsqrt.f32 %v2148_v55  ;;  %vm2157_vm9 = vmor %vm2155_vm15, %vm2156_vm12  ;;  %vm2165_vm11 = vweird.f32 %v2148_v55  ;;  %vm2320_vm12 = vcmask 130048  }
0x132d   : > { %v2151_v57 = vmul.f32 %v2847_v53, %v2150_v18 }
0x132f   : > { %v2152_v60 = vmul.f32 0.5, %v2151_v57 }
0x1331   : > { %v2153_v61 = vsub.f32 1.5, %v2152_v60 }
0x1332   : > { %v2849_v63 = vpop.eup %2848 }
0x1333   : > { %v2154_v54 = vmul.f32 %v2847_v53, %v2153_v61  ;;  %v2160_v1 = vmul.f32 %v2849_v63, %v2148_v55  ;;  %vm2166_vm10 = vweird.f32 %v2849_v63  ;;  %v2745_v55 = vld [vmem:[%s3110_s1] sm:$0xff] }
0x1334   : > { %vm2167_vm13 = vmor %vm2165_vm11, %vm2166_vm10  ;;  %2331 = vmatpush.bf16.msra.mxu0 %v2745_v55 }
0x1335   : > { %v2161_v2 = vmul.f32 %v2849_v63, %v2160_v1  ;;  %v2158_v3 = vsel %vm2157_vm9, %v2847_v53, %v2154_v54 }
0x1336   : > { %v2169_v8 = vmul.f32 %v2158_v3, %v2135_v42 }
0x1337   : > { %v2162_v4 = vmul.f32 0.5, %v2161_v2 }
0x1338   : > { %v2174_v13 = vmul.f32 %v2804_v6, %v2169_v8 }
0x1339   : > { %v2163_v5 = vsub.f32 1.5, %v2162_v4 }
0x133a   : > { %v2179_v15 = vadd.f32 %v2805_v12, %v2174_v13 }
0x133b   : > { %v2164_v43 = vmul.f32 %v2849_v63, %v2163_v5 }
0x133d   : > { %v2168_v9 = vsel %vm2167_vm13, %v2849_v63, %v2164_v43 }
0x133e   : > { %v2170_v14 = vmul.f32 %v2168_v9, %v2136_v7 }
0x1340   : > { %v2175_v11 = vmul.f32 %v2804_v6, %v2170_v14 }
0x1342   : > { %v2180_v16 = vadd.f32 %v2805_v12, %v2175_v11 }
0x1344   : > { %v2181_v20 = vpack.c.bf16 %v2180_v16, %v2179_v15 }
0x1346   : > { %2706 = vmatmul.msk.bf16.vlgmr.msrb.gmra.mxu2 %vm1205_vm3, %v2181_v20 }
0x13c9   : > { %v2214_v21 = vpop.f32.mrf.mxu2 }
0x13ca   : > { %v3591_v23 = vadd.f32 %v2806_v59, %v2214_v21 }
0x13cc   : > { %v3594_v24 = vmul.f32 0.70710677, %v3591_v23 }
0x13ce   : > { %v2223_v25 = vmul.f32 %v3594_v24, %v3594_v24 }
0x13d0   : > { %v2224_v26 = vmin.f32 %v2223_v25, 16.0 }
0x13d1   : > { %v2216_v28 = vpop.f32.mrf.mxu2 }
0x13d2   : > { %v2225_v29 = vmul.f32 2.1237322e-06, %v2224_v26  ;;  %v2236_v22 = vmul.f32 3.8918573e-05, %v2224_v26  ;;  %v3598_v30 = vadd.f32 %v2806_v59, %v2216_v28 }
0x13d4   : > { %v2226_v31 = vadd.f32 0.00028619796, %v2225_v29  ;;  %v2237_v32 = vadd.f32 0.001143296, %v2236_v22  ;;  %v3601_v33 = vmul.f32 0.70710677, %v3598_v30 }
0x13d6   : > { %v2238_v17 = vmul.f32 %v2237_v32, %v2224_v26  ;;  %v2263_v0 = vmul.f32 %v3601_v33, %v3601_v33  ;;  %v2227_v34 = vmul.f32 %v2226_v31, %v2224_v26 }
0x13d8   : > { %v2239_v62 = vadd.f32 0.014752088, %v2238_v17  ;;  %v2264_v35 = vmin.f32 %v2263_v0, 16.0  ;;  %v2228_v40 = vadd.f32 0.0036580483, %v2227_v34 }
0x13da   : > { %v2240_v37 = vmul.f32 %v2239_v62, %v2224_v26  ;;  %v2265_v38 = vmul.f32 2.1237322e-06, %v2264_v35  ;;  %v2276_v39 = vmul.f32 3.8918573e-05, %v2264_v35  ;;  %v2229_v45 = vmul.f32 %v2228_v40, %v2224_v26 }
0x13db   : > { %v2219_v40 = vmul.f32 0.5, %v3591_v23 }
0x13dc   : > { %v2241_v27 = vadd.f32 0.112945676, %v2240_v37  ;;  %v2266_v41 = vadd.f32 0.00028619796, %v2265_v38  ;;  %v2277_v42 = vadd.f32 0.001143296, %v2276_v39 }
0x13dd   : > { %v2230_v50 = vadd.f32 0.05243302, %v2229_v45 }
0x13de   : > { %v2242_v44 = vmul.f32 %v2241_v27, %v2224_v26  ;;  %v2267_v7 = vmul.f32 %v2266_v41, %v2264_v35  ;;  %v2278_v58 = vmul.f32 %v2277_v42, %v2264_v35  ;;  %v2220_v27 = vmul.f32 0.5, %v3598_v30 }
0x13df   : > { %v2231_v57 = vmul.f32 %v2230_v50, %v2224_v26 }
0x13e0   : > { %v2243_v46 = vadd.f32 0.4994258, %v2242_v44  ;;  %v2268_v47 = vadd.f32 0.0036580483, %v2267_v7  ;;  %v2279_v48 = vadd.f32 0.014752088, %v2278_v58 }
0x13e1   : > { %v2232_v1 = vadd.f32 0.18741608, %v2231_v57 }
0x13e2   : > { %v2244_v19 = vmul.f32 %v2243_v46, %v2224_v26  ;;  %v2280_v49 = vmul.f32 %v2279_v48, %v2264_v35  ;;  %v2269_v52 = vmul.f32 %v2268_v47, %v2264_v35 }
0x13e3   : > { %v2233_v6 = vmul.f32 %v2232_v1, %v2224_v26 }
0x13e4   : > { %v2245_v51 = vadd.f32 1.0, %v2244_v19  ;;  %v2281_v53 = vadd.f32 0.112945676, %v2280_v49  ;;  %v2270_v60 = vadd.f32 0.05243302, %v2269_v52 }
0x13e5   : > { %v2234_v14 = vadd.f32 1.1283791, %v2233_v6 }
0x13e6   : > { %2850 = vrcp.f32 %v2245_v51  ;;  %v2282_v18 = vmul.f32 %v2281_v53, %v2264_v35  ;;  %v2271_v3 = vmul.f32 %v2270_v60, %v2264_v35  ;;  %v2257_v43 = vand.u32 2147483648, %v2245_v51 }
0x13e7   : > { %v2255_v12 = vand.u32 2147483647, %v2245_v51  ;;  %vm2251_vm2 = vweird.f32 %v2245_v51  ;;  %v2235_v25 = vmul.f32 %v2234_v14, %v3594_v24 }
0x13e8   : > { %v2283_v61 = vadd.f32 0.4994258, %v2282_v18  ;;  %v2272_v9 = vadd.f32 0.18741608, %v2271_v3  ;;  %v2258_v16 = vor.u32 1.1754944e-38, %v2257_v43 }
0x13e9   : > { %vm2256_vm0 = vcmp.eq.f32.partialorder %v2255_v12, 8.507059e+37 }
0x13ea   : > { %v2284_v63 = vmul.f32 %v2283_v61, %v2264_v35  ;;  %v2273_v20 = vmul.f32 %v2272_v9, %v2264_v35 }
0x13ec   : > { %v2851_v54 = vpop.eup %2850  ;;  %v2285_v4 = vadd.f32 1.0, %v2284_v63  ;;  %v2274_v26 = vadd.f32 1.1283791, %v2273_v20 }
0x13ed   : > { %v2247_v2 = vmul.f32 %v2851_v54, %v2245_v51  ;;  %vm2252_vm14 = vweird.f32 %v2851_v54 }
0x13ee   : > { %2852 = vrcp.f32 %v2285_v4  ;;  %vm2253_vm5 = vmor %vm2251_vm2, %vm2252_vm14  ;;  %v2297_v29 = vand.u32 2147483648, %v2285_v4  ;;  %v2295_v32 = vand.u32 2147483647, %v2285_v4  ;;  %vm2291_vm7 = vweird.f32 %v2285_v4 }
0x13ef   : > { %v2248_v5 = vsub.f32 1.0, %v2247_v2  ;;  %v2275_v62 = vmul.f32 %v2274_v26, %v3601_v33  ;;  %v2807_v33 = vld [vmem:[%s3724_s20] ss:$0 sm:$0xff] }
0x13f0   : > { %v2298_v0 = vor.u32 1.1754944e-38, %v2297_v29  ;;  %vm2296_vm8 = vcmp.eq.f32.partialorder %v2295_v32, 8.507059e+37 }
0x13f1   : > { %v2249_v8 = vmul.f32 %v2851_v54, %v2248_v5 }
0x13f3   : > { %v2250_v13 = vadd.f32 %v2851_v54, %v2249_v8 }
0x13f4   : > { %v2853_v11 = vpop.eup %2852 }
0x13f5   : > { %v2254_v15 = vsel %vm2253_vm5, %v2851_v54, %v2250_v13  ;;  %v2287_v59 = vmul.f32 %v2853_v11, %v2285_v4  ;;  %vm2292_vm6 = vweird.f32 %v2853_v11 }
0x13f6   : > { %v2259_v21 = vsel %vm2256_vm0, %v2258_v16, %v2254_v15  ;;  %vm2293_vm1 = vmor %vm2291_vm7, %vm2292_vm6 }
0x13f7   : > { %v2288_v28 = vsub.f32 1.0, %v2287_v59  ;;  %v2260_v22 = vmul.f32 %v2259_v21, %v2235_v25 }
0x13f9   : > { %v2289_v31 = vmul.f32 %v2853_v11, %v2288_v28  ;;  %v2707_v34 = vclamps-f32 %v2260_v22, 1.0 }
0x13fb   : > { %v2290_v17 = vadd.f32 %v2853_v11, %v2289_v31  ;;  %v2303_v24 = vadd.f32 1.0, %v2707_v34 }
0x13fd   : > { %v2294_v35 = vsel %vm2293_vm1, %v2853_v11, %v2290_v17  ;;  %v2305_v42 = vmul.f32 %v2303_v24, %v2219_v40 }
0x13fe   : > { %v2299_v37 = vsel %vm2296_vm8, %v2298_v0, %v2294_v35 }
0x13ff   : > { %v2300_v38 = vmul.f32 %v2299_v37, %v2275_v62 }
0x1401   : > { %v2708_v39 = vclamps-f32 %v2300_v38, 1.0 }
0x1403   : > { %v2304_v41 = vadd.f32 1.0, %v2708_v39 }
0x1405   : > { %v2306_v44 = vmul.f32 %v2304_v41, %v2220_v27 }
0x1407   : > { %v2307_v7 = vpack.c.bf16 %v2306_v44, %v2305_v42 }
0x1409   : > { %2713 = vmatmul.msk.bf16.vlgmr.msra.gmra.mxu0 %vm2320_vm12, %v2307_v7 }
0x1486   : > { %v2333_v58 = vpop.f32.mrf.mxu0 }
0x1487   : > { %v2334_v45 = vadd.f32 %v2807_v33, %v2333_v58 }
0x1489   : > { %v2338_v46 = vadd.f32 %v2334_v45, %v3557_v36 }
0x148b   : > { %2340 = vst.msk [vmem:[#allocation2] sm:$0xff] %vm1205_vm3, %v2338_v46 }
0x148e   : > { %v2335_v23 = vpop.f32.mrf.mxu0 }
0x148f   : > { %v2336_v47 = vadd.f32 %v2807_v33, %v2335_v23  ;;  %2345 = sbr.rel (%p2714_p5) target bundleno = 5675 (0x162b), region = 124 }
0x1491   : > { %v2339_v30 = vadd.f32 %v2336_v47, %v3559_v56 }
0x1493   : > { %2341 = vst.msk [vmem:[#allocation2 + $0x8] sm:$0x3] %vm1209_vm4, %v2339_v30 }
0x1494   : > { %v2347_v48 = vrot.slane %v2338_v46, 4  ;;  %vm2349_vm15 = vcmask 1040384   ;;  %v2747_v56 = vld [vmem:[%s3669_s22 + $0x8] sm:$0xff]  ;;  %v2746_v55 = vld [vmem:[%s3669_s22] sm:$0xff]  ;;  %vm2420_vm11 = vcmask 74752  }
0x1495   : > { %2413 = vmatpush.bf16.msra.mxu0 %v2747_v56  ;;  %v2855_v4 = vld [vmem:[%s3725_s23] ss:$0 sm:$0xff] }
0x1496   : > { %v2350_v19 = vsel %vm2349_vm15, %v2338_v46, %v2347_v48  ;;  %v2857_v12 = vld [vmem:[%s3727_s8] ss:$0 sm:$0xff] }
0x1497   : > { %v2353_v49 = vsel %vm1209_vm4, %v2350_v19, 0.0 }
0x1498   : > { %2354 = vadd.xlane.f32.xlu0 %v2353_v49 }
0x1499   : > { %2414 = vmatpush.bf16.msra.mxu0 %v2746_v55 }
0x150b   : > { %v2355_v50 = vpop.xlane.xlu0 %2354 }
0x150c   : > { %v2356_v36 = vmul.f32 %v2355_v50, %v3198_v10 }
0x150e   : > { %v2357_v51 = vsub.f32 %v2350_v19, %v2356_v36 }
0x1510   : > { %v2358_v52 = vmul.f32 %v2357_v51, %v2357_v51 }
0x1512   : > { %v2359_v53 = vsel %vm1209_vm4, %v2358_v52, 0.0 }
0x1513   : > { %2360 = vadd.xlane.f32.xlu0 %v2359_v53 }
0x1586   : > { %v2361_v18 = vpop.xlane.xlu0 %2360 }
0x1587   : > { %v2362_v57 = vmul.f32 %v2361_v18, %v3198_v10  ;;  %v2856_v10 = vld [vmem:[%s3726_s0] ss:$0 sm:$0xff] }
0x1589   : > { %v2363_v60 = vadd.f32 1e-05, %v2362_v57 }
0x158b   : > { %2858 = vrsqrt.f32 %v2363_v60  ;;  %vm2370_vm9 = vweird.f32 %v2363_v60 }
0x1591   : > { %v2859_v61 = vpop.eup %2858 }
0x1592   : > { %v2365_v63 = vmul.f32 %v2859_v61, %v2363_v60  ;;  %vm2371_vm4 = vweird.f32 %v2859_v61 }
0x1593   : > { %vm2372_vm10 = vmor %vm2370_vm9, %vm2371_vm4 }
0x1594   : > { %v2366_v54 = vmul.f32 %v2859_v61, %v2365_v63 }
0x1596   : > { %v2367_v1 = vmul.f32 0.5, %v2366_v54 }
0x1598   : > { %v2368_v2 = vsub.f32 1.5, %v2367_v1 }
0x159a   : > { %v2369_v3 = vmul.f32 %v2859_v61, %v2368_v2 }
0x159c   : > { %v2373_v5 = vsel %vm2372_vm10, %v2859_v61, %v2369_v3 }
0x159d   : > { %v2374_v6 = vmul.f32 %v2373_v5, %v2357_v51 }
0x159f   : > { %v2378_v8 = vmul.f32 %v2855_v4, %v2374_v6 }
0x15a1   : > { %v2382_v43 = vadd.f32 %v2856_v10, %v2378_v8 }
0x15a3   : > { %v2383_v9 = vpack.c.bf16 %v2382_v43, %v2382_v43 }
0x15a5   : > { %2723 = vmatmul.msk.bf16.vlgmr.msra.gmra.mxu0 %vm1205_vm3, %v2383_v9 }
0x1622   : > { %v2416_v13 = vpop.f32.mrf.mxu0 }
0x1623   : > { %v2417_v14 = vadd.f32 %v2857_v12, %v2416_v13 }
0x1625   : > { %2421 = vst.msk [vmem:[#allocation3] sm:$0x3] %vm2420_vm11, %v2417_v14 }
0x162a   : > { %v2418_v11 = vpop.f32.mrf.mxu0 }
0x162b PF: > { %p2752_p6 = scmp.eq.s32.totalorder %s3052_s2, 1  ;;  %s2915_s7 = smov [#allocation3]  }
0x162c   : > { %s2433_s1 = sshll.u32 %s2915_s7, 4  ;;  %s3728_s6 = sld [smem:[#allocation23_spill]]  ;;  %s2434_s1 = int_to_ptr.vmem [resolvable:$true] %s2433_s1 }
0x1632   : > { %s2435_s12 = sshll.u32 %s3728_s6, 4  ;;  %s2436_s12 = int_to_ptr.hbm [resolvable:$true] %s2435_s12 }
0x1633   : > { %2749 = dma.vmem_to_hbm [thread:$0]  (%p2752_p6), %s2434_s1, 32, %s2436_s12, [#allocation4]  }
0x1634   : > { %2893 = dma.done.wait (%p2752_p6), [#allocation4], 32  }
0x1635   : > { %2895 = vsyncadd (%p2752_p6), [#allocation4], 4294967264 }
0x1636 PF: > { %s3729_s30 = sld [smem:[#allocation6_spill]] }
0x163c   : > { %s37_s29 = sadd.s32 1, %s3729_s30  }
0x163d   : > { %p34_p7 = scmp.ge.s32.totalorder %s37_s29, 4  }
0x163f   :  { %36 = sbr.rel (!%p34_p7) target bundleno = 19 (0x13), region = 204 }
0x1644   :  { %2460 = vsyncpa [#allocation4], 1 }
0x1645   :  { %2462 = vsyncpa [#allocation4 + $0x1], 1 }

</bundles_post_ra>
